<compile_context>
chip_gen: v7x
topology: tpu7x:2x2x1
jax: 0.10.0
libtpu: 0.0.40
codegen_flags: <defaults>
</compile_context>

<pallas_src>
import functools

import jax
import jax.numpy as jnp
from jax.experimental import pallas as pl
from jax.experimental.pallas import tpu as pltpu


# ----------------------------- Pallas kernel --------------------------------
def lstm_fc_kernel(ids_ref,    # (T*Bp, 1) int32  time-major token ids (batch-padded)
                   embw_ref,   # (V, 8*Hp) f32    emb @ Wih0, placed in layer-0 gate slots
                   bcomb_ref,  # (1, 8*Hp) f32    b0 in layer-0 slots, b1 in layer-1 slots
                   wblk_ref,   # (2*Hp, 8*Hp) bf16  wavefront block weight [[Whh0,Wih1],[0,Whh1]]
                   fcw_ref,    # (Hp, Vpad) bf16
                   fcb_ref,    # (1, Vpad) f32
                   out_ref,    # (Bp, Vpad) f32
                   *, T, Bp, Hp, V):
    # ---- Embedding gather + layer-0 input projection: fused, hoisted. ----
    # one-hot @ (emb @ Wih0) is exact row selection done on the MXU.
    # TODO(synk): at realistic vocab sizes, DMA-gather embedding rows instead
    #             of building a (T*Bp, V) one-hot.
    ids = ids_ref[...]                                           # (T*Bp, 1)
    iota = jax.lax.broadcasted_iota(jnp.int32, (T * Bp, V), 1)
    onehot = (ids == iota).astype(jnp.float32)                   # (T*Bp, V)
    xg_all = (jnp.dot(onehot, embw_ref[...],
                      preferred_element_type=jnp.float32)
              + bcomb_ref[...])                                  # (T*Bp, 8*Hp)

    wblk = wblk_ref[...]
    bcomb = bcomb_ref[...]

    zeros = jnp.zeros((Bp, Hp), jnp.float32)
    h0, c0, h1, c1 = zeros, zeros, zeros, zeros

    # Wavefront recurrence: step s computes layer-0 gates for time s and
    # layer-1 gates for time s-1 with a single bf16 matmul (f32 accum).
    # Gate lane slots (Hp lanes each): [i0 f0 o0 i1 f1 o1 | g0 g1].
    # TODO(synk): switch to lax.fori_loop(..., unroll=k) if T grows large.
    for s in range(T + 1):
        h_cat = jnp.concatenate([h0, h1], axis=1).astype(jnp.bfloat16)  # (Bp, 2Hp)
        g = jnp.dot(h_cat, wblk, preferred_element_type=jnp.float32)    # (Bp, 8Hp)
        g = g + (xg_all[s * Bp:(s + 1) * Bp, :] if s < T else bcomb)
        sg = jax.nn.sigmoid(g[:, 0:6 * Hp])      # one contiguous sigmoid slab
        tg = jnp.tanh(g[:, 6 * Hp:8 * Hp])       # one contiguous tanh slab
        if s < T:          # layer-0 cell update for timestep s
            c0 = sg[:, Hp:2 * Hp] * c0 + sg[:, 0:Hp] * tg[:, 0:Hp]
            h0 = sg[:, 2 * Hp:3 * Hp] * jnp.tanh(c0)
        if s >= 1:         # layer-1 cell update for timestep s-1
            c1 = sg[:, 4 * Hp:5 * Hp] * c1 + sg[:, 3 * Hp:4 * Hp] * tg[:, Hp:2 * Hp]
            h1 = sg[:, 5 * Hp:6 * Hp] * jnp.tanh(c1)

    # Final FC on the last timestep's top-layer hidden state (lane-dense store,
    # Vpad is a multiple of 128).
    out_ref[...] = (jnp.dot(h1.astype(jnp.bfloat16), fcw_ref[...],
                            preferred_element_type=jnp.float32)
                    + fcb_ref[...])


# ----------------------- One-time parameter preparation ----------------------
def prepare_params(params):
    """Gate-slot placement, wavefront block weight, H->Hp lane padding,
    fc lane padding, and bf16 casts of the MXU operands."""
    H = params["whh0"].shape[0]
    V, _E = params["embed"].shape
    Vout = params["fcw"].shape[1]
    Hp = ((H + 127) // 128) * 128
    Vpad = ((Vout + 127) // 128) * 128

    # torch gate order along the 4H axis is (i, f, g, o).
    def place(w, layer):
        """(rows, 4H) -> (rows, 8*Hp): scatter gates into wavefront lane slots."""
        gi, gf, gg, go = (w[:, 0:H], w[:, H:2 * H], w[:, 2 * H:3 * H], w[:, 3 * H:4 * H])
        slots = ({0: gi, 1: gf, 2: go, 6: gg} if layer == 0
                 else {3: gi, 4: gf, 5: go, 7: gg})
        out = jnp.zeros((w.shape[0], 8 * Hp), jnp.float32)
        for s, blk in slots.items():
            out = out.at[:, s * Hp:s * Hp + H].set(blk)
        return out

    # Hoisted "gathered input projection" table: row v = emb[v] @ Wih0 in the
    # layer-0 slots (zeros in layer-1 slots).  Kept f32 so the in-kernel
    # one-hot selection is exact.
    embw = jnp.dot(params["embed"], place(params["wih0"], 0))           # (V, 8Hp)
    bcomb = place(params["b0"], 0) + place(params["b1"], 1)             # (1, 8Hp)

    # Wavefront block weight [[Whh0, Wih1], [0, Whh1]] with rows padded H->Hp.
    top = place(params["whh0"], 0) + place(params["wih1"], 1)           # (H, 8Hp)
    bot = place(params["whh1"], 1)                                      # (H, 8Hp)
    wblk = (jnp.zeros((2 * Hp, 8 * Hp), jnp.float32)
            .at[0:H].set(top)
            .at[Hp:Hp + H].set(bot)).astype(jnp.bfloat16)

    fcw = (jnp.zeros((Hp, Vpad), jnp.float32)
           .at[:H, :Vout].set(params["fcw"])).astype(jnp.bfloat16)
    fcb = jnp.pad(params["fcb"], ((0, 0), (0, Vpad - Vout)))

    return {"embw": embw, "bcomb": bcomb, "wblk": wblk, "fcw": fcw, "fcb": fcb}


# ------------------------------ Wrapper --------------------------------------
@functools.partial(jax.jit, static_argnames=("vocab_size",))
def lstm_model_forward(tokens, kparams, *, vocab_size):
    """tokens: (B, T) int32 token ids.  Returns logits (B, vocab_size)."""
    B, T = tokens.shape
    Bp = ((B + 7) // 8) * 8                      # sublane-align the batch
    V = kparams["embw"].shape[0]
    Hp = kparams["wblk"].shape[0] // 2
    Vpad = kparams["fcw"].shape[1]

    # Tiny int-only prep; the embedding gather itself happens inside the kernel.
    ids = jnp.pad(tokens, ((0, Bp - B), (0, 0))).T.reshape(T * Bp, 1)

    vmem = pl.BlockSpec(memory_space=pltpu.MemorySpace.VMEM)
    kernel = functools.partial(lstm_fc_kernel, T=T, Bp=Bp, Hp=Hp, V=V)

    # TODO(synk): at realistic batch sizes add a batch grid axis with
    #             dimension_semantics=("parallel",) to use v7x's second
    #             TensorCore, and tile the FC over vocab-lane blocks with an
    #             explicit vmem_limit_bytes so (Hp, Vpad) fits v7x's 64 MiB VMEM.
    out = pl.pallas_call(
        kernel,
        out_shape=jax.ShapeDtypeStruct((Bp, Vpad), jnp.float32),
        in_specs=[vmem] * 6,
        out_specs=vmem,
    )(ids, kparams["embw"], kparams["bcomb"], kparams["wblk"],
      kparams["fcw"], kparams["fcb"])
    return out[:B, :vocab_size]


# -------------------------- Deterministic params -----------------------------
def init_params(key, vocab_size, embed_size, hidden_size):
    ks = jax.random.split(key, 12)
    s = 1.0 / jnp.sqrt(hidden_size)

    def u(k, shape):
        return jax.random.uniform(k, shape, jnp.float32, -s, s)

    H, E, V = hidden_size, embed_size, vocab_size
    # PyTorch stores W_ih as (4H, in); we keep the transposed (in, 4H) layout,
    # gate blocks in torch order (i, f, g, o); biases b_ih + b_hh combined.
    params = {
        "embed": jax.random.normal(ks[0], (V, E), jnp.float32),
        "wih0": u(ks[1], (E, 4 * H)),
        "whh0": u(ks[2], (H, 4 * H)),
        "b0": u(ks[3], (1, 4 * H)) + u(ks[4], (1, 4 * H)),
        "wih1": u(ks[5], (H, 4 * H)),
        "whh1": u(ks[6], (H, 4 * H)),
        "b1": u(ks[7], (1, 4 * H)) + u(ks[8], (1, 4 * H)),
        "fcw": u(ks[9], (H, V)),
        "fcb": u(ks[10], (1, V)),
    }
    return params


# ----------------------------- Pure-JAX reference ----------------------------
def reference_forward(tokens, params):
    x = jnp.take(params["embed"], tokens, axis=0)   # (B, T, E)
    B, T, _ = x.shape
    H = params["whh0"].shape[0]

    def cell(x_t, h, c, wih, whh, b):
        g = x_t @ wih + h @ whh + b
        i = jax.nn.sigmoid(g[:, 0:H])
        f = jax.nn.sigmoid(g[:, H:2 * H])
        gg = jnp.tanh(g[:, 2 * H:3 * H])
        o = jax.nn.sigmoid(g[:, 3 * H:4 * H])
        c = f * c + i * gg
        h = o * jnp.tanh(c)
        return h, c

    h0 = c0 = h1 = c1 = jnp.zeros((B, H), jnp.float32)
    for t in range(T):
        x_t = x[:, t, :]
        h0, c0 = cell(x_t, h0, c0, params["wih0"], params["whh0"], params["b0"])
        h1, c1 = cell(h0, h1, c1, params["wih1"], params["whh1"], params["b1"])
    return h1 @ params["fcw"] + params["fcb"]


# --------------------------------- Main ---------------------------------------
if __name__ == "__main__":
    vocab_size = 64
    embed_size = 32
    hidden_size = 32
    num_layers = 2          # kernel hard-codes a 2-layer wavefront, matching this config
    batch = 2
    seq = 8

    key = jax.random.PRNGKey(0)
    k_tok, k_param = jax.random.split(key)

    tokens = jax.random.randint(k_tok, (batch, seq), 0, vocab_size, dtype=jnp.int32)
    params = init_params(k_param, vocab_size, embed_size, hidden_size)
    kparams = prepare_params(params)            # one-time place / stack / pad / bf16

    logits = lstm_model_forward(tokens, kparams, vocab_size=vocab_size)
    logits = jax.block_until_ready(logits)

    ref = reference_forward(tokens, params)
    assert logits.shape == (batch, vocab_size)
    # Tolerance loosened vs. the f32 reference because MXU operands are bf16
    # (f32 accumulation); observed error is O(1e-2) at these sizes.
    assert jnp.allclose(logits, ref, rtol=5e-2, atol=5e-2), "mismatch vs JAX reference"

    print("KERNEL_OK")
</pallas_src>

<mosaic_0001>
module attributes {stable_mosaic.version = 11 : i64} {
  func.func @lstm_fc_kernel(%arg0: memref<64x1xi32, #tpu.memory_space<vmem>>, %arg1: memref<64x1024xf32, #tpu.memory_space<vmem>>, %arg2: memref<1x1024xf32, #tpu.memory_space<vmem>>, %arg3: memref<256x1024xbf16, #tpu.memory_space<vmem>>, %arg4: memref<128x128xbf16, #tpu.memory_space<vmem>>, %arg5: memref<1x128xf32, #tpu.memory_space<vmem>>, %arg6: memref<8x128xf32, #tpu.memory_space<vmem>>) attributes {dimension_semantics = [], scalar_prefetch = 0 : i64, scratch_operands = 0 : i64, tpu.core_type = #tpu.core_type<tc>} {
    %c0 = arith.constant 0 : index
    %c0_0 = arith.constant 0 : index
    %0 = vector.load %arg0[%c0, %c0_0] : memref<64x1xi32, #tpu.memory_space<vmem>>, vector<64x1xi32>
    %1 = tpu.iota {dimensions = array<i32: 1>} : vector<64x64xi32>
    %2 = vector.broadcast %0 : vector<64x1xi32> to vector<64x64xi32>
    %3 = arith.cmpi eq, %2, %1 : vector<64x64xi32>
    %4 = arith.extui %3 : vector<64x64xi1> to vector<64x64xi32>
    %5 = arith.sitofp %4 : vector<64x64xi32> to vector<64x64xf32>
    %c0_1 = arith.constant 0 : index
    %c0_2 = arith.constant 0 : index
    %6 = vector.load %arg1[%c0_1, %c0_2] : memref<64x1024xf32, #tpu.memory_space<vmem>>, vector<64x1024xf32>
    %cst = arith.constant dense<0.000000e+00> : vector<64x1024xf32>
    %7 = tpu.matmul %5, %6, %cst {dimension_numbers = #tpu.dot_dimension_numbers<[1], [0], [0], [1], [0, 0, 1, 1], [], []>} : vector<64x64xf32>, vector<64x1024xf32>, vector<64x1024xf32> -> vector<64x1024xf32>
    %c0_3 = arith.constant 0 : index
    %c0_4 = arith.constant 0 : index
    %8 = vector.load %arg2[%c0_3, %c0_4] : memref<1x1024xf32, #tpu.memory_space<vmem>>, vector<1x1024xf32>
    %9 = vector.broadcast %8 : vector<1x1024xf32> to vector<64x1024xf32>
    %10 = arith.addf %7, %9 : vector<64x1024xf32>
    %c0_5 = arith.constant 0 : index
    %c0_6 = arith.constant 0 : index
    %11 = vector.load %arg3[%c0_5, %c0_6] : memref<256x1024xbf16, #tpu.memory_space<vmem>>, vector<256x1024xbf16>
    %c0_7 = arith.constant 0 : index
    %c0_8 = arith.constant 0 : index
    %12 = vector.load %arg2[%c0_7, %c0_8] : memref<1x1024xf32, #tpu.memory_space<vmem>>, vector<1x1024xf32>
    %cst_9 = arith.constant 0.000000e+00 : f32
    %13 = vector.broadcast %cst_9 : f32 to vector<8x128xf32>
    %14 = tpu.concatenate %13, %13 in 1 : vector<8x128xf32>, vector<8x128xf32> -> vector<8x256xf32>
    %15 = arith.truncf %14 : vector<8x256xf32> to vector<8x256xbf16>
    %cst_10 = arith.constant dense<0.000000e+00> : vector<8x1024xf32>
    %16 = tpu.matmul %15, %11, %cst_10 {dimension_numbers = #tpu.dot_dimension_numbers<[1], [0], [0], [1], [0, 0, 1, 1], [], []>} : vector<8x256xbf16>, vector<256x1024xbf16>, vector<8x1024xf32> -> vector<8x1024xf32>
    %17 = vector.extract_strided_slice %10 {offsets = [0, 0], sizes = [8, 1024], strides = [1, 1]} : vector<64x1024xf32> to vector<8x1024xf32>
    %18 = arith.addf %16, %17 : vector<8x1024xf32>
    %19 = vector.extract_strided_slice %18 {offsets = [0, 0], sizes = [8, 768], strides = [1, 1]} : vector<8x1024xf32> to vector<8x768xf32>
    %20 = arith.negf %19 : vector<8x768xf32>
    %21 = math.exp %20 : vector<8x768xf32>
    %cst_11 = arith.constant 1.000000e+00 : f32
    %22 = vector.broadcast %cst_11 : f32 to vector<8x768xf32>
    %23 = arith.addf %22, %21 : vector<8x768xf32>
    %24 = arith.divf %22, %23 : vector<8x768xf32>
    %25 = vector.extract_strided_slice %18 {offsets = [0, 768], sizes = [8, 256], strides = [1, 1]} : vector<8x1024xf32> to vector<8x256xf32>
    %26 = math.tanh %25 : vector<8x256xf32>
    %27 = vector.extract_strided_slice %24 {offsets = [0, 128], sizes = [8, 128], strides = [1, 1]} : vector<8x768xf32> to vector<8x128xf32>
    %28 = arith.mulf %27, %13 : vector<8x128xf32>
    %29 = vector.extract_strided_slice %24 {offsets = [0, 0], sizes = [8, 128], strides = [1, 1]} : vector<8x768xf32> to vector<8x128xf32>
    %30 = vector.extract_strided_slice %26 {offsets = [0, 0], sizes = [8, 128], strides = [1, 1]} : vector<8x256xf32> to vector<8x128xf32>
    %31 = arith.mulf %29, %30 : vector<8x128xf32>
    %32 = arith.addf %28, %31 : vector<8x128xf32>
    %33 = vector.extract_strided_slice %24 {offsets = [0, 256], sizes = [8, 128], strides = [1, 1]} : vector<8x768xf32> to vector<8x128xf32>
    %34 = math.tanh %32 : vector<8x128xf32>
    %35 = arith.mulf %33, %34 : vector<8x128xf32>
    %36 = tpu.concatenate %35, %13 in 1 : vector<8x128xf32>, vector<8x128xf32> -> vector<8x256xf32>
    %37 = arith.truncf %36 : vector<8x256xf32> to vector<8x256xbf16>
    %cst_12 = arith.constant dense<0.000000e+00> : vector<8x1024xf32>
    %38 = tpu.matmul %37, %11, %cst_12 {dimension_numbers = #tpu.dot_dimension_numbers<[1], [0], [0], [1], [0, 0, 1, 1], [], []>} : vector<8x256xbf16>, vector<256x1024xbf16>, vector<8x1024xf32> -> vector<8x1024xf32>
    %39 = vector.extract_strided_slice %10 {offsets = [8, 0], sizes = [8, 1024], strides = [1, 1]} : vector<64x1024xf32> to vector<8x1024xf32>
    %40 = arith.addf %38, %39 : vector<8x1024xf32>
    %41 = vector.extract_strided_slice %40 {offsets = [0, 0], sizes = [8, 768], strides = [1, 1]} : vector<8x1024xf32> to vector<8x768xf32>
    %42 = arith.negf %41 : vector<8x768xf32>
    %43 = math.exp %42 : vector<8x768xf32>
    %cst_13 = arith.constant 1.000000e+00 : f32
    %44 = vector.broadcast %cst_13 : f32 to vector<8x768xf32>
    %45 = arith.addf %44, %43 : vector<8x768xf32>
    %46 = arith.divf %44, %45 : vector<8x768xf32>
    %47 = vector.extract_strided_slice %40 {offsets = [0, 768], sizes = [8, 256], strides = [1, 1]} : vector<8x1024xf32> to vector<8x256xf32>
    %48 = math.tanh %47 : vector<8x256xf32>
    %49 = vector.extract_strided_slice %46 {offsets = [0, 128], sizes = [8, 128], strides = [1, 1]} : vector<8x768xf32> to vector<8x128xf32>
    %50 = arith.mulf %49, %32 : vector<8x128xf32>
    %51 = vector.extract_strided_slice %46 {offsets = [0, 0], sizes = [8, 128], strides = [1, 1]} : vector<8x768xf32> to vector<8x128xf32>
    %52 = vector.extract_strided_slice %48 {offsets = [0, 0], sizes = [8, 128], strides = [1, 1]} : vector<8x256xf32> to vector<8x128xf32>
    %53 = arith.mulf %51, %52 : vector<8x128xf32>
    %54 = arith.addf %50, %53 : vector<8x128xf32>
    %55 = vector.extract_strided_slice %46 {offsets = [0, 256], sizes = [8, 128], strides = [1, 1]} : vector<8x768xf32> to vector<8x128xf32>
    %56 = math.tanh %54 : vector<8x128xf32>
    %57 = arith.mulf %55, %56 : vector<8x128xf32>
    %58 = vector.extract_strided_slice %46 {offsets = [0, 512], sizes = [8, 128], strides = [1, 1]} : vector<8x768xf32> to vector<8x128xf32>
    %59 = arith.mulf %58, %13 : vector<8x128xf32>
    %60 = vector.extract_strided_slice %46 {offsets = [0, 384], sizes = [8, 128], strides = [1, 1]} : vector<8x768xf32> to vector<8x128xf32>
    %61 = vector.extract_strided_slice %48 {offsets = [0, 128], sizes = [8, 128], strides = [1, 1]} : vector<8x256xf32> to vector<8x128xf32>
    %62 = arith.mulf %60, %61 : vector<8x128xf32>
    %63 = arith.addf %59, %62 : vector<8x128xf32>
    %64 = vector.extract_strided_slice %46 {offsets = [0, 640], sizes = [8, 128], strides = [1, 1]} : vector<8x768xf32> to vector<8x128xf32>
    %65 = math.tanh %63 : vector<8x128xf32>
    %66 = arith.mulf %64, %65 : vector<8x128xf32>
    %67 = tpu.concatenate %57, %66 in 1 : vector<8x128xf32>, vector<8x128xf32> -> vector<8x256xf32>
    %68 = arith.truncf %67 : vector<8x256xf32> to vector<8x256xbf16>
    %cst_14 = arith.constant dense<0.000000e+00> : vector<8x1024xf32>
    %69 = tpu.matmul %68, %11, %cst_14 {dimension_numbers = #tpu.dot_dimension_numbers<[1], [0], [0], [1], [0, 0, 1, 1], [], []>} : vector<8x256xbf16>, vector<256x1024xbf16>, vector<8x1024xf32> -> vector<8x1024xf32>
    %70 = vector.extract_strided_slice %10 {offsets = [16, 0], sizes = [8, 1024], strides = [1, 1]} : vector<64x1024xf32> to vector<8x1024xf32>
    %71 = arith.addf %69, %70 : vector<8x1024xf32>
    %72 = vector.extract_strided_slice %71 {offsets = [0, 0], sizes = [8, 768], strides = [1, 1]} : vector<8x1024xf32> to vector<8x768xf32>
    %73 = arith.negf %72 : vector<8x768xf32>
    %74 = math.exp %73 : vector<8x768xf32>
    %cst_15 = arith.constant 1.000000e+00 : f32
    %75 = vector.broadcast %cst_15 : f32 to vector<8x768xf32>
    %76 = arith.addf %75, %74 : vector<8x768xf32>
    %77 = arith.divf %75, %76 : vector<8x768xf32>
    %78 = vector.extract_strided_slice %71 {offsets = [0, 768], sizes = [8, 256], strides = [1, 1]} : vector<8x1024xf32> to vector<8x256xf32>
    %79 = math.tanh %78 : vector<8x256xf32>
    %80 = vector.extract_strided_slice %77 {offsets = [0, 128], sizes = [8, 128], strides = [1, 1]} : vector<8x768xf32> to vector<8x128xf32>
    %81 = arith.mulf %80, %54 : vector<8x128xf32>
    %82 = vector.extract_strided_slice %77 {offsets = [0, 0], sizes = [8, 128], strides = [1, 1]} : vector<8x768xf32> to vector<8x128xf32>
    %83 = vector.extract_strided_slice %79 {offsets = [0, 0], sizes = [8, 128], strides = [1, 1]} : vector<8x256xf32> to vector<8x128xf32>
    %84 = arith.mulf %82, %83 : vector<8x128xf32>
    %85 = arith.addf %81, %84 : vector<8x128xf32>
    %86 = vector.extract_strided_slice %77 {offsets = [0, 256], sizes = [8, 128], strides = [1, 1]} : vector<8x768xf32> to vector<8x128xf32>
    %87 = math.tanh %85 : vector<8x128xf32>
    %88 = arith.mulf %86, %87 : vector<8x128xf32>
    %89 = vector.extract_strided_slice %77 {offsets = [0, 512], sizes = [8, 128], strides = [1, 1]} : vector<8x768xf32> to vector<8x128xf32>
    %90 = arith.mulf %89, %63 : vector<8x128xf32>
    %91 = vector.extract_strided_slice %77 {offsets = [0, 384], sizes = [8, 128], strides = [1, 1]} : vector<8x768xf32> to vector<8x128xf32>
    %92 = vector.extract_strided_slice %79 {offsets = [0, 128], sizes = [8, 128], strides = [1, 1]} : vector<8x256xf32> to vector<8x128xf32>
    %93 = arith.mulf %91, %92 : vector<8x128xf32>
    %94 = arith.addf %90, %93 : vector<8x128xf32>
    %95 = vector.extract_strided_slice %77 {offsets = [0, 640], sizes = [8, 128], strides = [1, 1]} : vector<8x768xf32> to vector<8x128xf32>
    %96 = math.tanh %94 : vector<8x128xf32>
    %97 = arith.mulf %95, %96 : vector<8x128xf32>
    %98 = tpu.concatenate %88, %97 in 1 : vector<8x128xf32>, vector<8x128xf32> -> vector<8x256xf32>
    %99 = arith.truncf %98 : vector<8x256xf32> to vector<8x256xbf16>
    %cst_16 = arith.constant dense<0.000000e+00> : vector<8x1024xf32>
    %100 = tpu.matmul %99, %11, %cst_16 {dimension_numbers = #tpu.dot_dimension_numbers<[1], [0], [0], [1], [0, 0, 1, 1], [], []>} : vector<8x256xbf16>, vector<256x1024xbf16>, vector<8x1024xf32> -> vector<8x1024xf32>
    %101 = vector.extract_strided_slice %10 {offsets = [24, 0], sizes = [8, 1024], strides = [1, 1]} : vector<64x1024xf32> to vector<8x1024xf32>
    %102 = arith.addf %100, %101 : vector<8x1024xf32>
    %103 = vector.extract_strided_slice %102 {offsets = [0, 0], sizes = [8, 768], strides = [1, 1]} : vector<8x1024xf32> to vector<8x768xf32>
    %104 = arith.negf %103 : vector<8x768xf32>
    %105 = math.exp %104 : vector<8x768xf32>
    %cst_17 = arith.constant 1.000000e+00 : f32
    %106 = vector.broadcast %cst_17 : f32 to vector<8x768xf32>
    %107 = arith.addf %106, %105 : vector<8x768xf32>
    %108 = arith.divf %106, %107 : vector<8x768xf32>
    %109 = vector.extract_strided_slice %102 {offsets = [0, 768], sizes = [8, 256], strides = [1, 1]} : vector<8x1024xf32> to vector<8x256xf32>
    %110 = math.tanh %109 : vector<8x256xf32>
    %111 = vector.extract_strided_slice %108 {offsets = [0, 128], sizes = [8, 128], strides = [1, 1]} : vector<8x768xf32> to vector<8x128xf32>
    %112 = arith.mulf %111, %85 : vector<8x128xf32>
    %113 = vector.extract_strided_slice %108 {offsets = [0, 0], sizes = [8, 128], strides = [1, 1]} : vector<8x768xf32> to vector<8x128xf32>
    %114 = vector.extract_strided_slice %110 {offsets = [0, 0], sizes = [8, 128], strides = [1, 1]} : vector<8x256xf32> to vector<8x128xf32>
    %115 = arith.mulf %113, %114 : vector<8x128xf32>
    %116 = arith.addf %112, %115 : vector<8x128xf32>
    %117 = vector.extract_strided_slice %108 {offsets = [0, 256], sizes = [8, 128], strides = [1, 1]} : vector<8x768xf32> to vector<8x128xf32>
    %118 = math.tanh %116 : vector<8x128xf32>
    %119 = arith.mulf %117, %118 : vector<8x128xf32>
    %120 = vector.extract_strided_slice %108 {offsets = [0, 512], sizes = [8, 128], strides = [1, 1]} : vector<8x768xf32> to vector<8x128xf32>
    %121 = arith.mulf %120, %94 : vector<8x128xf32>
    %122 = vector.extract_strided_slice %108 {offsets = [0, 384], sizes = [8, 128], strides = [1, 1]} : vector<8x768xf32> to vector<8x128xf32>
    %123 = vector.extract_strided_slice %110 {offsets = [0, 128], sizes = [8, 128], strides = [1, 1]} : vector<8x256xf32> to vector<8x128xf32>
    %124 = arith.mulf %122, %123 : vector<8x128xf32>
    %125 = arith.addf %121, %124 : vector<8x128xf32>
    %126 = vector.extract_strided_slice %108 {offsets = [0, 640], sizes = [8, 128], strides = [1, 1]} : vector<8x768xf32> to vector<8x128xf32>
    %127 = math.tanh %125 : vector<8x128xf32>
    %128 = arith.mulf %126, %127 : vector<8x128xf32>
    %129 = tpu.concatenate %119, %128 in 1 : vector<8x128xf32>, vector<8x128xf32> -> vector<8x256xf32>
    %130 = arith.truncf %129 : vector<8x256xf32> to vector<8x256xbf16>
    %cst_18 = arith.constant dense<0.000000e+00> : vector<8x1024xf32>
    %131 = tpu.matmul %130, %11, %cst_18 {dimension_numbers = #tpu.dot_dimension_numbers<[1], [0], [0], [1], [0, 0, 1, 1], [], []>} : vector<8x256xbf16>, vector<256x1024xbf16>, vector<8x1024xf32> -> vector<8x1024xf32>
    %132 = vector.extract_strided_slice %10 {offsets = [32, 0], sizes = [8, 1024], strides = [1, 1]} : vector<64x1024xf32> to vector<8x1024xf32>
    %133 = arith.addf %131, %132 : vector<8x1024xf32>
    %134 = vector.extract_strided_slice %133 {offsets = [0, 0], sizes = [8, 768], strides = [1, 1]} : vector<8x1024xf32> to vector<8x768xf32>
    %135 = arith.negf %134 : vector<8x768xf32>
    %136 = math.exp %135 : vector<8x768xf32>
    %cst_19 = arith.constant 1.000000e+00 : f32
    %137 = vector.broadcast %cst_19 : f32 to vector<8x768xf32>
    %138 = arith.addf %137, %136 : vector<8x768xf32>
    %139 = arith.divf %137, %138 : vector<8x768xf32>
    %140 = vector.extract_strided_slice %133 {offsets = [0, 768], sizes = [8, 256], strides = [1, 1]} : vector<8x1024xf32> to vector<8x256xf32>
    %141 = math.tanh %140 : vector<8x256xf32>
    %142 = vector.extract_strided_slice %139 {offsets = [0, 128], sizes = [8, 128], strides = [1, 1]} : vector<8x768xf32> to vector<8x128xf32>
    %143 = arith.mulf %142, %116 : vector<8x128xf32>
    %144 = vector.extract_strided_slice %139 {offsets = [0, 0], sizes = [8, 128], strides = [1, 1]} : vector<8x768xf32> to vector<8x128xf32>
    %145 = vector.extract_strided_slice %141 {offsets = [0, 0], sizes = [8, 128], strides = [1, 1]} : vector<8x256xf32> to vector<8x128xf32>
    %146 = arith.mulf %144, %145 : vector<8x128xf32>
    %147 = arith.addf %143, %146 : vector<8x128xf32>
    %148 = vector.extract_strided_slice %139 {offsets = [0, 256], sizes = [8, 128], strides = [1, 1]} : vector<8x768xf32> to vector<8x128xf32>
    %149 = math.tanh %147 : vector<8x128xf32>
    %150 = arith.mulf %148, %149 : vector<8x128xf32>
    %151 = vector.extract_strided_slice %139 {offsets = [0, 512], sizes = [8, 128], strides = [1, 1]} : vector<8x768xf32> to vector<8x128xf32>
    %152 = arith.mulf %151, %125 : vector<8x128xf32>
    %153 = vector.extract_strided_slice %139 {offsets = [0, 384], sizes = [8, 128], strides = [1, 1]} : vector<8x768xf32> to vector<8x128xf32>
    %154 = vector.extract_strided_slice %141 {offsets = [0, 128], sizes = [8, 128], strides = [1, 1]} : vector<8x256xf32> to vector<8x128xf32>
    %155 = arith.mulf %153, %154 : vector<8x128xf32>
    %156 = arith.addf %152, %155 : vector<8x128xf32>
    %157 = vector.extract_strided_slice %139 {offsets = [0, 640], sizes = [8, 128], strides = [1, 1]} : vector<8x768xf32> to vector<8x128xf32>
    %158 = math.tanh %156 : vector<8x128xf32>
    %159 = arith.mulf %157, %158 : vector<8x128xf32>
    %160 = tpu.concatenate %150, %159 in 1 : vector<8x128xf32>, vector<8x128xf32> -> vector<8x256xf32>
    %161 = arith.truncf %160 : vector<8x256xf32> to vector<8x256xbf16>
    %cst_20 = arith.constant dense<0.000000e+00> : vector<8x1024xf32>
    %162 = tpu.matmul %161, %11, %cst_20 {dimension_numbers = #tpu.dot_dimension_numbers<[1], [0], [0], [1], [0, 0, 1, 1], [], []>} : vector<8x256xbf16>, vector<256x1024xbf16>, vector<8x1024xf32> -> vector<8x1024xf32>
    %163 = vector.extract_strided_slice %10 {offsets = [40, 0], sizes = [8, 1024], strides = [1, 1]} : vector<64x1024xf32> to vector<8x1024xf32>
    %164 = arith.addf %162, %163 : vector<8x1024xf32>
    %165 = vector.extract_strided_slice %164 {offsets = [0, 0], sizes = [8, 768], strides = [1, 1]} : vector<8x1024xf32> to vector<8x768xf32>
    %166 = arith.negf %165 : vector<8x768xf32>
    %167 = math.exp %166 : vector<8x768xf32>
    %cst_21 = arith.constant 1.000000e+00 : f32
    %168 = vector.broadcast %cst_21 : f32 to vector<8x768xf32>
    %169 = arith.addf %168, %167 : vector<8x768xf32>
    %170 = arith.divf %168, %169 : vector<8x768xf32>
    %171 = vector.extract_strided_slice %164 {offsets = [0, 768], sizes = [8, 256], strides = [1, 1]} : vector<8x1024xf32> to vector<8x256xf32>
    %172 = math.tanh %171 : vector<8x256xf32>
    %173 = vector.extract_strided_slice %170 {offsets = [0, 128], sizes = [8, 128], strides = [1, 1]} : vector<8x768xf32> to vector<8x128xf32>
    %174 = arith.mulf %173, %147 : vector<8x128xf32>
    %175 = vector.extract_strided_slice %170 {offsets = [0, 0], sizes = [8, 128], strides = [1, 1]} : vector<8x768xf32> to vector<8x128xf32>
    %176 = vector.extract_strided_slice %172 {offsets = [0, 0], sizes = [8, 128], strides = [1, 1]} : vector<8x256xf32> to vector<8x128xf32>
    %177 = arith.mulf %175, %176 : vector<8x128xf32>
    %178 = arith.addf %174, %177 : vector<8x128xf32>
    %179 = vector.extract_strided_slice %170 {offsets = [0, 256], sizes = [8, 128], strides = [1, 1]} : vector<8x768xf32> to vector<8x128xf32>
    %180 = math.tanh %178 : vector<8x128xf32>
    %181 = arith.mulf %179, %180 : vector<8x128xf32>
    %182 = vector.extract_strided_slice %170 {offsets = [0, 512], sizes = [8, 128], strides = [1, 1]} : vector<8x768xf32> to vector<8x128xf32>
    %183 = arith.mulf %182, %156 : vector<8x128xf32>
    %184 = vector.extract_strided_slice %170 {offsets = [0, 384], sizes = [8, 128], strides = [1, 1]} : vector<8x768xf32> to vector<8x128xf32>
    %185 = vector.extract_strided_slice %172 {offsets = [0, 128], sizes = [8, 128], strides = [1, 1]} : vector<8x256xf32> to vector<8x128xf32>
    %186 = arith.mulf %184, %185 : vector<8x128xf32>
    %187 = arith.addf %183, %186 : vector<8x128xf32>
    %188 = vector.extract_strided_slice %170 {offsets = [0, 640], sizes = [8, 128], strides = [1, 1]} : vector<8x768xf32> to vector<8x128xf32>
    %189 = math.tanh %187 : vector<8x128xf32>
    %190 = arith.mulf %188, %189 : vector<8x128xf32>
    %191 = tpu.concatenate %181, %190 in 1 : vector<8x128xf32>, vector<8x128xf32> -> vector<8x256xf32>
    %192 = arith.truncf %191 : vector<8x256xf32> to vector<8x256xbf16>
    %cst_22 = arith.constant dense<0.000000e+00> : vector<8x1024xf32>
    %193 = tpu.matmul %192, %11, %cst_22 {dimension_numbers = #tpu.dot_dimension_numbers<[1], [0], [0], [1], [0, 0, 1, 1], [], []>} : vector<8x256xbf16>, vector<256x1024xbf16>, vector<8x1024xf32> -> vector<8x1024xf32>
    %194 = vector.extract_strided_slice %10 {offsets = [48, 0], sizes = [8, 1024], strides = [1, 1]} : vector<64x1024xf32> to vector<8x1024xf32>
    %195 = arith.addf %193, %194 : vector<8x1024xf32>
    %196 = vector.extract_strided_slice %195 {offsets = [0, 0], sizes = [8, 768], strides = [1, 1]} : vector<8x1024xf32> to vector<8x768xf32>
    %197 = arith.negf %196 : vector<8x768xf32>
    %198 = math.exp %197 : vector<8x768xf32>
    %cst_23 = arith.constant 1.000000e+00 : f32
    %199 = vector.broadcast %cst_23 : f32 to vector<8x768xf32>
    %200 = arith.addf %199, %198 : vector<8x768xf32>
    %201 = arith.divf %199, %200 : vector<8x768xf32>
    %202 = vector.extract_strided_slice %195 {offsets = [0, 768], sizes = [8, 256], strides = [1, 1]} : vector<8x1024xf32> to vector<8x256xf32>
    %203 = math.tanh %202 : vector<8x256xf32>
    %204 = vector.extract_strided_slice %201 {offsets = [0, 128], sizes = [8, 128], strides = [1, 1]} : vector<8x768xf32> to vector<8x128xf32>
    %205 = arith.mulf %204, %178 : vector<8x128xf32>
    %206 = vector.extract_strided_slice %201 {offsets = [0, 0], sizes = [8, 128], strides = [1, 1]} : vector<8x768xf32> to vector<8x128xf32>
    %207 = vector.extract_strided_slice %203 {offsets = [0, 0], sizes = [8, 128], strides = [1, 1]} : vector<8x256xf32> to vector<8x128xf32>
    %208 = arith.mulf %206, %207 : vector<8x128xf32>
    %209 = arith.addf %205, %208 : vector<8x128xf32>
    %210 = vector.extract_strided_slice %201 {offsets = [0, 256], sizes = [8, 128], strides = [1, 1]} : vector<8x768xf32> to vector<8x128xf32>
    %211 = math.tanh %209 : vector<8x128xf32>
    %212 = arith.mulf %210, %211 : vector<8x128xf32>
    %213 = vector.extract_strided_slice %201 {offsets = [0, 512], sizes = [8, 128], strides = [1, 1]} : vector<8x768xf32> to vector<8x128xf32>
    %214 = arith.mulf %213, %187 : vector<8x128xf32>
    %215 = vector.extract_strided_slice %201 {offsets = [0, 384], sizes = [8, 128], strides = [1, 1]} : vector<8x768xf32> to vector<8x128xf32>
    %216 = vector.extract_strided_slice %203 {offsets = [0, 128], sizes = [8, 128], strides = [1, 1]} : vector<8x256xf32> to vector<8x128xf32>
    %217 = arith.mulf %215, %216 : vector<8x128xf32>
    %218 = arith.addf %214, %217 : vector<8x128xf32>
    %219 = vector.extract_strided_slice %201 {offsets = [0, 640], sizes = [8, 128], strides = [1, 1]} : vector<8x768xf32> to vector<8x128xf32>
    %220 = math.tanh %218 : vector<8x128xf32>
    %221 = arith.mulf %219, %220 : vector<8x128xf32>
    %222 = tpu.concatenate %212, %221 in 1 : vector<8x128xf32>, vector<8x128xf32> -> vector<8x256xf32>
    %223 = arith.truncf %222 : vector<8x256xf32> to vector<8x256xbf16>
    %cst_24 = arith.constant dense<0.000000e+00> : vector<8x1024xf32>
    %224 = tpu.matmul %223, %11, %cst_24 {dimension_numbers = #tpu.dot_dimension_numbers<[1], [0], [0], [1], [0, 0, 1, 1], [], []>} : vector<8x256xbf16>, vector<256x1024xbf16>, vector<8x1024xf32> -> vector<8x1024xf32>
    %225 = vector.extract_strided_slice %10 {offsets = [56, 0], sizes = [8, 1024], strides = [1, 1]} : vector<64x1024xf32> to vector<8x1024xf32>
    %226 = arith.addf %224, %225 : vector<8x1024xf32>
    %227 = vector.extract_strided_slice %226 {offsets = [0, 0], sizes = [8, 768], strides = [1, 1]} : vector<8x1024xf32> to vector<8x768xf32>
    %228 = arith.negf %227 : vector<8x768xf32>
    %229 = math.exp %228 : vector<8x768xf32>
    %cst_25 = arith.constant 1.000000e+00 : f32
    %230 = vector.broadcast %cst_25 : f32 to vector<8x768xf32>
    %231 = arith.addf %230, %229 : vector<8x768xf32>
    %232 = arith.divf %230, %231 : vector<8x768xf32>
    %233 = vector.extract_strided_slice %226 {offsets = [0, 768], sizes = [8, 256], strides = [1, 1]} : vector<8x1024xf32> to vector<8x256xf32>
    %234 = math.tanh %233 : vector<8x256xf32>
    %235 = vector.extract_strided_slice %232 {offsets = [0, 128], sizes = [8, 128], strides = [1, 1]} : vector<8x768xf32> to vector<8x128xf32>
    %236 = arith.mulf %235, %209 : vector<8x128xf32>
    %237 = vector.extract_strided_slice %232 {offsets = [0, 0], sizes = [8, 128], strides = [1, 1]} : vector<8x768xf32> to vector<8x128xf32>
    %238 = vector.extract_strided_slice %234 {offsets = [0, 0], sizes = [8, 128], strides = [1, 1]} : vector<8x256xf32> to vector<8x128xf32>
    %239 = arith.mulf %237, %238 : vector<8x128xf32>
    %240 = arith.addf %236, %239 : vector<8x128xf32>
    %241 = vector.extract_strided_slice %232 {offsets = [0, 256], sizes = [8, 128], strides = [1, 1]} : vector<8x768xf32> to vector<8x128xf32>
    %242 = math.tanh %240 : vector<8x128xf32>
    %243 = arith.mulf %241, %242 : vector<8x128xf32>
    %244 = vector.extract_strided_slice %232 {offsets = [0, 512], sizes = [8, 128], strides = [1, 1]} : vector<8x768xf32> to vector<8x128xf32>
    %245 = arith.mulf %244, %218 : vector<8x128xf32>
    %246 = vector.extract_strided_slice %232 {offsets = [0, 384], sizes = [8, 128], strides = [1, 1]} : vector<8x768xf32> to vector<8x128xf32>
    %247 = vector.extract_strided_slice %234 {offsets = [0, 128], sizes = [8, 128], strides = [1, 1]} : vector<8x256xf32> to vector<8x128xf32>
    %248 = arith.mulf %246, %247 : vector<8x128xf32>
    %249 = arith.addf %245, %248 : vector<8x128xf32>
    %250 = vector.extract_strided_slice %232 {offsets = [0, 640], sizes = [8, 128], strides = [1, 1]} : vector<8x768xf32> to vector<8x128xf32>
    %251 = math.tanh %249 : vector<8x128xf32>
    %252 = arith.mulf %250, %251 : vector<8x128xf32>
    %253 = tpu.concatenate %243, %252 in 1 : vector<8x128xf32>, vector<8x128xf32> -> vector<8x256xf32>
    %254 = arith.truncf %253 : vector<8x256xf32> to vector<8x256xbf16>
    %cst_26 = arith.constant dense<0.000000e+00> : vector<8x1024xf32>
    %255 = tpu.matmul %254, %11, %cst_26 {dimension_numbers = #tpu.dot_dimension_numbers<[1], [0], [0], [1], [0, 0, 1, 1], [], []>} : vector<8x256xbf16>, vector<256x1024xbf16>, vector<8x1024xf32> -> vector<8x1024xf32>
    %256 = vector.broadcast %12 : vector<1x1024xf32> to vector<8x1024xf32>
    %257 = arith.addf %255, %256 : vector<8x1024xf32>
    %258 = vector.extract_strided_slice %257 {offsets = [0, 0], sizes = [8, 768], strides = [1, 1]} : vector<8x1024xf32> to vector<8x768xf32>
    %259 = arith.negf %258 : vector<8x768xf32>
    %260 = math.exp %259 : vector<8x768xf32>
    %cst_27 = arith.constant 1.000000e+00 : f32
    %261 = vector.broadcast %cst_27 : f32 to vector<8x768xf32>
    %262 = arith.addf %261, %260 : vector<8x768xf32>
    %263 = arith.divf %261, %262 : vector<8x768xf32>
    %264 = vector.extract_strided_slice %257 {offsets = [0, 768], sizes = [8, 256], strides = [1, 1]} : vector<8x1024xf32> to vector<8x256xf32>
    %265 = math.tanh %264 : vector<8x256xf32>
    %266 = vector.extract_strided_slice %263 {offsets = [0, 512], sizes = [8, 128], strides = [1, 1]} : vector<8x768xf32> to vector<8x128xf32>
    %267 = arith.mulf %266, %249 : vector<8x128xf32>
    %268 = vector.extract_strided_slice %263 {offsets = [0, 384], sizes = [8, 128], strides = [1, 1]} : vector<8x768xf32> to vector<8x128xf32>
    %269 = vector.extract_strided_slice %265 {offsets = [0, 128], sizes = [8, 128], strides = [1, 1]} : vector<8x256xf32> to vector<8x128xf32>
    %270 = arith.mulf %268, %269 : vector<8x128xf32>
    %271 = arith.addf %267, %270 : vector<8x128xf32>
    %272 = vector.extract_strided_slice %263 {offsets = [0, 640], sizes = [8, 128], strides = [1, 1]} : vector<8x768xf32> to vector<8x128xf32>
    %273 = math.tanh %271 : vector<8x128xf32>
    %274 = arith.mulf %272, %273 : vector<8x128xf32>
    %275 = arith.truncf %274 : vector<8x128xf32> to vector<8x128xbf16>
    %c0_28 = arith.constant 0 : index
    %c0_29 = arith.constant 0 : index
    %276 = vector.load %arg4[%c0_28, %c0_29] : memref<128x128xbf16, #tpu.memory_space<vmem>>, vector<128x128xbf16>
    %cst_30 = arith.constant dense<0.000000e+00> : vector<8x128xf32>
    %277 = tpu.matmul %275, %276, %cst_30 {dimension_numbers = #tpu.dot_dimension_numbers<[1], [0], [0], [1], [0, 0, 1, 1], [], []>} : vector<8x128xbf16>, vector<128x128xbf16>, vector<8x128xf32> -> vector<8x128xf32>
    %c0_31 = arith.constant 0 : index
    %c0_32 = arith.constant 0 : index
    %278 = vector.load %arg5[%c0_31, %c0_32] : memref<1x128xf32, #tpu.memory_space<vmem>>, vector<1x128xf32>
    %279 = vector.broadcast %278 : vector<1x128xf32> to vector<8x128xf32>
    %280 = arith.addf %277, %279 : vector<8x128xf32>
    %c0_33 = arith.constant 0 : index
    %c0_34 = arith.constant 0 : index
    %281 = vector.load %arg6[%c0_33, %c0_34] : memref<8x128xf32, #tpu.memory_space<vmem>>, vector<8x128xf32>
    tpu.vector_store %arg6[%c0_33, %c0_34], %280 {strides = array<i32>} : memref<8x128xf32, #tpu.memory_space<vmem>>, vector<8x128xf32>,
    return
  }
}

</mosaic_0001>

<bundles_post_ra>
// kernel: lstm_model_forward.1
= control target key start
LH: loop header
LB: loop body
LE: loop exit
PB: predicated region body
PF: predicated region fallthrough
CT: control target
= control target key end

     0   :  { %11 = vsyncpa [#allocation3], 0  ;;  %s6006_s0 = inlined_call_operand.vmem [shape: s32[64,1], index: 0, kind: input, shape index: {}]   ;;  %s6007_s1 = inlined_call_operand.hbm [shape: f32[64,1024], index: 1, kind: input, shape index: {}]   ;;  %s6008_s2 = inlined_call_operand.vmem [shape: f32[1,1024], index: 2, kind: input, shape index: {}]   ;;  %s6009_s3 = inlined_call_operand.hbm [shape: bf16[256,1024], index: 3, kind: input, shape index: {}]   ;;  %s6010_s4 = inlined_call_operand.vmem [shape: bf16[128,128], index: 4, kind: input, shape index: {}]   ;;  %s6011_s5 = inlined_call_operand.vmem [shape: f32[1,128], index: 5, kind: input, shape index: {}]   ;;  %s6012_s6 = inlined_call_operand.vmem [shape: f32[8,128], index: 6, kind: output, shape index: {}]  }
   0x1   :  { %12 = vsyncpa [#allocation5], 0  ;;  %s4016_s21 = smov [#allocation2]   ;;  %s3968_s25 = scalar_lea.hbm %s6007_s1, 8192 }
   0x2   :  { %s20_s22 = sshll.u32 %s4016_s21, 4  ;;  %p3969_p0 = scmp.ne.s32.totalorder %s6007_s1, %s3968_s25  ;;  %s21_s22 = int_to_ptr.vmem [resolvable:$true] %s20_s22 }
   0x3   :  { %p3972_p1 = scmp.lt.u32.totalorder %s3968_s25, %s6007_s1 }
   0x5   :  { %p3974_p2 = pnand %p3972_p1, %p3969_p0 }
   0x7   :  { %3977 = shalt.err (!%p3974_p2)
}
   0x8   :  { %s3978_s30 = scalar_lea.vmem %s21_s22, 8192  ;;  %p3983_p4 = scmp.lt.s32.totalorder %s21_s22, %s21_s22 }
   0x9   :  { %p3979_p3 = scmp.ne.s32.totalorder %s21_s22, %s3978_s30  ;;  %p3984_p5 = scmp.lt.s32.totalorder %s3978_s30, %s3978_s30 }
   0xb   :  { %p3985_p6 = por %p3984_p5, %p3983_p4 }
   0xd   :  { %p3986_p7 = pnand %p3985_p6, %p3979_p3 }
   0xf   :  { %3989 = shalt.err (!%p3986_p7)
}
  0x10   :  { %s4017_s7 = smov 1024   ;;  %s4018_s8 = smov 64  }
  0x11   :  { %26 = dma.hbm_to_vmem [thread:$0]  %s6007_s1, 8192, %s21_s22, [#allocation3], %s4017_s7, %s4017_s7, %s4018_s8  }
  0x12   :  { %s4019_s11 = smov [#allocation4]   ;;  %s3990_s15 = scalar_lea.hbm %s6009_s3, 16384 }
  0x13   :  { %s34_s12 = sshll.u32 %s4019_s11, 4  ;;  %p3991_p8 = scmp.ne.s32.totalorder %s6009_s3, %s3990_s15  ;;  %s35_s12 = int_to_ptr.vmem [resolvable:$true] %s34_s12 }
  0x14   :  { %p3994_p9 = scmp.lt.u32.totalorder %s3990_s15, %s6009_s3 }
  0x16   :  { %p3996_p10 = pnand %p3994_p9, %p3991_p8 }
  0x18   :  { %3999 = shalt.err (!%p3996_p10)
}
  0x19   :  { %s4000_s20 = scalar_lea.vmem %s35_s12, 16384  ;;  %p4005_p12 = scmp.lt.s32.totalorder %s35_s12, %s35_s12 }
  0x1a   :  { %p4001_p11 = scmp.ne.s32.totalorder %s35_s12, %s4000_s20  ;;  %p4006_p13 = scmp.lt.s32.totalorder %s4000_s20, %s4000_s20 }
  0x1c   :  { %p4007_p0 = por %p4006_p13, %p4005_p12 }
  0x1e   :  { %p4008_p1 = pnand %p4007_p0, %p4001_p11 }
  0x20   :  { %4011 = shalt.err (!%p4008_p1)
}
  0x21   :  { %s4020_s1 = smov 512   ;;  %s4021_s21 = smov 32  }
  0x22   :  { %40 = dma.hbm_to_vmem [thread:$0]  %s6009_s3, 16384, %s35_s12, [#allocation5], %s4020_s1, %s4020_s1, %s4021_s21  }
  0x23   :  { %4012 = dma.done.wait [#allocation3], 8192  }
  0x24   :  { %4013 = vsyncadd [#allocation3], 4294959104 }
  0x25   :  { %4014 = dma.done.wait [#allocation5], 16384  }
  0x26   :  { %4015 = vsyncadd [#allocation5], 4294950912  ;;  %v4022_v0 = vmov 0   ;;  %v6026_v1 = vmov 0.0   ;;  %v54_v2 = vld [vmem:[%s6006_s0 + $0x10] sm:$0xff]  ;;  %v52_v3 = vld [vmem:[%s6006_s0] sm:$0xff]  ;;  %v6013_v40 = vlaneseq }
  0x27   :  { %3703 = vset.pattern.permute.xlu1 %v4022_v0  ;;  %3702 = vset.pattern.permute.xlu0 %v4022_v0  ;;  %v55_v4 = vld [vmem:[%s6006_s0 + $0x18] sm:$0xff]  ;;  %v53_v5 = vld [vmem:[%s6006_s0 + $0x8] sm:$0xff]  ;;  %v110_v8 = vld [vmem:[#allocation2] sm:$0xff]  ;;  %vm216_vm0 = vcmask 523264   ;;  %vm4025_vm9 = vmmov 0  }
  0x28   :  { %305 = vmatprep.mubr.f32.mxu0 %v6026_v1  ;;  %329 = vmatprep.mubr.f32.mxu1 %v6026_v1  ;;  %v111_v6 = vld [vmem:[#allocation2 + $0x8] sm:$0xff]  ;;  %v118_v9 = vld [vmem:[#allocation2 + $0x40] sm:$0xff]  ;;  %v59_v27 = vld [vmem:[%s6006_s0 + $0x38] sm:$0xff]  ;;  %v4112_v41 = vand.u32 127, %v6013_v40 }
  0x29   :  { %69 = vperm.xlu1 %3703, %v54_v2   ;;  %63 = vperm.xlu0 %3702, %v52_v3   ;;  %v119_v7 = vld [vmem:[#allocation2 + $0x48] sm:$0xff]  ;;  %v3622_v11 = vpack.c.bf16 %v118_v9, %v110_v8  ;;  %v126_v14 = vld [vmem:[#allocation2 + $0x80] sm:$0xff]  ;;  %v58_v28 = vld [vmem:[%s6006_s0 + $0x30] sm:$0xff] }
  0x2a   :  { %v3620_v10 = vpack.c.bf16 %v119_v7, %v111_v6  ;;  %v127_v12 = vld [vmem:[#allocation2 + $0x88] sm:$0xff]  ;;  %v134_v16 = vld [vmem:[#allocation2 + $0xc0] sm:$0xff]  ;;  %v113_v35 = vld [vmem:[#allocation2 + $0x18] sm:$0xff] }
  0x2b   :  { %v135_v13 = vld [vmem:[#allocation2 + $0xc8] sm:$0xff]  ;;  %v56_v20 = vld [vmem:[%s6006_s0 + $0x20] sm:$0xff]  ;;  %v3626_v21 = vpack.c.bf16 %v134_v16, %v126_v14  ;;  %v121_v36 = vld [vmem:[#allocation2 + $0x58] sm:$0xff] }
  0x2c   :  { %v3624_v15 = vpack.c.bf16 %v135_v13, %v127_v12  ;;  %v143_v17 = vld [vmem:[#allocation2 + $0x108] sm:$0xff]  ;;  %3621 = vmatprep.subr.bf16.mxu0 %v3620_v10  ;;  %3684 = vmatprep.subr.bf16.mxu1 %v3620_v10  ;;  %v142_v23 = vld [vmem:[#allocation2 + $0x100] sm:$0xff]  ;;  %v3636_v39 = vpack.c.bf16 %v121_v36, %v113_v35  ;;  %v112_v61 = vld [vmem:[#allocation2 + $0x10] sm:$0xff] }
  0x2d   :  { %72 = vperm.xlu1 %3703, %v55_v4   ;;  %66 = vperm.xlu0 %3702, %v53_v5   ;;  %v151_v18 = vld [vmem:[#allocation2 + $0x148] sm:$0xff]  ;;  %v150_v24 = vld [vmem:[#allocation2 + $0x140] sm:$0xff]  ;;  %v120_v62 = vld [vmem:[#allocation2 + $0x50] sm:$0xff] }
  0x2e   :  { %v57_v19 = vld [vmem:[%s6006_s0 + $0x28] sm:$0xff]  ;;  %3623 = vmatpush1.bf16.msra.mxu0 %v3622_v11  ;;  %3688 = vmatpush1.bf16.msra.mxu1 %v3622_v11  ;;  %v3628_v22 = vpack.c.bf16 %v151_v18, %v143_v17  ;;  %v3630_v29 = vpack.c.bf16 %v150_v24, %v142_v23  ;;  %v158_v31 = vld [vmem:[#allocation2 + $0x180] sm:$0xff]  ;;  %v129_v3 = vld [vmem:[#allocation2 + $0x98] sm:$0xff]  ;;  %v3638_v9 = vpack.c.bf16 %v120_v62, %v112_v61 }
  0x2f   :  { %3625 = vmatprep.subr.bf16.mxu0 %v3624_v15  ;;  %3685 = vmatprep.subr.bf16.mxu1 %v3624_v15  ;;  %v159_v25 = vld [vmem:[#allocation2 + $0x188] sm:$0xff]  ;;  %v166_v32 = vld [vmem:[#allocation2 + $0x1c0] sm:$0xff]  ;;  %v137_v4 = vld [vmem:[#allocation2 + $0xd8] sm:$0xff] }
  0x30   :  { %v167_v26 = vld [vmem:[#allocation2 + $0x1c8] sm:$0xff]  ;;  %v3634_v37 = vpack.c.bf16 %v166_v32, %v158_v31  ;;  %v114_v42 = vld [vmem:[#allocation2 + $0x20] sm:$0xff]  ;;  %v128_v12 = vld [vmem:[#allocation2 + $0x90] sm:$0xff]  ;;  %v3640_v16 = vpack.c.bf16 %v137_v4, %v129_v3 }
  0x31   :  { %78 = vperm.xlu1 %3703, %v57_v19   ;;  %75 = vperm.xlu0 %3702, %v56_v20   ;;  %v3632_v30 = vpack.c.bf16 %v167_v26, %v159_v25  ;;  %v115_v33 = vld [vmem:[#allocation2 + $0x28] sm:$0xff]  ;;  %v122_v43 = vld [vmem:[#allocation2 + $0x60] sm:$0xff]  ;;  %v136_v13 = vld [vmem:[#allocation2 + $0xd0] sm:$0xff] }
  0x32   :  { %3627 = vmatpush1.bf16.msra.mxu0 %v3626_v21  ;;  %3689 = vmatpush1.bf16.msra.mxu1 %v3626_v21  ;;  %v123_v34 = vld [vmem:[#allocation2 + $0x68] sm:$0xff]  ;;  %v3654_v48 = vpack.c.bf16 %v122_v43, %v114_v42  ;;  %v130_v50 = vld [vmem:[#allocation2 + $0xa0] sm:$0xff]  ;;  %v145_v19 = vld [vmem:[#allocation2 + $0x118] sm:$0xff]  ;;  %v3642_v23 = vpack.c.bf16 %v136_v13, %v128_v12 }
  0x33   :  { %3629 = vmatprep.subr.bf16.mxu0 %v3628_v22  ;;  %3686 = vmatprep.subr.bf16.mxu1 %v3628_v22  ;;  %v3652_v38 = vpack.c.bf16 %v123_v34, %v115_v33  ;;  %v131_v44 = vld [vmem:[#allocation2 + $0xa8] sm:$0xff]  ;;  %v138_v51 = vld [vmem:[#allocation2 + $0xe0] sm:$0xff]  ;;  %v153_v20 = vld [vmem:[#allocation2 + $0x158] sm:$0xff] }
  0x34   :  { %v139_v45 = vld [vmem:[#allocation2 + $0xe8] sm:$0xff]  ;;  %v3658_v57 = vpack.c.bf16 %v138_v51, %v130_v50  ;;  %v146_v58 = vld [vmem:[#allocation2 + $0x120] sm:$0xff]  ;;  %v144_v24 = vld [vmem:[#allocation2 + $0x110] sm:$0xff] }
  0x35   :  { %84 = vperm.xlu1 %3703, %v59_v27   ;;  %81 = vperm.xlu0 %3702, %v58_v28   ;;  %v3656_v49 = vpack.c.bf16 %v139_v45, %v131_v44  ;;  %v147_v53 = vld [vmem:[#allocation2 + $0x128] sm:$0xff]  ;;  %v154_v60 = vld [vmem:[#allocation2 + $0x160] sm:$0xff]  ;;  %v152_v25 = vld [vmem:[#allocation2 + $0x150] sm:$0xff] }
  0x36   :  { %3631 = vmatpush1.bf16.msra.mxu0 %v3630_v29  ;;  %3690 = vmatpush1.bf16.msra.mxu1 %v3630_v29  ;;  %v155_v54 = vld [vmem:[#allocation2 + $0x168] sm:$0xff]  ;;  %v3662_v8 = vpack.c.bf16 %v154_v60, %v146_v58  ;;  %v162_v10 = vld [vmem:[#allocation2 + $0x1a0] sm:$0xff]  ;;  %v3644_v29 = vpack.c.bf16 %v153_v20, %v145_v19  ;;  %v161_v32 = vld [vmem:[#allocation2 + $0x198] sm:$0xff]  ;;  %v3646_v36 = vpack.c.bf16 %v152_v25, %v144_v24 }
  0x37   :  { %3633 = vmatprep.subr.bf16.mxu0 %v3632_v30  ;;  %3687 = vmatprep.subr.bf16.mxu1 %v3632_v30  ;;  %v3660_v59 = vpack.c.bf16 %v155_v54, %v147_v53  ;;  %v163_v0 = vld [vmem:[#allocation2 + $0x1a8] sm:$0xff]  ;;  %v170_v11 = vld [vmem:[#allocation2 + $0x1e0] sm:$0xff]  ;;  %v169_v33 = vld [vmem:[#allocation2 + $0x1d8] sm:$0xff] }
  0x38   :  { %v171_v2 = vld [vmem:[#allocation2 + $0x1e8] sm:$0xff]  ;;  %v689_v17 = vld [vmem:[#allocation4] sm:$0xff]  ;;  %v3666_v22 = vpack.c.bf16 %v170_v11, %v162_v10  ;;  %v3648_v43 = vpack.c.bf16 %v169_v33, %v161_v32  ;;  %v133_v62 = vld [vmem:[#allocation2 + $0xb8] sm:$0xff] }
  0x39   :  { %v3664_v15 = vpack.c.bf16 %v171_v2, %v163_v0  ;;  %v693_v18 = vld [vmem:[#allocation4 + $0x20] sm:$0xff]  ;;  %v141_v0 = vld [vmem:[#allocation2 + $0xf8] sm:$0xff]  ;;  %v156_v24 = vld [vmem:[#allocation2 + $0x170] sm:$0xff] }
  0x3a   :  { %3635 = vmatpush1.bf16.msra.mxu0 %v3634_v37  ;;  %3691 = vmatpush1.bf16.msra.mxu1 %v3634_v37  ;;  %v4154_v28 = vcombine.high %v689_v17, %v693_v18  ;;  %v697_v30 = vld [vmem:[#allocation4 + $0x40] sm:$0xff]  ;;  %v4161_v35 = vcombine.low %v689_v17, %v693_v18  ;;  %v160_v37 = vld [vmem:[#allocation2 + $0x190] sm:$0xff]  ;;  %v157_v17 = vld [vmem:[#allocation2 + $0x178] sm:$0xff] }
  0x3b   :  { %3653 = vmatprep.subr.bf16.mxu0 %v3652_v38  ;;  %3637 = vmatprep.subr.bf16.mxu1 %v3636_v39  ;;  %v701_v31 = vld [vmem:[#allocation4 + $0x60] sm:$0xff]  ;;  %v168_v38 = vld [vmem:[#allocation2 + $0x1d0] sm:$0xff]  ;;  %v165_v33 = vld [vmem:[#allocation2 + $0x1b8] sm:$0xff] }
  0x3c   :  { %6284 = vst [vmem:[#allocation8_spill] sm:$0xff] %v4154_v28  ;;  %6285 = vst [vmem:[#allocation9_spill] sm:$0xff] %v4161_v35  ;;  %v4169_v42 = vcombine.high %v697_v30, %v701_v31  ;;  %v705_v44 = vld [vmem:[#allocation4 + $0x80] sm:$0xff]  ;;  %v758_v40 = vld [vmem:[#allocation4 + $0x228] sm:$0xff] }
  0x3d   :  { %v709_v45 = vld [vmem:[#allocation4 + $0xa0] sm:$0xff] }
  0x3e   :  { %6286 = vst [vmem:[#allocation10_spill] sm:$0xff] %v4169_v42  ;;  %v4185_v50 = vcombine.high %v705_v44, %v709_v45  ;;  %v713_v51 = vld [vmem:[#allocation4 + $0xc0] sm:$0xff] }
  0x3f   :  { %v717_v53 = vld [vmem:[#allocation4 + $0xe0] sm:$0xff] }
  0x40   :  { %6288 = vst [vmem:[#allocation12_spill] sm:$0xff] %v4185_v50  ;;  %v4196_v58 = vcombine.high %v713_v51, %v717_v53  ;;  %v725_v60 = vld [vmem:[#allocation4 + $0x120] sm:$0xff]  ;;  %v4205_v2 = vcombine.low %v713_v51, %v717_v53 }
  0x41   :  { %v729_v4 = vld [vmem:[#allocation4 + $0x140] sm:$0xff] }
  0x42   :  { %6290 = vst [vmem:[#allocation14_spill] sm:$0xff] %v4196_v58  ;;  %6291 = vst [vmem:[#allocation15_spill] sm:$0xff] %v4205_v2  ;;  %v737_v12 = vld [vmem:[#allocation4 + $0x180] sm:$0xff] }
  0x43   :  { %v741_v13 = vld [vmem:[#allocation4 + $0x1a0] sm:$0xff] }
  0x44   :  { %v4233_v19 = vcombine.high %v737_v12, %v741_v13  ;;  %v745_v20 = vld [vmem:[#allocation4 + $0x1c0] sm:$0xff]  ;;  %v4241_v25 = vcombine.low %v737_v12, %v741_v13 }
  0x46   :  { %6296 = vst [vmem:[#allocation20_spill] sm:$0xff] %v4233_v19  ;;  %6297 = vst [vmem:[#allocation21_spill] sm:$0xff] %v4241_v25 }
  0xa8   :  { %v70_v46 = vpop.permute.xlu1 %69  ;;  %v64_v47 = vpop.permute.xlu0 %63 }
  0xa9   :  { %vm86_vm1 = vcmp.eq.s32.totalorder %v64_v47, %v4112_v41  ;;  %vm88_vm2 = vcmp.eq.s32.totalorder %v70_v46, %v4112_v41  ;;  %v117_v46 = vld [vmem:[#allocation2 + $0x38] sm:$0xff] }
  0xaa   :  { %v4116_v52 = vsel %vm86_vm1, 1.0, %v6026_v1  ;;  %v4129_v5 = vsel %vm88_vm2, 1.0, %v6026_v1  ;;  %v125_v47 = vld [vmem:[#allocation2 + $0x78] sm:$0xff] }
  0xab   :  { %3374 = vmatmul.mubr.msk.f32.vlgmr.msra.gmra.mrb[0].mxu0 %vm216_vm0, %v4116_v52  ;;  %v3668_v54 = vpack.c.bf16 %v125_v47, %v117_v46  ;;  %v761_v47 = vld [vmem:[#allocation4 + $0x240] sm:$0xff] }
  0xac   :  { %3655 = vmatpush1.bf16.msra.mxu0 %v3654_v48  ;;  %v73_v55 = vpop.permute.xlu1 %72  ;;  %v67_v56 = vpop.permute.xlu0 %66  ;;  %311 = vmatprep.mubr.f32.mxu0 %v6026_v1  ;;  %v4177_v48 = vcombine.low %v697_v30, %v701_v31  ;;  %v753_v30 = vld [vmem:[#allocation4 + $0x200] sm:$0xff] }
  0xad   :  { %vm87_vm3 = vcmp.eq.s32.totalorder %v67_v56, %v4112_v41  ;;  %3657 = vmatprep.subr.bf16.mxu0 %v3656_v49  ;;  %vm89_vm5 = vcmp.eq.s32.totalorder %v73_v55, %v4112_v41  ;;  %v3650_v49 = vpack.c.bf16 %v168_v38, %v160_v37  ;;  %v116_v55 = vld [vmem:[#allocation2 + $0x30] sm:$0xff]  ;;  %v757_v31 = vld [vmem:[#allocation4 + $0x220] sm:$0xff] }
  0xae   :  { %v4124_v63 = vsel %vm87_vm3, 1.0, %v6026_v1  ;;  %v4147_v26 = vsel %vm89_vm5, 1.0, %v6026_v1  ;;  %6287 = vst [vmem:[#allocation11_spill] sm:$0xff] %v4177_v48  ;;  %v124_v56 = vld [vmem:[#allocation2 + $0x70] sm:$0xff] }
  0xaf   :  { %3375 = vmatmul.mubr.msk.f32.gmra.mrb[2].mxu0 %vm216_vm0, %v4124_v63  ;;  %v3670_v61 = vpack.c.bf16 %v124_v56, %v116_v55  ;;  %v172_v37 = vld [vmem:[#allocation2 + $0x1f0] sm:$0xff]  ;;  %v769_v56 = vld [vmem:[#allocation4 + $0x280] sm:$0xff] }
  0xb0   :  { %3659 = vmatpush1.bf16.msra.mxu0 %v3658_v57  ;;  %v79_v6 = vpop.permute.xlu1 %78  ;;  %v76_v7 = vpop.permute.xlu0 %75  ;;  %317 = vmatprep.mubr.f32.mxu0 %v6026_v1  ;;  %v4192_v57 = vcombine.low %v705_v44, %v709_v45  ;;  %v694_v44 = vld [vmem:[#allocation4 + $0x28] sm:$0xff]  ;;  %v4257_v45 = vcombine.high %v753_v30, %v757_v31 }
  0xb1   :  { %vm90_vm4 = vcmp.eq.s32.totalorder %v76_v7, %v4112_v41  ;;  %3661 = vmatprep.subr.bf16.mxu0 %v3660_v59  ;;  %vm91_vm6 = vcmp.eq.s32.totalorder %v79_v6, %v4112_v41  ;;  %v721_v59 = vld [vmem:[#allocation4 + $0x100] sm:$0xff]  ;;  %v3672_v7 = vpack.c.bf16 %v141_v0, %v133_v62 }
  0xb2   :  { %v4134_v14 = vsel %vm90_vm4, 1.0, %v6026_v1  ;;  %v4152_v27 = vsel %vm91_vm6, 1.0, %v6026_v1  ;;  %6289 = vst [vmem:[#allocation13_spill] sm:$0xff] %v4192_v57  ;;  %v4209_v3 = vcombine.high %v721_v59, %v725_v60  ;;  %v733_v6 = vld [vmem:[#allocation4 + $0x160] sm:$0xff]  ;;  %v4217_v10 = vcombine.low %v721_v59, %v725_v60  ;;  %6300 = vst [vmem:[#allocation24_spill] sm:$0xff] %v4257_v45 }
  0xb3   :  { %3376 = vmatmul.mubr.msk.f32.gmra.mrb[4].mxu0 %vm216_vm0, %v4129_v5  ;;  %3378 = vmatmul.mubr.msk.f32.vlgmr.msra.gmra.mrb[0].mxu1 %vm216_vm0, %v4134_v14  ;;  %v4221_v11 = vcombine.high %v729_v4, %v733_v6  ;;  %v4229_v18 = vcombine.low %v729_v4, %v733_v6  ;;  %v773_v59 = vld [vmem:[#allocation4 + $0x2a0] sm:$0xff]  ;;  %v6014_v60 = vmov 0.0|0.0   ;;  %v698_v6 = vld [vmem:[#allocation4 + $0x48] sm:$0xff] }
  0xb4   :  { %3663 = vmatpush1.bf16.msra.mxu0 %v3662_v8  ;;  %3639 = vmatpush1.bf16.msra.mxu1 %v3638_v9  ;;  %v82_v21 = vpop.permute.xlu0 %81  ;;  %v85_v34 = vpop.permute.xlu1 %84  ;;  %6292 = vst [vmem:[#allocation16_spill] sm:$0xff] %v4209_v3  ;;  %v132_v8 = vld [vmem:[#allocation2 + $0xb0] sm:$0xff]  ;;  %6293 = vst [vmem:[#allocation17_spill] sm:$0xff] %v4217_v10  ;;  %v4281_v62 = vcombine.high %v769_v56, %v773_v59  ;;  %v777_v0 = vld [vmem:[#allocation4 + $0x2c0] sm:$0xff] }
  0xb5   :  { %323 = vmatprep.mubr.f32.mxu0 %v6026_v1  ;;  %335 = vmatprep.mubr.f32.mxu1 %v6026_v1  ;;  %vm92_vm7 = vcmp.eq.s32.totalorder %v82_v21, %v4112_v41  ;;  %vm93_vm8 = vcmp.eq.s32.totalorder %v85_v34, %v4112_v41  ;;  %v140_v9 = vld [vmem:[#allocation2 + $0xf0] sm:$0xff]  ;;  %6294 = vst [vmem:[#allocation18_spill] sm:$0xff] %v4221_v11  ;;  %6295 = vst [vmem:[#allocation19_spill] sm:$0xff] %v4229_v18  ;;  %v749_v21 = vld [vmem:[#allocation4 + $0x1e0] sm:$0xff] }
  0xb6   :  { %3665 = vmatprep.subr.bf16.mxu0 %v3664_v15  ;;  %3641 = vmatprep.subr.bf16.mxu1 %v3640_v16  ;;  %v4166_v39 = vsel %vm92_vm7, 1.0, %v6026_v1  ;;  %v4182_v41 = vsel %vm93_vm8, 1.0, %v6026_v1  ;;  %v3674_v15 = vpack.c.bf16 %v140_v9, %v132_v8  ;;  %v149_v16 = vld [vmem:[#allocation2 + $0x138] sm:$0xff]  ;;  %v4253_v38 = vcombine.low %v745_v20, %v749_v21  ;;  %6305 = vst [vmem:[#allocation29_spill] sm:$0xff] %v4281_v62  ;;  %v781_v4 = vld [vmem:[#allocation4 + $0x2e0] sm:$0xff] }
  0xb7   :  { %3377 = vmatmul.mubr.msk.f32.gmra.mrb[6].mxu0 %vm216_vm0, %v4147_v26  ;;  %3379 = vmatmul.mubr.msk.f32.gmra.mrb[2].mxu1 %vm216_vm0, %v4152_v27  ;;  %v173_v34 = vld [vmem:[#allocation2 + $0x1f8] sm:$0xff]  ;;  %v4287_v8 = vcombine.low %v769_v56, %v773_v59  ;;  %v4292_v12 = vcombine.high %v777_v0, %v781_v4  ;;  %v813_v59 = vld [vmem:[#allocation4 + $0x3e0] sm:$0xff] }
  0xb8   :  { %3667 = vmatpush1.bf16.msra.mxu0 %v3666_v22  ;;  %3643 = vmatpush1.bf16.msra.mxu1 %v3642_v23  ;;  %v3676_v22 = vpack.c.bf16 %v157_v17, %v149_v16  ;;  %v148_v23 = vld [vmem:[#allocation2 + $0x130] sm:$0xff]  ;;  %6299 = vst [vmem:[#allocation23_spill] sm:$0xff] %v4253_v38  ;;  %v3680_v46 = vpack.c.bf16 %v173_v34, %v165_v33  ;;  %v789_v16 = vld [vmem:[#allocation4 + $0x320] sm:$0xff]  ;;  %v706_v17 = vld [vmem:[#allocation4 + $0x88] sm:$0xff] }
  0xb9   :  { %341 = vmatprep.mubr.f32.mxu1 %v6026_v1  ;;  %530 = vmatprep.mubr.f32.mxu0 %v6026_v1  ;;  %v3678_v32 = vpack.c.bf16 %v156_v24, %v148_v23  ;;  %6306 = vst [vmem:[#allocation30_spill] sm:$0xff] %v4287_v8  ;;  %6308 = vst [vmem:[#allocation32_spill] sm:$0xff] %v4292_v12 }
  0xba   :  { %1298 = vmatprep.subr.bf16.mxu0 %v4154_v28  ;;  %3645 = vmatprep.subr.bf16.mxu1 %v3644_v29  ;;  %v4245_v29 = vcombine.high %v745_v20, %v749_v21  ;;  %v710_v20 = vld [vmem:[#allocation4 + $0xa8] sm:$0xff]  ;;  %v4300_v21 = vcombine.low %v777_v0, %v781_v4 }
  0xbb   :  { %3380 = vmatmul.mubr.msk.f32.gmra.mrb[4].mxu1 %vm216_vm0, %v4166_v39  ;;  %3390 = vmatmul.mubr.msk.f32.vlgmr.msra.gmra.mrb[8].mxu0 %vm216_vm0, %v4116_v52  ;;  %v4309_v24 = vcombine.high %v706_v17, %v710_v20  ;;  %v4317_v34 = vcombine.low %v706_v17, %v710_v20  ;;  %v730_v0 = vld [vmem:[#allocation4 + $0x148] sm:$0xff]  ;;  %v692_v20 = vld [vmem:[#allocation4 + $0x18] sm:$0xff] }
  0xbc   :  { %1299 = vmatpush1.bf16.msra.mxu0 %v4161_v35  ;;  %3647 = vmatpush1.bf16.msra.mxu1 %v3646_v36  ;;  %6298 = vst [vmem:[#allocation22_spill] sm:$0xff] %v4245_v29  ;;  %v164_v36 = vld [vmem:[#allocation2 + $0x1b0] sm:$0xff]  ;;  %6310 = vst [vmem:[#allocation34_spill] sm:$0xff] %v4300_v21  ;;  %v734_v4 = vld [vmem:[#allocation4 + $0x168] sm:$0xff] }
  0xbd   :  { %347 = vmatprep.mubr.f32.mxu1 %v6026_v1  ;;  %534 = vmatprep.mubr.f32.mxu0 %v6026_v1  ;;  %v3682_v51 = vpack.c.bf16 %v172_v37, %v164_v36  ;;  %6313 = vst [vmem:[#allocation37_spill] sm:$0xff] %v4309_v24  ;;  %6315 = vst [vmem:[#allocation39_spill] sm:$0xff] %v4317_v34  ;;  %v742_v17 = vld [vmem:[#allocation4 + $0x1a8] sm:$0xff] }
  0xbe   :  { %1300 = vmatprep.subr.bf16.mxu0 %v4169_v42  ;;  %3649 = vmatprep.subr.bf16.mxu1 %v3648_v43  ;;  %v690_v43 = vld [vmem:[#allocation4 + $0x8] sm:$0xff] }
  0xbf   :  { %3381 = vmatmul.mubr.msk.f32.gmra.mrb[6].mxu1 %vm216_vm0, %v4182_v41  ;;  %3391 = vmatmul.mubr.msk.f32.gmra.mrb[10].mxu0 %vm216_vm0, %v4124_v63  ;;  %v4263_v53 = vcombine.high %v690_v43, %v694_v44  ;;  %v4289_v9 = vcombine.low %v690_v43, %v694_v44  ;;  %v805_v43 = vld [vmem:[#allocation4 + $0x3a0] sm:$0xff]  ;;  %v722_v44 = vld [vmem:[#allocation4 + $0x108] sm:$0xff] }
  0xc0   :  { %1301 = vmatpush1.bf16.msra.mxu0 %v4177_v48  ;;  %3651 = vmatpush1.bf16.msra.mxu1 %v3650_v49  ;;  %v765_v49 = vld [vmem:[#allocation4 + $0x260] sm:$0xff] }
  0xc1   :  { %418 = vmatprep.mubr.f32.mxu1 %v6026_v1  ;;  %540 = vmatprep.mubr.f32.mxu0 %v6026_v1  ;;  %6301 = vst [vmem:[#allocation25_spill] sm:$0xff] %v4263_v53  ;;  %v4270_v55 = vcombine.high %v761_v47, %v765_v49  ;;  %6307 = vst [vmem:[#allocation31_spill] sm:$0xff] %v4289_v9 }
  0xc2   :  { %1302 = vmatprep.subr.bf16.mxu0 %v4185_v50  ;;  %3669 = vmatprep.subr.bf16.mxu1 %v3668_v54  ;;  %v4267_v54 = vcombine.low %v753_v30, %v757_v31  ;;  %v797_v30 = vld [vmem:[#allocation4 + $0x360] sm:$0xff]  ;;  %v714_v31 = vld [vmem:[#allocation4 + $0xc8] sm:$0xff] }
  0xc3   :  { %3382 = vmatmul.mubr.msk.f32.vlgmr.msra.gmra.mrb[8].mxu1 %vm216_vm0, %v4116_v52  ;;  %3392 = vmatmul.mubr.msk.f32.gmra.mrb[12].mxu0 %vm216_vm0, %v4129_v5  ;;  %6303 = vst [vmem:[#allocation27_spill] sm:$0xff] %v4270_v55 }
  0xc4   :  { %1303 = vmatpush1.bf16.msra.mxu0 %v4192_v57  ;;  %423 = vmatprep.mubr.f32.mxu1 %v6026_v1  ;;  %6302 = vst [vmem:[#allocation26_spill] sm:$0xff] %v4267_v54 }
  0xc5   :  { %546 = vmatprep.mubr.f32.mxu0 %v6026_v1  ;;  %1304 = vmatprep.subr.bf16.mxu0 %v4196_v58 }
  0xc6   :  { %3671 = vmatpush1.bf16.msra.mxu1 %v3670_v61  ;;  %v4278_v61 = vcombine.low %v761_v47, %v765_v49 }
  0xc7   :  { %3383 = vmatmul.mubr.msk.f32.gmra.mrb[10].mxu1 %vm216_vm0, %v4124_v63  ;;  %3393 = vmatmul.mubr.msk.f32.gmra.mrb[14].mxu0 %vm216_vm0, %v4147_v26 }
  0xc8   :  { %1305 = vmatpush1.bf16.msra.mxu0 %v4205_v2  ;;  %429 = vmatprep.mubr.f32.mxu1 %v6026_v1  ;;  %6304 = vst [vmem:[#allocation28_spill] sm:$0xff] %v4278_v61 }
  0xc9   :  { %552 = vmatprep.mubr.f32.mxu0 %v6026_v1  ;;  %1306 = vmatprep.subr.bf16.mxu0 %v4209_v3 }
  0xca   :  { %3673 = vmatprep.subr.bf16.mxu1 %v3672_v7  ;;  %v702_v7 = vld [vmem:[#allocation4 + $0x68] sm:$0xff] }
  0xcb   :  { %3384 = vmatmul.mubr.msk.f32.gmra.mrb[12].mxu1 %vm216_vm0, %v4129_v5  ;;  %3394 = vmatmul.mubr.msk.f32.gmra.mrb[16].mxu0 %vm216_vm0, %v4134_v14  ;;  %v4294_v13 = vcombine.high %v698_v6, %v702_v7 }
  0xcc   :  { %1307 = vmatpush1.bf16.msra.mxu0 %v4217_v10  ;;  %435 = vmatprep.mubr.f32.mxu1 %v6026_v1 }
  0xcd   :  { %558 = vmatprep.mubr.f32.mxu0 %v6026_v1  ;;  %1308 = vmatprep.subr.bf16.mxu0 %v4221_v11  ;;  %6309 = vst [vmem:[#allocation33_spill] sm:$0xff] %v4294_v13 }
  0xce   :  { %3675 = vmatpush1.bf16.msra.mxu1 %v3674_v15  ;;  %v785_v15 = vld [vmem:[#allocation4 + $0x300] sm:$0xff] }
  0xcf   :  { %3385 = vmatmul.mubr.msk.f32.gmra.mrb[14].mxu1 %vm216_vm0, %v4147_v26  ;;  %3395 = vmatmul.mubr.msk.f32.gmra.mrb[18].mxu0 %vm216_vm0, %v4152_v27  ;;  %v4306_v23 = vcombine.high %v785_v15, %v789_v16  ;;  %v4315_v33 = vcombine.low %v785_v15, %v789_v16  ;;  %v4354_v16 = vcombine.high %v730_v0, %v734_v4 }
  0xd0   :  { %1309 = vmatpush1.bf16.msra.mxu0 %v4229_v18  ;;  %441 = vmatprep.mubr.f32.mxu1 %v6026_v1 }
  0xd1   :  { %564 = vmatprep.mubr.f32.mxu0 %v6026_v1  ;;  %1310 = vmatprep.subr.bf16.mxu0 %v4233_v19  ;;  %6312 = vst [vmem:[#allocation36_spill] sm:$0xff] %v4306_v23  ;;  %6314 = vst [vmem:[#allocation38_spill] sm:$0xff] %v4315_v33 }
  0xd2   :  { %3677 = vmatprep.subr.bf16.mxu1 %v3676_v22  ;;  %v4302_v22 = vcombine.low %v698_v6, %v702_v7  ;;  %6325 = vst [vmem:[#allocation49_spill] sm:$0xff] %v4354_v16 }
  0xd3   :  { %3386 = vmatmul.mubr.msk.f32.gmra.mrb[16].mxu1 %vm216_vm0, %v4134_v14  ;;  %3396 = vmatmul.mubr.msk.f32.gmra.mrb[20].mxu0 %vm216_vm0, %v4166_v39 }
  0xd4   :  { %1311 = vmatpush1.bf16.msra.mxu0 %v4241_v25  ;;  %447 = vmatprep.mubr.f32.mxu1 %v6026_v1  ;;  %6311 = vst [vmem:[#allocation35_spill] sm:$0xff] %v4302_v22 }
  0xd5   :  { %570 = vmatprep.mubr.f32.mxu0 %v6026_v1  ;;  %1312 = vmatprep.subr.bf16.mxu0 %v4245_v29 }
  0xd6   :  { %3679 = vmatpush1.bf16.msra.mxu1 %v3678_v32  ;;  %v718_v32 = vld [vmem:[#allocation4 + $0xe8] sm:$0xff] }
  0xd7   :  { %3387 = vmatmul.mubr.msk.f32.gmra.mrb[18].mxu1 %vm216_vm0, %v4152_v27  ;;  %3397 = vmatmul.mubr.msk.f32.gmra.mrb[22].mxu0 %vm216_vm0, %v4182_v41  ;;  %v4324_v37 = vcombine.high %v714_v31, %v718_v32  ;;  %v4332_v49 = vcombine.low %v714_v31, %v718_v32  ;;  %v4362_v31 = vcombine.low %v730_v0, %v734_v4  ;;  %v754_v4 = vld [vmem:[#allocation4 + $0x208] sm:$0xff] }
  0xd8   :  { %1313 = vmatpush1.bf16.msra.mxu0 %v4253_v38  ;;  %453 = vmatprep.mubr.f32.mxu1 %v6026_v1 }
  0xd9   :  { %1314 = vmatprep.subr.bf16.mxu0 %v4257_v45  ;;  %3681 = vmatprep.subr.bf16.mxu1 %v3680_v46  ;;  %6317 = vst [vmem:[#allocation41_spill] sm:$0xff] %v4324_v37  ;;  %v726_v46 = vld [vmem:[#allocation4 + $0x128] sm:$0xff]  ;;  %6319 = vst [vmem:[#allocation43_spill] sm:$0xff] %v4332_v49 }
  0xda   :  { %3683 = vmatpush1.bf16.msra.mxu1 %v3682_v51  ;;  %1330 = vmatprep.mubr.bf16.mxu0 %v6014_v60  ;;  %v4339_v56 = vcombine.high %v722_v44, %v726_v46  ;;  %v4347_v7 = vcombine.low %v722_v44, %v726_v46  ;;  %6327 = vst [vmem:[#allocation51_spill] sm:$0xff] %v4362_v31  ;;  %v700_v44 = vld [vmem:[#allocation4 + $0x58] sm:$0xff] }
  0xdb   :  { %3388 = vmatmul.mubr.msk.f32.gmra.mrb[20].mxu1 %vm216_vm0, %v4166_v39  ;;  %1339 = vmatprep.subr.bf16.mxu1 %v4263_v53  ;;  %v704_v46 = vld [vmem:[#allocation4 + $0x78] sm:$0xff] }
  0xdc   :  { %1315 = vmatpush1.bf16.msra.mxu0 %v4267_v54  ;;  %459 = vmatprep.mubr.f32.mxu1 %v6026_v1  ;;  %6321 = vst [vmem:[#allocation45_spill] sm:$0xff] %v4339_v56  ;;  %6323 = vst [vmem:[#allocation47_spill] sm:$0xff] %v4347_v7  ;;  %v708_v60 = vld [vmem:[#allocation4 + $0x98] sm:$0xff] }
  0xdd   :  { %1316 = vmatprep.subr.bf16.mxu0 %v4270_v55 }
  0xdf   :  { %3389 = vmatmul.mubr.msk.f32.gmra.mrb[22].mxu1 %vm216_vm0, %v4182_v41 }
  0xe0   :  { %1317 = vmatpush1.bf16.msra.mxu0 %v4278_v61  ;;  %641 = vmatprep.mubr.f32.mxu1 %v6026_v1 }
  0xe1   :  { %1318 = vmatprep.subr.bf16.mxu0 %v4281_v62 }
  0xe3   :  { %3398 = vmatmul.mubr.msk.f32.vlgmr.msra.gmra.mrb[24].mxu1 %vm216_vm0, %v4116_v52  ;;  %v793_v52 = vld [vmem:[#allocation4 + $0x340] sm:$0xff] }
  0xe4   :  { %1319 = vmatpush1.bf16.msra.mxu0 %v4287_v8  ;;  %1340 = vmatpush1.bf16.msra.mxu1 %v4289_v9  ;;  %v4321_v36 = vcombine.high %v793_v52, %v797_v30  ;;  %v4330_v47 = vcombine.low %v793_v52, %v797_v30  ;;  %v696_v52 = vld [vmem:[#allocation4 + $0x38] sm:$0xff] }
  0xe5   :  { %646 = vmatprep.mubr.f32.mxu1 %v6026_v1  ;;  %1320 = vmatprep.subr.bf16.mxu0 %v4292_v12 }
  0xe6   :  { %1341 = vmatprep.subr.bf16.mxu1 %v4294_v13  ;;  %6316 = vst [vmem:[#allocation40_spill] sm:$0xff] %v4321_v36  ;;  %6318 = vst [vmem:[#allocation42_spill] sm:$0xff] %v4330_v47 }
  0xe7   :  { %3399 = vmatmul.mubr.msk.f32.gmra.mrb[26].mxu1 %vm216_vm0, %v4124_v63  ;;  %v801_v63 = vld [vmem:[#allocation4 + $0x380] sm:$0xff] }
  0xe8   :  { %1321 = vmatpush1.bf16.msra.mxu0 %v4300_v21  ;;  %1342 = vmatpush1.bf16.msra.mxu1 %v4302_v22  ;;  %v4336_v51 = vcombine.high %v801_v63, %v805_v43  ;;  %v4345_v6 = vcombine.low %v801_v63, %v805_v43  ;;  %v4369_v63 = vcombine.high %v692_v20, %v696_v52  ;;  %v750_v43 = vld [vmem:[#allocation4 + $0x1e8] sm:$0xff] }
  0xe9   :  { %652 = vmatprep.mubr.f32.mxu1 %v6026_v1  ;;  %1322 = vmatprep.subr.bf16.mxu0 %v4306_v23 }
  0xea   :  { %1343 = vmatprep.subr.bf16.mxu1 %v4309_v24  ;;  %6320 = vst [vmem:[#allocation44_spill] sm:$0xff] %v4336_v51  ;;  %6322 = vst [vmem:[#allocation46_spill] sm:$0xff] %v4345_v6 }
  0xeb   :  { %3400 = vmatmul.mubr.msk.f32.gmra.mrb[28].mxu1 %vm216_vm0, %v4129_v5  ;;  %v809_v5 = vld [vmem:[#allocation4 + $0x3c0] sm:$0xff]  ;;  %6329 = vst [vmem:[#allocation53_spill] sm:$0xff] %v4369_v63 }
  0xec   :  { %1323 = vmatpush1.bf16.msra.mxu0 %v4315_v33  ;;  %1344 = vmatpush1.bf16.msra.mxu1 %v4317_v34  ;;  %v4351_v15 = vcombine.high %v809_v5, %v813_v59  ;;  %v4360_v30 = vcombine.low %v809_v5, %v813_v59  ;;  %v4377_v59 = vcombine.low %v692_v20, %v696_v52 }
  0xed   :  { %658 = vmatprep.mubr.f32.mxu1 %v6026_v1  ;;  %1324 = vmatprep.subr.bf16.mxu0 %v4321_v36  ;;  %v4397_v20 = vcombine.high %v754_v4, %v758_v40 }
  0xee   :  { %1345 = vmatprep.subr.bf16.mxu1 %v4324_v37  ;;  %6324 = vst [vmem:[#allocation48_spill] sm:$0xff] %v4351_v15  ;;  %6326 = vst [vmem:[#allocation50_spill] sm:$0xff] %v4360_v30 }
  0xef   :  { %3401 = vmatmul.mubr.msk.f32.gmra.mrb[30].mxu1 %vm216_vm0, %v4147_v26  ;;  %v738_v26 = vld [vmem:[#allocation4 + $0x188] sm:$0xff]  ;;  %6331 = vst [vmem:[#allocation55_spill] sm:$0xff] %v4377_v59  ;;  %6337 = vst [vmem:[#allocation60_spill] sm:$0xff] %v4397_v20 }
  0xf0   :  { %1325 = vmatpush1.bf16.msra.mxu0 %v4330_v47  ;;  %1346 = vmatpush1.bf16.msra.mxu1 %v4332_v49  ;;  %v4366_v32 = vcombine.high %v738_v26, %v742_v17  ;;  %v4375_v5 = vcombine.low %v738_v26, %v742_v17  ;;  %v4393_v17 = vcombine.low %v700_v44, %v704_v46  ;;  %v736_v47 = vld [vmem:[#allocation4 + $0x178] sm:$0xff] }
  0xf1   :  { %664 = vmatprep.mubr.f32.mxu1 %v6026_v1  ;;  %1326 = vmatprep.subr.bf16.mxu0 %v4336_v51  ;;  %v720_v51 = vld [vmem:[#allocation4 + $0xf8] sm:$0xff] }
  0xf2   :  { %1347 = vmatprep.subr.bf16.mxu1 %v4339_v56  ;;  %6328 = vst [vmem:[#allocation52_spill] sm:$0xff] %v4366_v32  ;;  %6330 = vst [vmem:[#allocation54_spill] sm:$0xff] %v4375_v5 }
  0xf3   :  { %3402 = vmatmul.mubr.msk.f32.gmra.mrb[32].mxu1 %vm216_vm0, %v4134_v14  ;;  %v746_v14 = vld [vmem:[#allocation4 + $0x1c8] sm:$0xff]  ;;  %6336 = vst [vmem:[#allocation59_spill] sm:$0xff] %v4393_v17 }
  0xf4   :  { %1327 = vmatpush1.bf16.msra.mxu0 %v4345_v6  ;;  %1348 = vmatpush1.bf16.msra.mxu1 %v4347_v7  ;;  %v4381_v0 = vcombine.high %v746_v14, %v750_v43  ;;  %v4391_v26 = vcombine.low %v746_v14, %v750_v43  ;;  %v716_v6 = vld [vmem:[#allocation4 + $0xd8] sm:$0xff]  ;;  %v4407_v14 = vcombine.low %v754_v4, %v758_v40 }
  0xf5   :  { %670 = vmatprep.mubr.f32.mxu1 %v6026_v1  ;;  %1328 = vmatprep.subr.bf16.mxu0 %v4351_v15  ;;  %v6334_v15 = vmov 0.0|0.0  }
  0xf6   :  { %1349 = vmatprep.subr.bf16.mxu1 %v4354_v16  ;;  %6332 = vst [vmem:[#allocation56_spill] sm:$0xff] %v4381_v0  ;;  %6335 = vst [vmem:[#allocation58_spill] sm:$0xff] %v4391_v26 }
  0xf7   :  { %3403 = vmatmul.mubr.msk.f32.gmra.mrb[34].mxu1 %vm216_vm0, %v4152_v27  ;;  %v4384_v27 = vcombine.high %v700_v44, %v704_v46  ;;  %6339 = vst [vmem:[#allocation62_spill] sm:$0xff] %v4407_v14  ;;  %v4415_v46 = vcombine.high %v716_v6, %v720_v51 }
  0xf8   :  { %1329 = vmatpush1.bf16.msra.mxu0 %v4360_v30  ;;  %1350 = vmatpush1.bf16.msra.mxu1 %v4362_v31  ;;  %v712_v30 = vld [vmem:[#allocation4 + $0xb8] sm:$0xff] }
  0xf9   :  { %676 = vmatprep.mubr.f32.mxu1 %v6026_v1  ;;  %1351 = vmatprep.subr.bf16.mxu1 %v4366_v32  ;;  %6333 = vst [vmem:[#allocation57_spill] sm:$0xff] %v4384_v27  ;;  %v4399_v52 = vcombine.high %v708_v60, %v712_v30  ;;  %v4409_v43 = vcombine.low %v708_v60, %v712_v30  ;;  %6342 = vst [vmem:[#allocation65_spill] sm:$0xff] %v4415_v46 }
  0xfa   :  { %1379 = vmatprep.subr.bf16.mxu0 %v4369_v63  ;;  %v762_v63 = vld [vmem:[#allocation4 + $0x248] sm:$0xff]  ;;  %v4422_v60 = vcombine.low %v716_v6, %v720_v51 }
  0xfb   :  { %1331 = vmatmul.mubr.bf16.vlgmr.msra.gmra.mrb[24].mxu0 %v6334_v15  ;;  %3404 = vmatmul.mubr.msk.f32.gmra.mrb[36].mxu1 %vm216_vm0, %v4166_v39  ;;  %6338 = vst [vmem:[#allocation61_spill] sm:$0xff] %v4399_v52  ;;  %v766_v39 = vld [vmem:[#allocation4 + $0x268] sm:$0xff]  ;;  %6340 = vst [vmem:[#allocation63_spill] sm:$0xff] %v4409_v43 }
  0xfc   :  { %1352 = vmatpush1.bf16.msra.mxu1 %v4375_v5  ;;  %1380 = vmatpush1.bf16.msra.mxu0 %v4377_v59  ;;  %v4413_v44 = vcombine.high %v762_v63, %v766_v39  ;;  %v724_v59 = vld [vmem:[#allocation4 + $0x118] sm:$0xff]  ;;  %v4420_v40 = vcombine.low %v762_v63, %v766_v39  ;;  %6344 = vst [vmem:[#allocation67_spill] sm:$0xff] %v4422_v60 }
  0xfd   :  { %682 = vmatprep.mubr.f32.mxu1 %v6026_v1  ;;  %1353 = vmatprep.subr.bf16.mxu1 %v4381_v0  ;;  %v770_v1 = vld [vmem:[#allocation4 + $0x288] sm:$0xff] }
  0xfe   :  { %1381 = vmatprep.subr.bf16.mxu0 %v4384_v27  ;;  %1411 = vmatprep.mubr.bf16.mxu0 %v6334_v15  ;;  %6341 = vst [vmem:[#allocation64_spill] sm:$0xff] %v4413_v44  ;;  %v774_v27 = vld [vmem:[#allocation4 + $0x2a8] sm:$0xff]  ;;  %6343 = vst [vmem:[#allocation66_spill] sm:$0xff] %v4420_v40 }
  0xff   :  { %3405 = vmatmul.mubr.msk.f32.gmra.mrb[38].mxu1 %vm216_vm0, %v4182_v41  ;;  %v728_v41 = vld [vmem:[#allocation4 + $0x138] sm:$0xff]  ;;  %v4426_v30 = vcombine.high %v770_v1, %v774_v27  ;;  %v4432_v63 = vcombine.low %v770_v1, %v774_v27 }
 0x100   :  { %1354 = vmatpush1.bf16.msra.mxu1 %v4391_v26  ;;  %1382 = vmatpush1.bf16.msra.mxu0 %v4393_v17  ;;  %v4428_v4 = vcombine.high %v724_v59, %v728_v41  ;;  %v782_v17 = vld [vmem:[#allocation4 + $0x2e8] sm:$0xff]  ;;  %v4434_v51 = vcombine.low %v724_v59, %v728_v41 }
 0x101   :  { %1355 = vmatprep.subr.bf16.mxu1 %v4397_v20  ;;  %1383 = vmatprep.subr.bf16.mxu0 %v4399_v52  ;;  %6345 = vst [vmem:[#allocation68_spill] sm:$0xff] %v4426_v30  ;;  %v778_v52 = vld [vmem:[#allocation4 + $0x2c8] sm:$0xff]  ;;  %v732_v20 = vld [vmem:[#allocation4 + $0x158] sm:$0xff]  ;;  %6347 = vst [vmem:[#allocation70_spill] sm:$0xff] %v4432_v63 }
 0x102   :  { %1371 = vmatprep.mubr.bf16.mxu1 %v6334_v15  ;;  %6346 = vst [vmem:[#allocation69_spill] sm:$0xff] %v4428_v4  ;;  %6348 = vst [vmem:[#allocation71_spill] sm:$0xff] %v4434_v51  ;;  %v4438_v6 = vcombine.high %v778_v52, %v782_v17  ;;  %v4440_v39 = vcombine.high %v732_v20, %v736_v47  ;;  %v4444_v1 = vcombine.low %v778_v52, %v782_v17 }
 0x103   :  { %v4446_v59 = vcombine.low %v732_v20, %v736_v47 }
 0x104   :  { %1356 = vmatpush1.bf16.msra.mxu1 %v4407_v14  ;;  %1384 = vmatpush1.bf16.msra.mxu0 %v4409_v43  ;;  %6349 = vst [vmem:[#allocation72_spill] sm:$0xff] %v4438_v6  ;;  %6350 = vst [vmem:[#allocation73_spill] sm:$0xff] %v4440_v39  ;;  %v790_v43 = vld [vmem:[#allocation4 + $0x328] sm:$0xff]  ;;  %v744_v14 = vld [vmem:[#allocation4 + $0x1b8] sm:$0xff] }
 0x105   :  { %1357 = vmatprep.subr.bf16.mxu1 %v4413_v44  ;;  %1385 = vmatprep.subr.bf16.mxu0 %v4415_v46  ;;  %v786_v46 = vld [vmem:[#allocation4 + $0x308] sm:$0xff]  ;;  %v740_v44 = vld [vmem:[#allocation4 + $0x198] sm:$0xff]  ;;  %6351 = vst [vmem:[#allocation74_spill] sm:$0xff] %v4444_v1  ;;  %6352 = vst [vmem:[#allocation75_spill] sm:$0xff] %v4446_v59 }
 0x106   :  { %v4450_v27 = vcombine.high %v786_v46, %v790_v43  ;;  %v4452_v41 = vcombine.high %v740_v44, %v744_v14  ;;  %v4456_v17 = vcombine.low %v786_v46, %v790_v43  ;;  %v4458_v47 = vcombine.low %v740_v44, %v744_v14 }
 0x108   :  { %1358 = vmatpush1.bf16.msra.mxu1 %v4420_v40  ;;  %1386 = vmatpush1.bf16.msra.mxu0 %v4422_v60  ;;  %6353 = vst [vmem:[#allocation76_spill] sm:$0xff] %v4450_v27  ;;  %6354 = vst [vmem:[#allocation77_spill] sm:$0xff] %v4452_v41  ;;  %v798_v60 = vld [vmem:[#allocation4 + $0x368] sm:$0xff]  ;;  %v752_v40 = vld [vmem:[#allocation4 + $0x1f8] sm:$0xff] }
 0x109   :  { %1359 = vmatprep.subr.bf16.mxu1 %v4426_v30  ;;  %1387 = vmatprep.subr.bf16.mxu0 %v4428_v4  ;;  %v794_v4 = vld [vmem:[#allocation4 + $0x348] sm:$0xff]  ;;  %v748_v30 = vld [vmem:[#allocation4 + $0x1d8] sm:$0xff]  ;;  %6355 = vst [vmem:[#allocation78_spill] sm:$0xff] %v4456_v17  ;;  %6356 = vst [vmem:[#allocation79_spill] sm:$0xff] %v4458_v47 }
 0x10a   :  { %v4462_v20 = vcombine.high %v794_v4, %v798_v60  ;;  %v4464_v52 = vcombine.high %v748_v30, %v752_v40  ;;  %v4468_v43 = vcombine.low %v794_v4, %v798_v60  ;;  %v4470_v14 = vcombine.low %v748_v30, %v752_v40 }
 0x10c   :  { %1360 = vmatpush1.bf16.msra.mxu1 %v4432_v63  ;;  %1388 = vmatpush1.bf16.msra.mxu0 %v4434_v51  ;;  %6357 = vst [vmem:[#allocation80_spill] sm:$0xff] %v4462_v20  ;;  %6358 = vst [vmem:[#allocation81_spill] sm:$0xff] %v4464_v52  ;;  %v806_v51 = vld [vmem:[#allocation4 + $0x3a8] sm:$0xff]  ;;  %v760_v63 = vld [vmem:[#allocation4 + $0x238] sm:$0xff] }
 0x10d   :  { %1361 = vmatprep.subr.bf16.mxu1 %v4438_v6  ;;  %1389 = vmatprep.subr.bf16.mxu0 %v4440_v39  ;;  %v802_v39 = vld [vmem:[#allocation4 + $0x388] sm:$0xff]  ;;  %v756_v6 = vld [vmem:[#allocation4 + $0x218] sm:$0xff]  ;;  %6359 = vst [vmem:[#allocation82_spill] sm:$0xff] %v4468_v43  ;;  %6360 = vst [vmem:[#allocation83_spill] sm:$0xff] %v4470_v14 }
 0x10e   :  { %v4474_v44 = vcombine.high %v802_v39, %v806_v51  ;;  %v4476_v46 = vcombine.high %v756_v6, %v760_v63  ;;  %v4480_v60 = vcombine.low %v802_v39, %v806_v51  ;;  %v4482_v40 = vcombine.low %v756_v6, %v760_v63  ;;  %v780_v6 = vld [vmem:[#allocation4 + $0x2d8] sm:$0xff] }
 0x10f   :  { %v784_v39 = vld [vmem:[#allocation4 + $0x2f8] sm:$0xff] }
 0x110   :  { %1362 = vmatpush1.bf16.msra.mxu1 %v4444_v1  ;;  %1390 = vmatpush1.bf16.msra.mxu0 %v4446_v59  ;;  %6361 = vst [vmem:[#allocation84_spill] sm:$0xff] %v4474_v44  ;;  %6362 = vst [vmem:[#allocation85_spill] sm:$0xff] %v4476_v46  ;;  %v814_v59 = vld [vmem:[#allocation4 + $0x3e8] sm:$0xff]  ;;  %v768_v1 = vld [vmem:[#allocation4 + $0x278] sm:$0xff] }
 0x111   :  { %1363 = vmatprep.subr.bf16.mxu1 %v4450_v27  ;;  %1391 = vmatprep.subr.bf16.mxu0 %v4452_v41  ;;  %v810_v41 = vld [vmem:[#allocation4 + $0x3c8] sm:$0xff]  ;;  %v764_v27 = vld [vmem:[#allocation4 + $0x258] sm:$0xff]  ;;  %6363 = vst [vmem:[#allocation86_spill] sm:$0xff] %v4480_v60 }
 0x112   :  { %v4486_v30 = vcombine.high %v810_v41, %v814_v59  ;;  %v4488_v4 = vcombine.high %v764_v27, %v768_v1  ;;  %v4494_v51 = vcombine.low %v764_v27, %v768_v1  ;;  %v788_v1 = vld [vmem:[#allocation4 + $0x318] sm:$0xff] }
 0x113   :  { %v792_v27 = vld [vmem:[#allocation4 + $0x338] sm:$0xff] }
 0x114   :  { %1364 = vmatpush1.bf16.msra.mxu1 %v4456_v17  ;;  %1392 = vmatpush1.bf16.msra.mxu0 %v4458_v47  ;;  %6364 = vst [vmem:[#allocation87_spill] sm:$0xff] %v4486_v30  ;;  %6365 = vst [vmem:[#allocation88_spill] sm:$0xff] %v4488_v4  ;;  %v776_v47 = vld [vmem:[#allocation4 + $0x2b8] sm:$0xff] }
 0x115   :  { %1365 = vmatprep.subr.bf16.mxu1 %v4462_v20  ;;  %1393 = vmatprep.subr.bf16.mxu0 %v4464_v52  ;;  %v772_v52 = vld [vmem:[#allocation4 + $0x298] sm:$0xff] }
 0x116   :  { %v4498_v63 = vcombine.high %v772_v52, %v776_v47 }
 0x118   :  { %1366 = vmatpush1.bf16.msra.mxu1 %v4468_v43  ;;  %1394 = vmatpush1.bf16.msra.mxu0 %v4470_v14  ;;  %v4492_v43 = vcombine.low %v810_v41, %v814_v59  ;;  %6367 = vst [vmem:[#allocation90_spill] sm:$0xff] %v4498_v63  ;;  %v4505_v59 = vcombine.high %v780_v6, %v784_v39 }
 0x119   :  { %1367 = vmatprep.subr.bf16.mxu1 %v4474_v44  ;;  %1395 = vmatprep.subr.bf16.mxu0 %v4476_v46  ;;  %v4502_v46 = vcombine.low %v772_v52, %v776_v47  ;;  %v4510_v41 = vcombine.low %v780_v6, %v784_v39  ;;  %v4514_v47 = vcombine.high %v788_v1, %v792_v27  ;;  %v796_v52 = vld [vmem:[#allocation4 + $0x358] sm:$0xff] }
 0x11a   :  { %6366 = vst [vmem:[#allocation89_spill] sm:$0xff] %v4492_v43  ;;  %6369 = vst [vmem:[#allocation92_spill] sm:$0xff] %v4505_v59  ;;  %v804_v39 = vld [vmem:[#allocation4 + $0x398] sm:$0xff] }
 0x11b   :  { %6368 = vst [vmem:[#allocation91_spill] sm:$0xff] %v4502_v46  ;;  %6370 = vst [vmem:[#allocation93_spill] sm:$0xff] %v4510_v41 }
 0x11c   :  { %1368 = vmatpush1.bf16.msra.mxu1 %v4480_v60  ;;  %1396 = vmatpush1.bf16.msra.mxu0 %v4482_v40  ;;  %6371 = vst [vmem:[#allocation94_spill] sm:$0xff] %v4514_v47 }
 0x11d   :  { %1369 = vmatprep.subr.bf16.mxu1 %v4486_v30  ;;  %1397 = vmatprep.subr.bf16.mxu0 %v4488_v4 }
 0x120   :  { %1370 = vmatpush1.bf16.msra.mxu1 %v4492_v43  ;;  %1398 = vmatpush1.bf16.msra.mxu0 %v4494_v51 }
 0x121   :  { %1399 = vmatprep.subr.bf16.mxu0 %v4498_v63  ;;  %1604 = vmatprep.subr.bf16.mxu1 %v4154_v28  ;;  %v800_v63 = vld [vmem:[#allocation4 + $0x378] sm:$0xff]  ;;  %v4519_v28 = vcombine.low %v788_v1, %v792_v27 }
 0x122   :  { %v4523_v6 = vcombine.high %v796_v52, %v800_v63  ;;  %v812_v27 = vld [vmem:[#allocation4 + $0x3d8] sm:$0xff] }
 0x123   :  { %1372 = vmatmul.mubr.bf16.vlgmr.msra.gmra.mrb[40].mxu1 %v6334_v15  ;;  %6372 = vst [vmem:[#allocation95_spill] sm:$0xff] %v4519_v28 }
 0x124   :  { %1400 = vmatpush1.bf16.msra.mxu0 %v4502_v46  ;;  %1605 = vmatpush1.bf16.msra.mxu1 %v4161_v35  ;;  %6373 = vst [vmem:[#allocation96_spill] sm:$0xff] %v4523_v6  ;;  %v808_v35 = vld [vmem:[#allocation4 + $0x3b8] sm:$0xff] }
 0x125   :  { %1401 = vmatprep.subr.bf16.mxu0 %v4505_v59  ;;  %1606 = vmatprep.subr.bf16.mxu1 %v4169_v42  ;;  %v4527_v42 = vcombine.low %v796_v52, %v800_v63  ;;  %v4531_v1 = vcombine.high %v804_v39, %v808_v35 }
 0x126   :  { %1636 = vmatprep.mubr.bf16.mxu1 %v6334_v15 }
 0x127   :  { %6374 = vst [vmem:[#allocation97_spill] sm:$0xff] %v4527_v42  ;;  %6375 = vst [vmem:[#allocation98_spill] sm:$0xff] %v4531_v1 }
 0x128   :  { %1402 = vmatpush1.bf16.msra.mxu0 %v4510_v41  ;;  %1607 = vmatpush1.bf16.msra.mxu1 %v4177_v48  ;;  %v816_v48 = vld [vmem:[#allocation4 + $0x3f8] sm:$0xff] }
 0x129   :  { %1403 = vmatprep.subr.bf16.mxu0 %v4514_v47  ;;  %1608 = vmatprep.subr.bf16.mxu1 %v4185_v50  ;;  %v4535_v47 = vcombine.low %v804_v39, %v808_v35  ;;  %v4539_v63 = vcombine.high %v812_v27, %v816_v48  ;;  %v4543_v52 = vcombine.low %v812_v27, %v816_v48  ;;  %v6379_v35 = vld [vmem:[#allocation42_spill] sm:$0xff]  ;;  %v6380_v48 = vld [vmem:[#allocation60_spill] sm:$0xff] }
 0x12a   :  { %v6381_v39 = vld [vmem:[#allocation44_spill] sm:$0xff]  ;;  %v6382_v27 = vld [vmem:[#allocation62_spill] sm:$0xff] }
 0x12b   :  { %6376 = vst [vmem:[#allocation99_spill] sm:$0xff] %v4535_v47  ;;  %6377 = vst [vmem:[#allocation100_spill] sm:$0xff] %v4539_v63 }
 0x12c   :  { %1404 = vmatpush1.bf16.msra.mxu0 %v4519_v28  ;;  %1609 = vmatpush1.bf16.msra.mxu1 %v4192_v57  ;;  %6378 = vst [vmem:[#allocation101_spill] sm:$0xff] %v4543_v52 }
 0x12d   :  { %1405 = vmatprep.subr.bf16.mxu0 %v4523_v6  ;;  %1610 = vmatprep.subr.bf16.mxu1 %v4196_v58 }
 0x130   :  { %1406 = vmatpush1.bf16.msra.mxu0 %v4527_v42  ;;  %1611 = vmatpush1.bf16.msra.mxu1 %v4205_v2 }
 0x131   :  { %1407 = vmatprep.subr.bf16.mxu0 %v4531_v1  ;;  %1612 = vmatprep.subr.bf16.mxu1 %v4209_v3 }
 0x134   :  { %1408 = vmatpush1.bf16.msra.mxu0 %v4535_v47  ;;  %1613 = vmatpush1.bf16.msra.mxu1 %v4217_v10 }
 0x135   :  { %1409 = vmatprep.subr.bf16.mxu0 %v4539_v63  ;;  %1614 = vmatprep.subr.bf16.mxu1 %v4221_v11 }
 0x138   :  { %1410 = vmatpush1.bf16.msra.mxu0 %v4543_v52  ;;  %1615 = vmatpush1.bf16.msra.mxu1 %v4229_v18 }
 0x139   :  { %1645 = vmatprep.subr.bf16.mxu0 %v4263_v53  ;;  %1616 = vmatprep.subr.bf16.mxu1 %v4233_v19 }
 0x13b   :  { %1412 = vmatmul.mubr.bf16.vlgmr.msra.gmra.mrb[28].mxu0 %v6334_v15 }
 0x13c   :  { %1646 = vmatpush1.bf16.msra.mxu0 %v4289_v9  ;;  %1617 = vmatpush1.bf16.msra.mxu1 %v4241_v25 }
 0x13d   :  { %1647 = vmatprep.subr.bf16.mxu0 %v4294_v13  ;;  %1618 = vmatprep.subr.bf16.mxu1 %v4245_v29 }
 0x13e   :  { %1677 = vmatprep.mubr.bf16.mxu0 %v6334_v15 }
 0x140   :  { %1648 = vmatpush1.bf16.msra.mxu0 %v4302_v22  ;;  %1619 = vmatpush1.bf16.msra.mxu1 %v4253_v38 }
 0x141   :  { %1649 = vmatprep.subr.bf16.mxu0 %v4309_v24  ;;  %1620 = vmatprep.subr.bf16.mxu1 %v4257_v45 }
 0x144   :  { %1650 = vmatpush1.bf16.msra.mxu0 %v4317_v34  ;;  %1621 = vmatpush1.bf16.msra.mxu1 %v4267_v54 }
 0x145   :  { %1651 = vmatprep.subr.bf16.mxu0 %v4324_v37  ;;  %1622 = vmatprep.subr.bf16.mxu1 %v4270_v55 }
 0x148   :  { %1652 = vmatpush1.bf16.msra.mxu0 %v4332_v49  ;;  %1623 = vmatpush1.bf16.msra.mxu1 %v4278_v61  ;;  %v6391_v61 = vld [vmem:[#allocation74_spill] sm:$0xff] }
 0x149   :  { %1653 = vmatprep.subr.bf16.mxu0 %v4339_v56  ;;  %1624 = vmatprep.subr.bf16.mxu1 %v4281_v62  ;;  %v6389_v62 = vld [vmem:[#allocation70_spill] sm:$0xff] }
 0x14c   :  { %1654 = vmatpush1.bf16.msra.mxu0 %v4347_v7  ;;  %1625 = vmatpush1.bf16.msra.mxu1 %v4287_v8  ;;  %v6387_v8 = vld [vmem:[#allocation50_spill] sm:$0xff] }
 0x14d   :  { %1655 = vmatprep.subr.bf16.mxu0 %v4354_v16  ;;  %1626 = vmatprep.subr.bf16.mxu1 %v4292_v12  ;;  %v6385_v12 = vld [vmem:[#allocation48_spill] sm:$0xff] }
 0x150   :  { %1656 = vmatpush1.bf16.msra.mxu0 %v4362_v31  ;;  %1627 = vmatpush1.bf16.msra.mxu1 %v4300_v21  ;;  %v6383_v21 = vld [vmem:[#allocation46_spill] sm:$0xff] }
 0x151   :  { %1657 = vmatprep.subr.bf16.mxu0 %v4366_v32  ;;  %1628 = vmatprep.subr.bf16.mxu1 %v4306_v23  ;;  %v6384_v23 = vld [vmem:[#allocation64_spill] sm:$0xff] }
 0x154   :  { %1658 = vmatpush1.bf16.msra.mxu0 %v4375_v5  ;;  %1629 = vmatpush1.bf16.msra.mxu1 %v4315_v33  ;;  %v6386_v33 = vld [vmem:[#allocation66_spill] sm:$0xff] }
 0x155   :  { %1659 = vmatprep.subr.bf16.mxu0 %v4381_v0  ;;  %1630 = vmatprep.subr.bf16.mxu1 %v4321_v36  ;;  %v6388_v36 = vld [vmem:[#allocation68_spill] sm:$0xff] }
 0x158   :  { %1660 = vmatpush1.bf16.msra.mxu0 %v4391_v26  ;;  %1631 = vmatpush1.bf16.msra.mxu1 %v6379_v35  ;;  %v6390_v35 = vld [vmem:[#allocation72_spill] sm:$0xff] }
 0x159   :  { %1661 = vmatprep.subr.bf16.mxu0 %v6380_v48  ;;  %1632 = vmatprep.subr.bf16.mxu1 %v6381_v39  ;;  %v6392_v39 = vld [vmem:[#allocation76_spill] sm:$0xff]  ;;  %v695_v48 = vld [vmem:[#allocation4 + $0x30] sm:$0xff] }
 0x15c   :  { %1662 = vmatpush1.bf16.msra.mxu0 %v6382_v27  ;;  %1633 = vmatpush1.bf16.msra.mxu1 %v6383_v21  ;;  %v6393_v21 = vld [vmem:[#allocation82_spill] sm:$0xff] }
 0x15d   :  { %1663 = vmatprep.subr.bf16.mxu0 %v6384_v23  ;;  %1634 = vmatprep.subr.bf16.mxu1 %v6385_v12 }
 0x160   :  { %1664 = vmatpush1.bf16.msra.mxu0 %v6386_v33  ;;  %1635 = vmatpush1.bf16.msra.mxu1 %v6387_v8  ;;  %v6394_v8 = vlaneseq }
 0x161   :  { %1665 = vmatprep.subr.bf16.mxu0 %v6388_v36 }
 0x162   :  { %v4605_v12 = vshrl.u32 %v6394_v8, 7 }
 0x164   :  { %1666 = vmatpush1.bf16.msra.mxu0 %v6389_v62  ;;  %6395 = vst [vmem:[#allocation102_spill] sm:$0xff] %v4605_v12 }
 0x165   :  { %1667 = vmatprep.subr.bf16.mxu0 %v6390_v35 }
 0x168   :  { %1668 = vmatpush1.bf16.msra.mxu0 %v6391_v61  ;;  %v6396_v61 = vld [vmem:[#allocation53_spill] sm:$0xff] }
 0x169   :  { %1669 = vmatprep.subr.bf16.mxu0 %v6392_v39  ;;  %v178_v39 = vsub.s32 0, %v4605_v12 }
 0x16c   :  { %1670 = vmatpush1.bf16.msra.mxu0 %v4456_v17 }
 0x16d   :  { %1671 = vmatprep.subr.bf16.mxu0 %v4462_v20  ;;  %v4612_v20 = vld [vmem:[%s6008_s2] sm:$0xff] }
 0x16e   :  { %6397 = vst [vmem:[#allocation103_spill] sm:$0xff] %v4612_v20 }
 0x170   :  { %1672 = vmatpush1.bf16.msra.mxu0 %v6393_v21 }
 0x171   :  { %1673 = vmatprep.subr.bf16.mxu0 %v4474_v44 }
 0x174   :  { %1674 = vmatpush1.bf16.msra.mxu0 %v4480_v60  ;;  %v182_v60 = vsub.s32 1, %v4605_v12 }
 0x175   :  { %1675 = vmatprep.subr.bf16.mxu0 %v4486_v30 }
 0x176   :  { %v4623_v8 = vrot.slane %v4612_v20, %v182_v60 }
 0x178   :  { %1676 = vmatpush1.bf16.msra.mxu0 %v4492_v43  ;;  %v4620_v43 = vrot.slane %v4612_v20, %v178_v39 }
 0x179   :  { %1727 = vmatprep.subr.bf16.mxu0 %v6396_v61 }
 0x17e   :  { %v4614_v21 = vpop.f32.mrb[0].mxu0 }
 0x17f   :  { %v4617_v44 = vpop.f32.mrb[1].mxu0 }
 0x182   :  { %v313_v61 = vpop.f32.mrb[2].mxu0 }
 0x183   :  { %v4626_v30 = vadd.f32 %v313_v61, %v4620_v43  ;;  %v315_v17 = vpop.f32.mrb[3].mxu0 }
 0x184   :  { %v4629_v35 = vadd.f32 %v315_v17, %v4623_v8 }
 0x185   :  { %6398 = vst [vmem:[#allocation104_spill] sm:$0xff] %v4626_v30 }
 0x186   :  { %6399 = vst [vmem:[#allocation105_spill] sm:$0xff] %v4629_v35  ;;  %v319_v62 = vpop.f32.mrb[4].mxu0  ;;  %v331_v36 = vpop.f32.mrb[0].mxu1 }
 0x187   :  { %v4632_v33 = vadd.f32 %v319_v62, %v4620_v43  ;;  %v4635_v23 = vadd.f32 %v331_v36, %v4620_v43  ;;  %v321_v39 = vpop.f32.mrb[5].mxu0  ;;  %v333_v55 = vpop.f32.mrb[1].mxu1 }
 0x188   :  { %v4638_v60 = vadd.f32 %v321_v39, %v4623_v8  ;;  %v4641_v61 = vadd.f32 %v333_v55, %v4623_v8 }
 0x189   :  { %6400 = vst [vmem:[#allocation106_spill] sm:$0xff] %v4632_v33  ;;  %6401 = vst [vmem:[#allocation107_spill] sm:$0xff] %v4635_v23 }
 0x18a   :  { %6402 = vst [vmem:[#allocation108_spill] sm:$0xff] %v4638_v60  ;;  %6403 = vst [vmem:[#allocation109_spill] sm:$0xff] %v4641_v61  ;;  %v325_v30 = vpop.f32.mrb[6].mxu0  ;;  %v337_v27 = vpop.f32.mrb[2].mxu1 }
 0x18b   :  { %v4644_v17 = vadd.f32 %v325_v30, %v4620_v43  ;;  %v4647_v35 = vadd.f32 %v337_v27, %v4620_v43  ;;  %v327_v62 = vpop.f32.mrb[7].mxu0  ;;  %v339_v33 = vpop.f32.mrb[3].mxu1 }
 0x18c   :  { %v4650_v36 = vadd.f32 %v327_v62, %v4623_v8  ;;  %v4653_v23 = vadd.f32 %v339_v33, %v4623_v8 }
 0x18d   :  { %6404 = vst [vmem:[#allocation110_spill] sm:$0xff] %v4644_v17  ;;  %6405 = vst [vmem:[#allocation111_spill] sm:$0xff] %v4647_v35 }
 0x18e   :  { %6406 = vst [vmem:[#allocation112_spill] sm:$0xff] %v4650_v36  ;;  %6407 = vst [vmem:[#allocation113_spill] sm:$0xff] %v4653_v23  ;;  %v343_v39 = vpop.f32.mrb[4].mxu1  ;;  %v532_v60 = vpop.f32.mrb[8].mxu0 }
 0x18f   :  { %v4656_v55 = vadd.f32 %v343_v39, %v4620_v43  ;;  %v345_v61 = vpop.f32.mrb[5].mxu1  ;;  %v533_v54 = vpop.f32.mrb[9].mxu0  ;;  %v186_v60 = vsub.s32 2, %v4605_v12 }
 0x190   :  { %v4659_v30 = vadd.f32 %v345_v61, %v4623_v8 }
 0x191   :  { %6408 = vst [vmem:[#allocation114_spill] sm:$0xff] %v4656_v55  ;;  %v4679_v55 = vrot.slane %v4612_v20, %v186_v60 }
 0x192   :  { %6409 = vst [vmem:[#allocation115_spill] sm:$0xff] %v4659_v30  ;;  %v349_v27 = vpop.f32.mrb[6].mxu1  ;;  %v4661_v35 = vpop.f32.mrb[10].mxu0 }
 0x193   :  { %6410 = vst [vmem:[#allocation116_spill] sm:$0xff] %v4661_v35  ;;  %v4664_v17 = vadd.f32 %v349_v27, %v4620_v43  ;;  %v351_v62 = vpop.f32.mrb[7].mxu1  ;;  %v4666_v36 = vpop.f32.mrb[11].mxu0 }
 0x194   :  { %6412 = vst [vmem:[#allocation118_spill] sm:$0xff] %v4666_v36  ;;  %v4669_v33 = vadd.f32 %v351_v62, %v4623_v8 }
 0x195   :  { %6411 = vst [vmem:[#allocation117_spill] sm:$0xff] %v4664_v17 }
 0x196   :  { %6413 = vst [vmem:[#allocation119_spill] sm:$0xff] %v4669_v33  ;;  %v4672_v39 = vpop.f32.mrb[8].mxu1  ;;  %v4674_v54 = vpop.f32.mrb[12].mxu0 }
 0x197   :  { %6414 = vst [vmem:[#allocation120_spill] sm:$0xff] %v4674_v54  ;;  %v422_v61 = vpop.f32.mrb[9].mxu1  ;;  %v4676_v30 = vpop.f32.mrb[13].mxu0  ;;  %v691_v54 = vld [vmem:[#allocation4 + $0x10] sm:$0xff] }
 0x198   :  { %6415 = vst [vmem:[#allocation121_spill] sm:$0xff] %v4676_v30 }
 0x19a   :  { %v425_v27 = vpop.f32.mrb[10].mxu1  ;;  %v4681_v17 = vpop.f32.mrb[14].mxu0 }
 0x19b   :  { %6416 = vst [vmem:[#allocation122_spill] sm:$0xff] %v4681_v17  ;;  %v4684_v23 = vadd.f32 %v425_v27, %v4679_v55  ;;  %v4686_v62 = vpop.f32.mrb[11].mxu1  ;;  %v4688_v33 = vpop.f32.mrb[15].mxu0  ;;  %v4699_v17 = vcombine.high %v691_v54, %v695_v48 }
 0x19c   :  { %6418 = vst [vmem:[#allocation124_spill] sm:$0xff] %v4686_v62  ;;  %6419 = vst [vmem:[#allocation125_spill] sm:$0xff] %v4688_v33 }
 0x19d   :  { %6417 = vst [vmem:[#allocation123_spill] sm:$0xff] %v4684_v23  ;;  %6424 = vst [vmem:[#allocation130_spill] sm:$0xff] %v4699_v17  ;;  %1686 = vmatprep.subr.bf16.mxu1 %v4699_v17 }
 0x19e   :  { %v431_v36 = vpop.f32.mrb[12].mxu1  ;;  %v4690_v35 = vpop.f32.mrb[16].mxu0 }
 0x19f   :  { %6420 = vst [vmem:[#allocation126_spill] sm:$0xff] %v4690_v35  ;;  %v4693_v61 = vadd.f32 %v431_v36, %v4679_v55  ;;  %v4695_v30 = vpop.f32.mrb[13].mxu1  ;;  %v4697_v60 = vpop.f32.mrb[17].mxu0 }
 0x1a0   :  { %6422 = vst [vmem:[#allocation128_spill] sm:$0xff] %v4695_v30  ;;  %6423 = vst [vmem:[#allocation129_spill] sm:$0xff] %v4697_v60 }
 0x1a1   :  { %6421 = vst [vmem:[#allocation127_spill] sm:$0xff] %v4693_v61 }
 0x1a2   :  { %v437_v27 = vpop.f32.mrb[14].mxu1  ;;  %v4701_v23 = vpop.f32.mrb[18].mxu0 }
 0x1a3   :  { %6425 = vst [vmem:[#allocation131_spill] sm:$0xff] %v4701_v23  ;;  %v4704_v62 = vadd.f32 %v437_v27, %v4679_v55  ;;  %v4706_v33 = vpop.f32.mrb[15].mxu1  ;;  %v4708_v35 = vpop.f32.mrb[19].mxu0 }
 0x1a4   :  { %6427 = vst [vmem:[#allocation133_spill] sm:$0xff] %v4706_v33  ;;  %6428 = vst [vmem:[#allocation134_spill] sm:$0xff] %v4708_v35  ;;  %v4729_v33 = vcombine.low %v691_v54, %v695_v48 }
 0x1a5   :  { %6426 = vst [vmem:[#allocation132_spill] sm:$0xff] %v4704_v62 }
 0x1a6   :  { %v443_v36 = vpop.f32.mrb[16].mxu1  ;;  %v4711_v61 = vpop.f32.mrb[20].mxu0 }
 0x1a7   :  { %6429 = vst [vmem:[#allocation135_spill] sm:$0xff] %v4711_v61  ;;  %v4714_v60 = vadd.f32 %v443_v36, %v4679_v55  ;;  %v4716_v30 = vpop.f32.mrb[17].mxu1  ;;  %v4718_v45 = vpop.f32.mrb[21].mxu0 }
 0x1a8   :  { %6431 = vst [vmem:[#allocation137_spill] sm:$0xff] %v4716_v30  ;;  %6432 = vst [vmem:[#allocation138_spill] sm:$0xff] %v4718_v45 }
 0x1a9   :  { %6430 = vst [vmem:[#allocation136_spill] sm:$0xff] %v4714_v60 }
 0x1aa   :  { %v449_v23 = vpop.f32.mrb[18].mxu1  ;;  %v4720_v26 = vpop.f32.mrb[22].mxu0 }
 0x1ab   :  { %6433 = vst [vmem:[#allocation139_spill] sm:$0xff] %v4720_v26  ;;  %v4723_v27 = vadd.f32 %v449_v23, %v4679_v55  ;;  %v4725_v62 = vpop.f32.mrb[19].mxu1  ;;  %v4727_v35 = vpop.f32.mrb[23].mxu0  ;;  %v202_v23 = vsub.s32 6, %v4605_v12 }
 0x1ac   :  { %6435 = vst [vmem:[#allocation141_spill] sm:$0xff] %v4725_v62  ;;  %6436 = vst [vmem:[#allocation142_spill] sm:$0xff] %v4727_v35 }
 0x1ad   :  { %6434 = vst [vmem:[#allocation140_spill] sm:$0xff] %v4723_v27  ;;  %v203_v35 = vrot.slane %v4612_v20, %v202_v23 }
 0x1ae   :  { %v455_v61 = vpop.f32.mrb[20].mxu1 }
 0x1af   :  { %v4732_v36 = vadd.f32 %v455_v61, %v4679_v55  ;;  %v4734_v60 = vpop.f32.mrb[21].mxu1 }
 0x1b0   :  { %6438 = vst [vmem:[#allocation144_spill] sm:$0xff] %v4734_v60 }
 0x1b1   :  { %6437 = vst [vmem:[#allocation143_spill] sm:$0xff] %v4732_v36 }
 0x1b2   :  { %v461_v30 = vpop.f32.mrb[22].mxu1 }
 0x1b3   :  { %v4737_v45 = vadd.f32 %v461_v30, %v4679_v55  ;;  %v4739_v26 = vpop.f32.mrb[23].mxu1 }
 0x1b4   :  { %6440 = vst [vmem:[#allocation146_spill] sm:$0xff] %v4739_v26 }
 0x1b5   :  { %6439 = vst [vmem:[#allocation145_spill] sm:$0xff] %v4737_v45 }
 0x1b6   :  { %v643_v27 = vpop.f32.mrb[24].mxu1 }
 0x1b7   :  { %v645_v62 = vpop.f32.mrb[25].mxu1 }
 0x1ba   :  { %v648_v48 = vpop.f32.mrb[26].mxu1 }
 0x1bb   :  { %v4743_v54 = vadd.f32 %v648_v48, %v203_v35  ;;  %v4745_v17 = vpop.f32.mrb[27].mxu1 }
 0x1bc   :  { %6442 = vst [vmem:[#allocation148_spill] sm:$0xff] %v4745_v17 }
 0x1bd   :  { %6441 = vst [vmem:[#allocation147_spill] sm:$0xff] %v4743_v54 }
 0x1be   :  { %v654_v61 = vpop.f32.mrb[28].mxu1 }
 0x1bf   :  { %v4747_v36 = vadd.f32 %v654_v61, %v203_v35  ;;  %v4749_v60 = vpop.f32.mrb[29].mxu1  ;;  %v308_v61 = vadd.f32 %v4614_v21, %v4620_v43  ;;  %v421_v21 = vadd.f32 %v4672_v39, %v4679_v55 }
 0x1c0   :  { %6444 = vst [vmem:[#allocation150_spill] sm:$0xff] %v4749_v60 }
 0x1c1   :  { %6443 = vst [vmem:[#allocation149_spill] sm:$0xff] %v4747_v36  ;;  %v310_v36 = vadd.f32 %v4617_v44, %v4623_v8 }
 0x1c2   :  { %v660_v30 = vpop.f32.mrb[30].mxu1 }
 0x1c3   :  { %v4751_v45 = vadd.f32 %v660_v30, %v203_v35  ;;  %v4753_v26 = vpop.f32.mrb[31].mxu1 }
 0x1c4   :  { %6446 = vst [vmem:[#allocation152_spill] sm:$0xff] %v4753_v26 }
 0x1c5   :  { %6445 = vst [vmem:[#allocation151_spill] sm:$0xff] %v4751_v45 }
 0x1c6   :  { %v666_v12 = vpop.f32.mrb[32].mxu1 }
 0x1c7   :  { %v4755_v38 = vadd.f32 %v666_v12, %v203_v35  ;;  %v4757_v62 = vpop.f32.mrb[33].mxu1 }
 0x1c8   :  { %6448 = vst [vmem:[#allocation154_spill] sm:$0xff] %v4757_v62 }
 0x1c9   :  { %6447 = vst [vmem:[#allocation153_spill] sm:$0xff] %v4755_v38 }
 0x1ca   :  { %v672_v23 = vpop.f32.mrb[34].mxu1 }
 0x1cb   :  { %v4759_v48 = vadd.f32 %v672_v23, %v203_v35  ;;  %v4761_v54 = vpop.f32.mrb[35].mxu1 }
 0x1cc   :  { %6450 = vst [vmem:[#allocation156_spill] sm:$0xff] %v4761_v54 }
 0x1cd   :  { %6449 = vst [vmem:[#allocation155_spill] sm:$0xff] %v4759_v48 }
 0x1ce   :  { %v1332_v30 = vpop.f32.mrb[24].mxu0  ;;  %v678_v45 = vpop.f32.mrb[36].mxu1 }
 0x1cf   :  { %v1333_v60 = vadd.f32 %v1332_v30, %v308_v61  ;;  %v4767_v26 = vadd.f32 %v678_v45, %v203_v35  ;;  %v1334_v12 = vpop.f32.mrb[25].mxu0  ;;  %v4769_v38 = vpop.f32.mrb[37].mxu1 }
 0x1d0   :  { %6452 = vst [vmem:[#allocation158_spill] sm:$0xff] %v4769_v38  ;;  %v1335_v62 = vadd.f32 %v1334_v12, %v310_v36  ;;  %v1336_v17 = vpop.f32.mrb[26].mxu0 }
 0x1d1   :  { %6451 = vst [vmem:[#allocation157_spill] sm:$0xff] %v4767_v26  ;;  %v1337_v23 = vpop.f32.mrb[27].mxu0  ;;  %v3502_v26 = vmul.f32 -1.442695, %v1333_v60 }
 0x1d2   :  { %v684_v48 = vpop.f32.mrb[38].mxu1  ;;  %v3503_v30 = vmul.f32 -1.442695, %v1335_v62 }
 0x1d3   :  { %v4771_v20 = vadd.f32 %v684_v48, %v203_v35  ;;  %v4773_v54 = vpop.f32.mrb[39].mxu1 }
 0x1d4   :  { %6454 = vst [vmem:[#allocation160_spill] sm:$0xff] %v4773_v54  ;;  %3712 = vpow2.f32 %v3503_v30 }
 0x1d5   :  { %6453 = vst [vmem:[#allocation159_spill] sm:$0xff] %v4771_v20  ;;  %3714 = vpow2.f32 %v3502_v26  ;;  %v644_v20 = vadd.f32 %v643_v27, %v203_v35 }
 0x1de   :  { %v3713_v36 = vpop.eup %3712 }
 0x1df   :  { %v3715_v17 = vpop.eup %3714  ;;  %v1429_v23 = vadd.f32 1.0, %v3713_v36 }
 0x1e0   :  { %v1428_v48 = vadd.f32 1.0, %v3715_v17  ;;  %v707_v17 = vld [vmem:[#allocation4 + $0x90] sm:$0xff] }
 0x1f6   :  { %v1373_v43 = vpop.f32.mrb[40].mxu1 }
 0x1f7   :  { %v1374_v44 = vadd.f32 %v1373_v43, %v421_v21  ;;  %v1375_v8 = vpop.f32.mrb[41].mxu1 }
 0x1f8   :  { %v1376_v61 = vpop.f32.mrb[42].mxu1 }
 0x1f9   :  { %v1377_v45 = vpop.f32.mrb[43].mxu1  ;;  %v3504_v12 = vmul.f32 -1.442695, %v1374_v44 }
 0x1fb   :  { %3716 = vpow2.f32 %v3504_v12  ;;  %v711_v12 = vld [vmem:[#allocation4 + $0xb0] sm:$0xff] }
 0x1fc   :  { %3718 = vrcp.f32 %v1429_v23  ;;  %v6455_v23 = vld [vmem:[#allocation55_spill] sm:$0xff] }
 0x1fd   :  { %3720 = vrcp.f32 %v1428_v48 }
 0x205   :  { %v3717_v43 = vpop.eup %3716 }
 0x206   :  { %v3719_v62 = vpop.eup %3718  ;;  %v1430_v26 = vadd.f32 1.0, %v3717_v43  ;;  %v719_v43 = vld [vmem:[#allocation4 + $0xf0] sm:$0xff] }
 0x207   :  { %v3721_v60 = vpop.eup %3720  ;;  %v1438_v61 = vmul.f32 0.0, %v3719_v62  ;;  %v6457_v62 = vld [vmem:[#allocation59_spill] sm:$0xff] }
 0x20e   :  { %v1413_v54 = vpop.f32.mrb[28].mxu0 }
 0x20f   :  { %v1414_v38 = vadd.f32 %v1413_v54, %v644_v20  ;;  %v1415_v55 = vpop.f32.mrb[29].mxu0  ;;  %v699_v20 = vld [vmem:[#allocation4 + $0x50] sm:$0xff] }
 0x210   :  { %v1416_v39 = vpop.f32.mrb[30].mxu0  ;;  %v703_v54 = vld [vmem:[#allocation4 + $0x70] sm:$0xff]  ;;  %v6456_v55 = vld [vmem:[#allocation57_spill] sm:$0xff] }
 0x211   :  { %3722 = vtanh.f32 %v1414_v38  ;;  %v1417_v21 = vpop.f32.mrb[31].mxu0  ;;  %v4782_v38 = vcombine.high %v699_v20, %v703_v54  ;;  %v4788_v48 = vcombine.low %v699_v20, %v703_v54  ;;  %v4792_v39 = vcombine.high %v707_v17, %v711_v12  ;;  %v731_v54 = vld [vmem:[#allocation4 + $0x150] sm:$0xff] }
 0x212   :  { %3724 = vrcp.f32 %v1430_v26  ;;  %v715_v21 = vld [vmem:[#allocation4 + $0xd0] sm:$0xff] }
 0x213   :  { %v4802_v26 = vcombine.high %v715_v21, %v719_v43 }
 0x215   :  { %6460 = vst [vmem:[#allocation57_spill] sm:$0xff] %v4802_v26 }
 0x21b   :  { %v3723_v8 = vpop.eup %3722 }
 0x21c   :  { %v1439_v45 = vmul.f32 %v3723_v8, %v3721_v60  ;;  %v3725_v35 = vpop.eup %3724  ;;  %v4798_v60 = vcombine.low %v707_v17, %v711_v12  ;;  %v6459_v8 = vld [vmem:[#allocation61_spill] sm:$0xff]  ;;  %v6465_v17 = vld [vmem:[#allocation67_spill] sm:$0xff] }
 0x21e   :  { %v4777_v44 = vadd.f32 %v1439_v45, %v1438_v61  ;;  %6458 = vst [vmem:[#allocation55_spill] sm:$0xff] %v4798_v60  ;;  %v723_v61 = vld [vmem:[#allocation4 + $0x110] sm:$0xff] }
 0x21f   :  { %v727_v45 = vld [vmem:[#allocation4 + $0x130] sm:$0xff] }
 0x220   :  { %3726 = vtanh.f32 %v4777_v44  ;;  %v4810_v20 = vcombine.high %v723_v61, %v727_v45  ;;  %v4814_v12 = vcombine.low %v723_v61, %v727_v45  ;;  %v747_v45 = vld [vmem:[#allocation4 + $0x1d0] sm:$0xff] }
 0x222   :  { %6464 = vst [vmem:[#allocation61_spill] sm:$0xff] %v4810_v20  ;;  %6466 = vst [vmem:[#allocation161_spill] sm:$0xff] %v4814_v12 }
 0x22a   :  { %v3727_v27 = vpop.eup %3726 }
 0x22b   :  { %v1442_v30 = vmul.f32 %v3727_v27, %v3725_v35  ;;  %v6461_v35 = vld [vmem:[#allocation63_spill] sm:$0xff]  ;;  %v4806_v27 = vcombine.low %v715_v21, %v719_v43  ;;  %v739_v43 = vld [vmem:[#allocation4 + $0x190] sm:$0xff] }
 0x22d   :  { %v4780_v36 = vpack.c.bf16 %v1442_v30, %v1442_v30  ;;  %6462 = vst [vmem:[#allocation59_spill] sm:$0xff] %v4806_v27  ;;  %v735_v30 = vld [vmem:[#allocation4 + $0x170] sm:$0xff] }
 0x22e   :  { %v4818_v21 = vcombine.high %v731_v54, %v735_v30 }
 0x22f   :  { %1637 = vmatmul.mubr.bf16.vlgmr.msra.gmra.mrb[44].mxu1 %v4780_v36  ;;  %1678 = vmatmul.mubr.bf16.vlgmr.msra.gmra.mrb[32].mxu0 %v4780_v36 }
 0x230   :  { %1687 = vmatpush1.bf16.msra.mxu1 %v4729_v33  ;;  %1728 = vmatpush1.bf16.msra.mxu0 %v6455_v23  ;;  %6468 = vst [vmem:[#allocation162_spill] sm:$0xff] %v4818_v21 }
 0x231   :  { %1688 = vmatprep.subr.bf16.mxu1 %v4782_v38  ;;  %1729 = vmatprep.subr.bf16.mxu0 %v6456_v55 }
 0x232   :  { %1718 = vmatprep.mubr.bf16.mxu1 %v6334_v15  ;;  %1759 = vmatprep.mubr.bf16.mxu0 %v6334_v15  ;;  %v6463_v15 = vld [vmem:[#allocation65_spill] sm:$0xff] }
 0x234   :  { %1689 = vmatpush1.bf16.msra.mxu1 %v4788_v48  ;;  %1730 = vmatpush1.bf16.msra.mxu0 %v6457_v62 }
 0x235   :  { %1690 = vmatprep.subr.bf16.mxu1 %v4792_v39  ;;  %1731 = vmatprep.subr.bf16.mxu0 %v6459_v8 }
 0x238   :  { %1691 = vmatpush1.bf16.msra.mxu1 %v4798_v60  ;;  %1732 = vmatpush1.bf16.msra.mxu0 %v6461_v35  ;;  %v6467_v60 = vld [vmem:[#allocation69_spill] sm:$0xff]  ;;  %v4822_v35 = vcombine.low %v731_v54, %v735_v30  ;;  %v755_v30 = vld [vmem:[#allocation4 + $0x210] sm:$0xff] }
 0x239   :  { %1692 = vmatprep.subr.bf16.mxu1 %v4802_v26  ;;  %1733 = vmatprep.subr.bf16.mxu0 %v6463_v15  ;;  %v743_v26 = vld [vmem:[#allocation4 + $0x1b0] sm:$0xff]  ;;  %v6469_v15 = vld [vmem:[#allocation71_spill] sm:$0xff] }
 0x23a   :  { %6470 = vst [vmem:[#allocation163_spill] sm:$0xff] %v4822_v35  ;;  %v4826_v61 = vcombine.high %v739_v43, %v743_v26 }
 0x23c   :  { %1693 = vmatpush1.bf16.msra.mxu1 %v4806_v27  ;;  %1734 = vmatpush1.bf16.msra.mxu0 %v6465_v17  ;;  %v6471_v27 = vld [vmem:[#allocation73_spill] sm:$0xff]  ;;  %6472 = vst [vmem:[#allocation164_spill] sm:$0xff] %v4826_v61  ;;  %v4830_v17 = vcombine.low %v739_v43, %v743_v26  ;;  %v763_v43 = vld [vmem:[#allocation4 + $0x250] sm:$0xff] }
 0x23d   :  { %1694 = vmatprep.subr.bf16.mxu1 %v4810_v20  ;;  %1735 = vmatprep.subr.bf16.mxu0 %v6467_v60  ;;  %v751_v20 = vld [vmem:[#allocation4 + $0x1f0] sm:$0xff]  ;;  %v6473_v60 = vld [vmem:[#allocation75_spill] sm:$0xff] }
 0x23e   :  { %6474 = vst [vmem:[#allocation75_spill] sm:$0xff] %v4830_v17  ;;  %v4834_v54 = vcombine.high %v747_v45, %v751_v20 }
 0x240   :  { %1695 = vmatpush1.bf16.msra.mxu1 %v4814_v12  ;;  %1736 = vmatpush1.bf16.msra.mxu0 %v6469_v15  ;;  %v6475_v12 = vld [vmem:[#allocation77_spill] sm:$0xff]  ;;  %6476 = vst [vmem:[#allocation165_spill] sm:$0xff] %v4834_v54  ;;  %v4838_v15 = vcombine.low %v747_v45, %v751_v20  ;;  %v771_v45 = vld [vmem:[#allocation4 + $0x290] sm:$0xff] }
 0x241   :  { %1696 = vmatprep.subr.bf16.mxu1 %v4818_v21  ;;  %1737 = vmatprep.subr.bf16.mxu0 %v6471_v27  ;;  %v759_v21 = vld [vmem:[#allocation4 + $0x230] sm:$0xff]  ;;  %v6477_v27 = vld [vmem:[#allocation79_spill] sm:$0xff] }
 0x242   :  { %6478 = vst [vmem:[#allocation79_spill] sm:$0xff] %v4838_v15  ;;  %v4842_v26 = vcombine.high %v755_v30, %v759_v21 }
 0x244   :  { %1697 = vmatpush1.bf16.msra.mxu1 %v4822_v35  ;;  %1738 = vmatpush1.bf16.msra.mxu0 %v6473_v60  ;;  %v6479_v35 = vld [vmem:[#allocation81_spill] sm:$0xff]  ;;  %6480 = vst [vmem:[#allocation166_spill] sm:$0xff] %v4842_v26 }
 0x245   :  { %1698 = vmatprep.subr.bf16.mxu1 %v4826_v61  ;;  %1739 = vmatprep.subr.bf16.mxu0 %v6475_v12  ;;  %v767_v61 = vld [vmem:[#allocation4 + $0x270] sm:$0xff]  ;;  %v4846_v12 = vcombine.low %v755_v30, %v759_v21 }
 0x246   :  { %v4850_v20 = vcombine.high %v763_v43, %v767_v61  ;;  %v779_v30 = vld [vmem:[#allocation4 + $0x2d0] sm:$0xff] }
 0x247   :  { %6481 = vst [vmem:[#allocation167_spill] sm:$0xff] %v4846_v12 }
 0x248   :  { %1699 = vmatpush1.bf16.msra.mxu1 %v4830_v17  ;;  %1740 = vmatpush1.bf16.msra.mxu0 %v6477_v27  ;;  %v6482_v17 = vld [vmem:[#allocation85_spill] sm:$0xff]  ;;  %6483 = vst [vmem:[#allocation168_spill] sm:$0xff] %v4850_v20 }
 0x249   :  { %1700 = vmatprep.subr.bf16.mxu1 %v4834_v54  ;;  %1741 = vmatprep.subr.bf16.mxu0 %v6479_v35  ;;  %v775_v54 = vld [vmem:[#allocation4 + $0x2b0] sm:$0xff]  ;;  %v4854_v35 = vcombine.low %v763_v43, %v767_v61 }
 0x24a   :  { %v4858_v21 = vcombine.high %v771_v45, %v775_v54  ;;  %v787_v43 = vld [vmem:[#allocation4 + $0x310] sm:$0xff] }
 0x24b   :  { %6484 = vst [vmem:[#allocation169_spill] sm:$0xff] %v4854_v35 }
 0x24c   :  { %1701 = vmatpush1.bf16.msra.mxu1 %v4838_v15  ;;  %1742 = vmatpush1.bf16.msra.mxu0 %v4470_v14  ;;  %6485 = vst [vmem:[#allocation170_spill] sm:$0xff] %v4858_v21 }
 0x24d   :  { %1702 = vmatprep.subr.bf16.mxu1 %v4842_v26  ;;  %1743 = vmatprep.subr.bf16.mxu0 %v6482_v17  ;;  %v783_v26 = vld [vmem:[#allocation4 + $0x2f0] sm:$0xff]  ;;  %v4862_v17 = vcombine.low %v771_v45, %v775_v54 }
 0x24e   :  { %v4866_v61 = vcombine.high %v779_v30, %v783_v26  ;;  %v795_v45 = vld [vmem:[#allocation4 + $0x350] sm:$0xff] }
 0x24f   :  { %6486 = vst [vmem:[#allocation171_spill] sm:$0xff] %v4862_v17 }
 0x250   :  { %1703 = vmatpush1.bf16.msra.mxu1 %v4846_v12  ;;  %1744 = vmatpush1.bf16.msra.mxu0 %v4482_v40  ;;  %v6487_v12 = vld [vmem:[#allocation90_spill] sm:$0xff]  ;;  %6488 = vst [vmem:[#allocation172_spill] sm:$0xff] %v4866_v61 }
 0x251   :  { %1704 = vmatprep.subr.bf16.mxu1 %v4850_v20  ;;  %1745 = vmatprep.subr.bf16.mxu0 %v4488_v4  ;;  %v791_v20 = vld [vmem:[#allocation4 + $0x330] sm:$0xff]  ;;  %v4870_v4 = vcombine.low %v779_v30, %v783_v26 }
 0x252   :  { %v4874_v54 = vcombine.high %v787_v43, %v791_v20  ;;  %v803_v30 = vld [vmem:[#allocation4 + $0x390] sm:$0xff] }
 0x253   :  { %6489 = vst [vmem:[#allocation173_spill] sm:$0xff] %v4870_v4 }
 0x254   :  { %1705 = vmatpush1.bf16.msra.mxu1 %v4854_v35  ;;  %1746 = vmatpush1.bf16.msra.mxu0 %v4494_v51  ;;  %6490 = vst [vmem:[#allocation174_spill] sm:$0xff] %v4874_v54 }
 0x255   :  { %1706 = vmatprep.subr.bf16.mxu1 %v4858_v21  ;;  %1747 = vmatprep.subr.bf16.mxu0 %v6487_v12  ;;  %v799_v21 = vld [vmem:[#allocation4 + $0x370] sm:$0xff]  ;;  %v4878_v12 = vcombine.low %v787_v43, %v791_v20 }
 0x256   :  { %v4882_v26 = vcombine.high %v795_v45, %v799_v21  ;;  %v811_v43 = vld [vmem:[#allocation4 + $0x3d0] sm:$0xff] }
 0x257   :  { %6491 = vst [vmem:[#allocation175_spill] sm:$0xff] %v4878_v12 }
 0x258   :  { %1707 = vmatpush1.bf16.msra.mxu1 %v4862_v17  ;;  %1748 = vmatpush1.bf16.msra.mxu0 %v4502_v46  ;;  %v6492_v17 = vld [vmem:[#allocation94_spill] sm:$0xff]  ;;  %6493 = vst [vmem:[#allocation176_spill] sm:$0xff] %v4882_v26 }
 0x259   :  { %1708 = vmatprep.subr.bf16.mxu1 %v4866_v61  ;;  %1749 = vmatprep.subr.bf16.mxu0 %v4505_v59  ;;  %v807_v61 = vld [vmem:[#allocation4 + $0x3b0] sm:$0xff]  ;;  %v4886_v59 = vcombine.low %v795_v45, %v799_v21 }
 0x25a   :  { %v4890_v20 = vcombine.high %v803_v30, %v807_v61 }
 0x25b   :  { %6494 = vst [vmem:[#allocation177_spill] sm:$0xff] %v4886_v59 }
 0x25c   :  { %1709 = vmatpush1.bf16.msra.mxu1 %v4870_v4  ;;  %1750 = vmatpush1.bf16.msra.mxu0 %v4510_v41  ;;  %6495 = vst [vmem:[#allocation178_spill] sm:$0xff] %v4890_v20 }
 0x25d   :  { %1710 = vmatprep.subr.bf16.mxu1 %v4874_v54  ;;  %1751 = vmatprep.subr.bf16.mxu0 %v6492_v17  ;;  %v815_v54 = vld [vmem:[#allocation4 + $0x3f0] sm:$0xff]  ;;  %v4894_v17 = vcombine.low %v803_v30, %v807_v61  ;;  %v6499_v61 = vld [vmem:[#allocation8_spill] sm:$0xff]  ;;  %v6500_v30 = vld [vmem:[#allocation9_spill] sm:$0xff] }
 0x25e   :  { %v4898_v21 = vcombine.high %v811_v43, %v815_v54  ;;  %v4902_v45 = vcombine.low %v811_v43, %v815_v54  ;;  %v6501_v54 = vld [vmem:[#allocation10_spill] sm:$0xff]  ;;  %v6502_v43 = vld [vmem:[#allocation11_spill] sm:$0xff] }
 0x25f   :  { %6496 = vst [vmem:[#allocation179_spill] sm:$0xff] %v4894_v17 }
 0x260   :  { %1711 = vmatpush1.bf16.msra.mxu1 %v4878_v12  ;;  %1752 = vmatpush1.bf16.msra.mxu0 %v4519_v28  ;;  %6497 = vst [vmem:[#allocation180_spill] sm:$0xff] %v4898_v21  ;;  %6498 = vst [vmem:[#allocation181_spill] sm:$0xff] %v4902_v45 }
 0x261   :  { %1712 = vmatprep.subr.bf16.mxu1 %v4882_v26  ;;  %1753 = vmatprep.subr.bf16.mxu0 %v4523_v6 }
 0x264   :  { %1713 = vmatpush1.bf16.msra.mxu1 %v4886_v59  ;;  %1754 = vmatpush1.bf16.msra.mxu0 %v4527_v42 }
 0x265   :  { %1714 = vmatprep.subr.bf16.mxu1 %v4890_v20  ;;  %1755 = vmatprep.subr.bf16.mxu0 %v4531_v1 }
 0x268   :  { %1715 = vmatpush1.bf16.msra.mxu1 %v4894_v17  ;;  %1756 = vmatpush1.bf16.msra.mxu0 %v4535_v47 }
 0x269   :  { %1716 = vmatprep.subr.bf16.mxu1 %v4898_v21  ;;  %1757 = vmatprep.subr.bf16.mxu0 %v4539_v63 }
 0x26c   :  { %1717 = vmatpush1.bf16.msra.mxu1 %v4902_v45  ;;  %1758 = vmatpush1.bf16.msra.mxu0 %v4543_v52 }
 0x26d   :  { %1818 = vmatprep.subr.bf16.mxu1 %v6499_v61  ;;  %1859 = vmatprep.subr.bf16.mxu0 %v4263_v53 }
 0x26f   :  { %1719 = vmatmul.mubr.bf16.vlgmr.msra.gmra.mrb[48].mxu1 %v4780_v36  ;;  %1760 = vmatmul.mubr.bf16.vlgmr.msra.gmra.mrb[36].mxu0 %v4780_v36  ;;  %v6503_v36 = vld [vmem:[#allocation23_spill] sm:$0xff] }
 0x270   :  { %1819 = vmatpush1.bf16.msra.mxu1 %v6500_v30  ;;  %1860 = vmatpush1.bf16.msra.mxu0 %v4289_v9 }
 0x271   :  { %1820 = vmatprep.subr.bf16.mxu1 %v6501_v54  ;;  %1861 = vmatprep.subr.bf16.mxu0 %v4294_v13 }
 0x274   :  { %1821 = vmatpush1.bf16.msra.mxu1 %v6502_v43  ;;  %1862 = vmatpush1.bf16.msra.mxu0 %v4302_v22 }
 0x275   :  { %1822 = vmatprep.subr.bf16.mxu1 %v4185_v50  ;;  %1863 = vmatprep.subr.bf16.mxu0 %v4309_v24 }
 0x278   :  { %1823 = vmatpush1.bf16.msra.mxu1 %v4192_v57  ;;  %1864 = vmatpush1.bf16.msra.mxu0 %v4317_v34 }
 0x279   :  { %1824 = vmatprep.subr.bf16.mxu1 %v4196_v58  ;;  %1865 = vmatprep.subr.bf16.mxu0 %v4324_v37 }
 0x27c   :  { %1825 = vmatpush1.bf16.msra.mxu1 %v4205_v2  ;;  %1866 = vmatpush1.bf16.msra.mxu0 %v4332_v49  ;;  %v6545_v2 = vld [vmem:[#allocation105_spill] sm:$0xff] }
 0x27d   :  { %1826 = vmatprep.subr.bf16.mxu1 %v4209_v3  ;;  %1867 = vmatprep.subr.bf16.mxu0 %v4339_v56  ;;  %v6543_v56 = vld [vmem:[#allocation104_spill] sm:$0xff]  ;;  %v6544_v3 = vld [vmem:[#allocation123_spill] sm:$0xff] }
 0x280   :  { %1827 = vmatpush1.bf16.msra.mxu1 %v4217_v10  ;;  %1868 = vmatpush1.bf16.msra.mxu0 %v4347_v7  ;;  %v6540_v7 = vld [vmem:[#allocation103_spill] sm:$0xff] }
 0x281   :  { %1828 = vmatprep.subr.bf16.mxu1 %v4221_v11  ;;  %1869 = vmatprep.subr.bf16.mxu0 %v4354_v16  ;;  %v6504_v11 = vld [vmem:[#allocation58_spill] sm:$0xff]  ;;  %v6505_v16 = vld [vmem:[#allocation24_spill] sm:$0xff] }
 0x284   :  { %1829 = vmatpush1.bf16.msra.mxu1 %v4229_v18  ;;  %1870 = vmatpush1.bf16.msra.mxu0 %v4362_v31  ;;  %v6506_v18 = vld [vmem:[#allocation60_spill] sm:$0xff]  ;;  %v6507_v31 = vld [vmem:[#allocation26_spill] sm:$0xff] }
 0x285   :  { %1830 = vmatprep.subr.bf16.mxu1 %v4233_v19  ;;  %1871 = vmatprep.subr.bf16.mxu0 %v4366_v32  ;;  %v6508_v19 = vld [vmem:[#allocation62_spill] sm:$0xff]  ;;  %v6509_v32 = vld [vmem:[#allocation27_spill] sm:$0xff] }
 0x288   :  { %1831 = vmatpush1.bf16.msra.mxu1 %v4241_v25  ;;  %1872 = vmatpush1.bf16.msra.mxu0 %v4375_v5  ;;  %v6510_v25 = vld [vmem:[#allocation64_spill] sm:$0xff] }
 0x289   :  { %1832 = vmatprep.subr.bf16.mxu1 %v4245_v29  ;;  %1873 = vmatprep.subr.bf16.mxu0 %v4381_v0  ;;  %v6511_v5 = vld [vmem:[#allocation28_spill] sm:$0xff]  ;;  %v6512_v29 = vld [vmem:[#allocation66_spill] sm:$0xff]  ;;  %v6513_v0 = vld [vmem:[#allocation29_spill] sm:$0xff] }
 0x28c   :  { %1833 = vmatpush1.bf16.msra.mxu1 %v6503_v36  ;;  %1874 = vmatpush1.bf16.msra.mxu0 %v6504_v11  ;;  %v6514_v36 = vld [vmem:[#allocation68_spill] sm:$0xff]  ;;  %v6515_v11 = vld [vmem:[#allocation30_spill] sm:$0xff] }
 0x28d   :  { %1834 = vmatprep.subr.bf16.mxu1 %v6505_v16  ;;  %1875 = vmatprep.subr.bf16.mxu0 %v6506_v18  ;;  %v6516_v16 = vld [vmem:[#allocation70_spill] sm:$0xff]  ;;  %v6517_v18 = vld [vmem:[#allocation32_spill] sm:$0xff] }
 0x290   :  { %1835 = vmatpush1.bf16.msra.mxu1 %v6507_v31  ;;  %1876 = vmatpush1.bf16.msra.mxu0 %v6508_v19  ;;  %v6518_v31 = vld [vmem:[#allocation72_spill] sm:$0xff]  ;;  %v6519_v19 = vld [vmem:[#allocation34_spill] sm:$0xff] }
 0x291   :  { %1836 = vmatprep.subr.bf16.mxu1 %v6509_v32  ;;  %1877 = vmatprep.subr.bf16.mxu0 %v6510_v25  ;;  %v6520_v32 = vld [vmem:[#allocation74_spill] sm:$0xff]  ;;  %v6521_v25 = vld [vmem:[#allocation36_spill] sm:$0xff] }
 0x294   :  { %1837 = vmatpush1.bf16.msra.mxu1 %v6511_v5  ;;  %1878 = vmatpush1.bf16.msra.mxu0 %v6512_v29  ;;  %v6522_v5 = vld [vmem:[#allocation76_spill] sm:$0xff]  ;;  %v6523_v29 = vld [vmem:[#allocation38_spill] sm:$0xff] }
 0x295   :  { %1838 = vmatprep.subr.bf16.mxu1 %v6513_v0  ;;  %1879 = vmatprep.subr.bf16.mxu0 %v6514_v36  ;;  %v6524_v0 = vld [vmem:[#allocation78_spill] sm:$0xff]  ;;  %v6525_v36 = vld [vmem:[#allocation40_spill] sm:$0xff] }
 0x298   :  { %1839 = vmatpush1.bf16.msra.mxu1 %v6515_v11  ;;  %1880 = vmatpush1.bf16.msra.mxu0 %v6516_v16  ;;  %v6526_v11 = vld [vmem:[#allocation80_spill] sm:$0xff]  ;;  %v6527_v16 = vld [vmem:[#allocation42_spill] sm:$0xff] }
 0x299   :  { %1840 = vmatprep.subr.bf16.mxu1 %v6517_v18  ;;  %1881 = vmatprep.subr.bf16.mxu0 %v6518_v31  ;;  %v6528_v18 = vld [vmem:[#allocation82_spill] sm:$0xff]  ;;  %v6529_v31 = vld [vmem:[#allocation44_spill] sm:$0xff] }
 0x29c   :  { %1841 = vmatpush1.bf16.msra.mxu1 %v6519_v19  ;;  %1882 = vmatpush1.bf16.msra.mxu0 %v6520_v32  ;;  %v6530_v19 = vld [vmem:[#allocation84_spill] sm:$0xff]  ;;  %v6531_v32 = vld [vmem:[#allocation46_spill] sm:$0xff] }
 0x29d   :  { %1842 = vmatprep.subr.bf16.mxu1 %v6521_v25  ;;  %1883 = vmatprep.subr.bf16.mxu0 %v6522_v5  ;;  %v6532_v25 = vld [vmem:[#allocation86_spill] sm:$0xff]  ;;  %v6533_v5 = vld [vmem:[#allocation48_spill] sm:$0xff] }
 0x2a0   :  { %1843 = vmatpush1.bf16.msra.mxu1 %v6523_v29  ;;  %1884 = vmatpush1.bf16.msra.mxu0 %v6524_v0  ;;  %v6534_v29 = vld [vmem:[#allocation87_spill] sm:$0xff]  ;;  %v6535_v0 = vld [vmem:[#allocation50_spill] sm:$0xff] }
 0x2a1   :  { %1844 = vmatprep.subr.bf16.mxu1 %v6525_v36  ;;  %1885 = vmatprep.subr.bf16.mxu0 %v6526_v11  ;;  %v6536_v36 = vld [vmem:[#allocation89_spill] sm:$0xff]  ;;  %v6537_v11 = vld [vmem:[#allocation130_spill] sm:$0xff] }
 0x2a4   :  { %1845 = vmatpush1.bf16.msra.mxu1 %v6527_v16  ;;  %1886 = vmatpush1.bf16.msra.mxu0 %v6528_v18  ;;  %v6538_v16 = vld [vmem:[#allocation53_spill] sm:$0xff]  ;;  %v6539_v18 = vld [vmem:[#allocation102_spill] sm:$0xff] }
 0x2a5   :  { %1846 = vmatprep.subr.bf16.mxu1 %v6529_v31  ;;  %1887 = vmatprep.subr.bf16.mxu0 %v6530_v19  ;;  %v190_v31 = vsub.s32 3, %v6539_v18 }
 0x2a7   :  { %v4978_v19 = vrot.slane %v6540_v7, %v190_v31 }
 0x2a8   :  { %1847 = vmatpush1.bf16.msra.mxu1 %v6531_v32  ;;  %1888 = vmatpush1.bf16.msra.mxu0 %v6532_v25  ;;  %v6542_v32 = vld [vmem:[#allocation124_spill] sm:$0xff] }
 0x2a9   :  { %1848 = vmatprep.subr.bf16.mxu1 %v6533_v5  ;;  %1889 = vmatprep.subr.bf16.mxu0 %v6534_v29  ;;  %6541 = vst [vmem:[#allocation102_spill] sm:$0xff] %v4978_v19  ;;  %v428_v25 = vadd.f32 %v6542_v32, %v4978_v19  ;;  %v194_v32 = vsub.s32 4, %v6539_v18 }
 0x2ac   :  { %1849 = vmatpush1.bf16.msra.mxu1 %v6535_v0  ;;  %1890 = vmatpush1.bf16.msra.mxu0 %v6536_v36 }
 0x2ad   :  { %1900 = vmatprep.subr.bf16.mxu1 %v6537_v11  ;;  %1941 = vmatprep.subr.bf16.mxu0 %v6538_v16 }
 0x302   :  { %v1638_v10 = vpop.f32.mrb[44].mxu1  ;;  %v1679_v5 = vpop.f32.mrb[32].mxu0 }
 0x303   :  { %v1639_v29 = vadd.f32 %v1638_v10, %v6543_v56  ;;  %v1680_v0 = vadd.f32 %v1679_v5, %v6544_v3  ;;  %v1640_v49 = vpop.f32.mrb[45].mxu1  ;;  %v1681_v36 = vpop.f32.mrb[33].mxu0  ;;  %v198_v10 = vsub.s32 5, %v6539_v18  ;;  %v206_v3 = vsub.s32 7, %v6539_v18  ;;  %v6550_v18 = vld [vmem:[#allocation118_spill] sm:$0xff] }
 0x304   :  { %v1641_v11 = vadd.f32 %v1640_v49, %v6545_v2  ;;  %v1682_v37 = vadd.f32 %v1681_v36, %v428_v25  ;;  %v1642_v16 = vpop.f32.mrb[46].mxu1  ;;  %v1683_v58 = vpop.f32.mrb[34].mxu0  ;;  %v4989_v25 = vrot.slane %v6540_v7, %v194_v32  ;;  %v6551_v49 = vld [vmem:[#allocation148_spill] sm:$0xff] }
 0x305   :  { %v1643_v34 = vpop.f32.mrb[47].mxu1  ;;  %v1684_v57 = vpop.f32.mrb[35].mxu0  ;;  %v3537_v31 = vmul.f32 -1.442695, %v1639_v29  ;;  %v4995_v58 = vrot.slane %v6540_v7, %v206_v3 }
 0x306   :  { %v3538_v24 = vmul.f32 -1.442695, %v1641_v11  ;;  %v3540_v50 = vmul.f32 -1.442695, %v1682_v37  ;;  %6546 = vst [vmem:[#allocation103_spill] sm:$0xff] %v4989_v25  ;;  %v4992_v57 = vrot.slane %v6540_v7, %v198_v10  ;;  %v6552_v10 = vld [vmem:[#allocation147_spill] sm:$0xff] }
 0x307   :  { %3728 = vpow2.f32 %v3537_v31  ;;  %6548 = vst [vmem:[#allocation104_spill] sm:$0xff] %v4995_v58  ;;  %v651_v16 = vadd.f32 %v6551_v49, %v4995_v58  ;;  %v3539_v49 = vmul.f32 -1.442695, %v1680_v0 }
 0x308   :  { %3730 = vpow2.f32 %v3538_v24  ;;  %6547 = vst [vmem:[#allocation124_spill] sm:$0xff] %v4992_v57  ;;  %v6549_v24 = vld [vmem:[#allocation116_spill] sm:$0xff]  ;;  %v539_v37 = vadd.f32 %v6550_v18, %v4992_v57 }
 0x309   :  { %3732 = vpow2.f32 %v3540_v50  ;;  %v537_v34 = vadd.f32 %v6549_v24, %v4989_v25 }
 0x311   :  { %v3729_v56 = vpop.eup %3728 }
 0x312   :  { %v3731_v5 = vpop.eup %3730  ;;  %v1786_v11 = vadd.f32 1.0, %v3729_v56 }
 0x313   :  { %v3733_v2 = vpop.eup %3732  ;;  %v1787_v50 = vadd.f32 1.0, %v3731_v5 }
 0x314   :  { %v1789_v29 = vadd.f32 1.0, %v3733_v2  ;;  %3734 = vrcp.f32 %v1786_v11 }
 0x315   :  { %3736 = vrcp.f32 %v1787_v50 }
 0x316   :  { %3738 = vrcp.f32 %v1789_v29 }
 0x31e   :  { %v3735_v11 = vpop.eup %3734 }
 0x31f   :  { %v3737_v58 = vpop.eup %3736 }
 0x320   :  { %v1806_v29 = vmul.f32 %v3737_v58, %v4777_v44 }
 0x342   :  { %v1720_v36 = vpop.f32.mrb[48].mxu1  ;;  %v1761_v31 = vpop.f32.mrb[36].mxu0 }
 0x343   :  { %v1721_v32 = vadd.f32 %v1720_v36, %v537_v34  ;;  %v1762_v7 = vadd.f32 %v1761_v31, %v6552_v10  ;;  %v1722_v3 = vpop.f32.mrb[49].mxu1  ;;  %v1763_v56 = vpop.f32.mrb[37].mxu0 }
 0x344   :  { %v1723_v5 = vadd.f32 %v1722_v3, %v539_v37  ;;  %v1764_v2 = vadd.f32 %v1763_v56, %v651_v16  ;;  %v1724_v19 = vpop.f32.mrb[50].mxu1  ;;  %v1765_v24 = vpop.f32.mrb[38].mxu0 }
 0x345   :  { %v3541_v25 = vmul.f32 -1.442695, %v1721_v32  ;;  %3740 = vtanh.f32 %v1762_v7  ;;  %v1725_v18 = vpop.f32.mrb[51].mxu1  ;;  %v1766_v57 = vpop.f32.mrb[39].mxu0 }
 0x346   :  { %3742 = vtanh.f32 %v1764_v2  ;;  %v3542_v50 = vmul.f32 -1.442695, %v1723_v5  ;;  %v3739_v34 = vpop.eup %3738 }
 0x347   :  { %3744 = vpow2.f32 %v3541_v25 }
 0x348   :  { %3746 = vpow2.f32 %v3539_v49 }
 0x349   :  { %3748 = vpow2.f32 %v3542_v50 }
 0x34f   :  { %v3741_v36 = vpop.eup %3740 }
 0x350   :  { %v3743_v31 = vpop.eup %3742  ;;  %v1807_v37 = vmul.f32 %v3741_v36, %v3735_v11  ;;  %v6554_v36 = vld [vmem:[#allocation63_spill] sm:$0xff] }
 0x351   :  { %v3745_v16 = vpop.eup %3744  ;;  %v1812_v19 = vmul.f32 %v3743_v31, %v3739_v34  ;;  %v6553_v34 = vld [vmem:[#allocation55_spill] sm:$0xff]  ;;  %v6555_v31 = vld [vmem:[#allocation57_spill] sm:$0xff] }
 0x352   :  { %v1790_v32 = vadd.f32 1.0, %v3745_v16  ;;  %v5005_v10 = vadd.f32 %v1807_v37, %v1806_v29  ;;  %v3747_v57 = vpop.eup %3746  ;;  %v6556_v29 = vld [vmem:[#allocation65_spill] sm:$0xff]  ;;  %v6557_v37 = vld [vmem:[#allocation59_spill] sm:$0xff] }
 0x353   :  { %v3749_v25 = vpop.eup %3748  ;;  %v1788_v7 = vadd.f32 1.0, %v3747_v57  ;;  %v6558_v16 = vld [vmem:[#allocation67_spill] sm:$0xff]  ;;  %v6561_v57 = vld [vmem:[#allocation161_spill] sm:$0xff] }
 0x354   :  { %3750 = vrcp.f32 %v1790_v32  ;;  %v1791_v3 = vadd.f32 1.0, %v3749_v25  ;;  %v6560_v32 = vld [vmem:[#allocation69_spill] sm:$0xff]  ;;  %v6562_v25 = vld [vmem:[#allocation71_spill] sm:$0xff] }
 0x355   :  { %3752 = vtanh.f32 %v5005_v10 }
 0x356   :  { %3754 = vrcp.f32 %v1788_v7  ;;  %v6563_v7 = vld [vmem:[#allocation162_spill] sm:$0xff] }
 0x357   :  { %3756 = vrcp.f32 %v1791_v3  ;;  %v6565_v3 = vld [vmem:[#allocation163_spill] sm:$0xff] }
 0x35e   :  { %v3751_v0 = vpop.eup %3750 }
 0x35f   :  { %v1811_v56 = vmul.f32 0.0, %v3751_v0  ;;  %v3753_v44 = vpop.eup %3752  ;;  %v6564_v0 = vld [vmem:[#allocation73_spill] sm:$0xff] }
 0x360   :  { %v3755_v58 = vpop.eup %3754 }
 0x361   :  { %v5008_v5 = vadd.f32 %v1812_v19, %v1811_v56  ;;  %v3757_v2 = vpop.eup %3756  ;;  %v1810_v18 = vmul.f32 %v3755_v58, %v3753_v44  ;;  %v6559_v19 = vld [vmem:[#allocation61_spill] sm:$0xff]  ;;  %v6566_v56 = vld [vmem:[#allocation164_spill] sm:$0xff]  ;;  %v6568_v58 = vld [vmem:[#allocation75_spill] sm:$0xff] }
 0x362   :  { %v6567_v44 = vld [vmem:[#allocation77_spill] sm:$0xff] }
 0x363   :  { %3758 = vtanh.f32 %v5008_v5  ;;  %v5011_v50 = vpack.c.bf16 %v1810_v18, %v1810_v18  ;;  %v6571_v18 = vld [vmem:[#allocation166_spill] sm:$0xff] }
 0x36d   :  { %v3759_v24 = vpop.eup %3758 }
 0x36e   :  { %v1815_v11 = vmul.f32 %v3759_v24, %v3757_v2  ;;  %v6569_v2 = vld [vmem:[#allocation165_spill] sm:$0xff] }
 0x36f   :  { %v6570_v24 = vld [vmem:[#allocation81_spill] sm:$0xff] }
 0x370   :  { %v1817_v49 = vpack.c.bf16 %v1815_v11, %v1815_v11  ;;  %v6572_v11 = vld [vmem:[#allocation85_spill] sm:$0xff] }
 0x372   :  { %1850 = vmatprep.mubr.bf16.mxu1 %v1817_v49  ;;  %1891 = vmatprep.mubr.bf16.mxu0 %v1817_v49 }
 0x373   :  { %1851 = vmatmul.mubr.bf16.vlgmr.msra.gmra.mrb[52].mxu1 %v5011_v50  ;;  %1892 = vmatmul.mubr.bf16.vlgmr.msra.gmra.mrb[40].mxu0 %v5011_v50 }
 0x374   :  { %1901 = vmatpush1.bf16.msra.mxu1 %v4729_v33  ;;  %1942 = vmatpush1.bf16.msra.mxu0 %v6455_v23 }
 0x375   :  { %1932 = vmatprep.mubr.bf16.mxu1 %v1817_v49  ;;  %1973 = vmatprep.mubr.bf16.mxu0 %v1817_v49  ;;  %v6573_v49 = vld [vmem:[#allocation167_spill] sm:$0xff] }
 0x376   :  { %1902 = vmatprep.subr.bf16.mxu1 %v4782_v38  ;;  %1943 = vmatprep.subr.bf16.mxu0 %v6456_v55 }
 0x378   :  { %1903 = vmatpush1.bf16.msra.mxu1 %v4788_v48  ;;  %1944 = vmatpush1.bf16.msra.mxu0 %v6457_v62 }
 0x379   :  { %1904 = vmatprep.subr.bf16.mxu1 %v4792_v39  ;;  %1945 = vmatprep.subr.bf16.mxu0 %v6459_v8 }
 0x37c   :  { %1905 = vmatpush1.bf16.msra.mxu1 %v6553_v34  ;;  %1946 = vmatpush1.bf16.msra.mxu0 %v6554_v36 }
 0x37d   :  { %1906 = vmatprep.subr.bf16.mxu1 %v6555_v31  ;;  %1947 = vmatprep.subr.bf16.mxu0 %v6556_v29 }
 0x380   :  { %1907 = vmatpush1.bf16.msra.mxu1 %v6557_v37  ;;  %1948 = vmatpush1.bf16.msra.mxu0 %v6558_v16 }
 0x381   :  { %1908 = vmatprep.subr.bf16.mxu1 %v6559_v19  ;;  %1949 = vmatprep.subr.bf16.mxu0 %v6560_v32 }
 0x384   :  { %1909 = vmatpush1.bf16.msra.mxu1 %v6561_v57  ;;  %1950 = vmatpush1.bf16.msra.mxu0 %v6562_v25 }
 0x385   :  { %1910 = vmatprep.subr.bf16.mxu1 %v6563_v7  ;;  %1951 = vmatprep.subr.bf16.mxu0 %v6564_v0 }
 0x388   :  { %1911 = vmatpush1.bf16.msra.mxu1 %v6565_v3  ;;  %1952 = vmatpush1.bf16.msra.mxu0 %v6473_v60 }
 0x389   :  { %1912 = vmatprep.subr.bf16.mxu1 %v6566_v56  ;;  %1953 = vmatprep.subr.bf16.mxu0 %v6567_v44  ;;  %v6574_v44 = vld [vmem:[#allocation168_spill] sm:$0xff] }
 0x38c   :  { %1913 = vmatpush1.bf16.msra.mxu1 %v6568_v58  ;;  %1954 = vmatpush1.bf16.msra.mxu0 %v6477_v27  ;;  %v6575_v58 = vld [vmem:[#allocation88_spill] sm:$0xff] }
 0x38d   :  { %1914 = vmatprep.subr.bf16.mxu1 %v6569_v2  ;;  %1955 = vmatprep.subr.bf16.mxu0 %v6570_v24  ;;  %v6576_v24 = vld [vmem:[#allocation170_spill] sm:$0xff] }
 0x390   :  { %1915 = vmatpush1.bf16.msra.mxu1 %v4838_v15  ;;  %1956 = vmatpush1.bf16.msra.mxu0 %v4470_v14  ;;  %v6577_v15 = vld [vmem:[#allocation90_spill] sm:$0xff]  ;;  %v6578_v14 = vld [vmem:[#allocation171_spill] sm:$0xff] }
 0x391   :  { %1916 = vmatprep.subr.bf16.mxu1 %v6571_v18  ;;  %1957 = vmatprep.subr.bf16.mxu0 %v6572_v11  ;;  %v6579_v11 = vld [vmem:[#allocation172_spill] sm:$0xff] }
 0x394   :  { %1917 = vmatpush1.bf16.msra.mxu1 %v6573_v49  ;;  %1958 = vmatpush1.bf16.msra.mxu0 %v4482_v40  ;;  %v6580_v49 = vld [vmem:[#allocation92_spill] sm:$0xff] }
 0x395   :  { %1918 = vmatprep.subr.bf16.mxu1 %v6574_v44  ;;  %1959 = vmatprep.subr.bf16.mxu0 %v6575_v58  ;;  %v6581_v58 = vld [vmem:[#allocation174_spill] sm:$0xff] }
 0x398   :  { %1919 = vmatpush1.bf16.msra.mxu1 %v4854_v35  ;;  %1960 = vmatpush1.bf16.msra.mxu0 %v4494_v51  ;;  %v6582_v35 = vld [vmem:[#allocation94_spill] sm:$0xff] }
 0x399   :  { %1920 = vmatprep.subr.bf16.mxu1 %v6576_v24  ;;  %1961 = vmatprep.subr.bf16.mxu0 %v6577_v15 }
 0x39c   :  { %1921 = vmatpush1.bf16.msra.mxu1 %v6578_v14  ;;  %1962 = vmatpush1.bf16.msra.mxu0 %v4502_v46 }
 0x39d   :  { %1922 = vmatprep.subr.bf16.mxu1 %v6579_v11  ;;  %1963 = vmatprep.subr.bf16.mxu0 %v6580_v49 }
 0x3a0   :  { %1923 = vmatpush1.bf16.msra.mxu1 %v4870_v4  ;;  %1964 = vmatpush1.bf16.msra.mxu0 %v4510_v41 }
 0x3a1   :  { %1924 = vmatprep.subr.bf16.mxu1 %v6581_v58  ;;  %1965 = vmatprep.subr.bf16.mxu0 %v6582_v35 }
 0x3a4   :  { %1925 = vmatpush1.bf16.msra.mxu1 %v4878_v12  ;;  %1966 = vmatpush1.bf16.msra.mxu0 %v4519_v28  ;;  %v6646_v28 = vld [vmem:[#allocation103_spill] sm:$0xff]  ;;  %v6647_v12 = vld [vmem:[#allocation120_spill] sm:$0xff] }
 0x3a5   :  { %1926 = vmatprep.subr.bf16.mxu1 %v4882_v26  ;;  %1967 = vmatprep.subr.bf16.mxu0 %v4523_v6 }
 0x3a8   :  { %1927 = vmatpush1.bf16.msra.mxu1 %v4886_v59  ;;  %1968 = vmatpush1.bf16.msra.mxu0 %v4527_v42 }
 0x3a9   :  { %1928 = vmatprep.subr.bf16.mxu1 %v4890_v20  ;;  %1969 = vmatprep.subr.bf16.mxu0 %v4531_v1 }
 0x3ac   :  { %1929 = vmatpush1.bf16.msra.mxu1 %v4894_v17  ;;  %1970 = vmatpush1.bf16.msra.mxu0 %v4535_v47 }
 0x3ad   :  { %1930 = vmatprep.subr.bf16.mxu1 %v4898_v21  ;;  %1971 = vmatprep.subr.bf16.mxu0 %v4539_v63 }
 0x3b0   :  { %1931 = vmatpush1.bf16.msra.mxu1 %v4902_v45  ;;  %1972 = vmatpush1.bf16.msra.mxu0 %v4543_v52  ;;  %v6583_v52 = vld [vmem:[#allocation12_spill] sm:$0xff]  ;;  %v6586_v45 = vld [vmem:[#allocation39_spill] sm:$0xff] }
 0x3b1   :  { %2032 = vmatprep.subr.bf16.mxu1 %v6499_v61  ;;  %2073 = vmatprep.subr.bf16.mxu0 %v4263_v53  ;;  %v6584_v61 = vld [vmem:[#allocation37_spill] sm:$0xff] }
 0x3b2   :  { %v6585_v53 = vld [vmem:[#allocation13_spill] sm:$0xff] }
 0x3b3   :  { %1933 = vmatmul.mubr.bf16.vlgmr.msra.gmra.mrb[56].mxu1 %v5011_v50  ;;  %1974 = vmatmul.mubr.bf16.vlgmr.msra.gmra.mrb[44].mxu0 %v5011_v50  ;;  %v6587_v50 = vld [vmem:[#allocation14_spill] sm:$0xff] }
 0x3b4   :  { %2033 = vmatpush1.bf16.msra.mxu1 %v6500_v30  ;;  %2074 = vmatpush1.bf16.msra.mxu0 %v4289_v9  ;;  %v6588_v30 = vld [vmem:[#allocation41_spill] sm:$0xff]  ;;  %v6589_v9 = vld [vmem:[#allocation15_spill] sm:$0xff] }
 0x3b5   :  { %2034 = vmatprep.subr.bf16.mxu1 %v6501_v54  ;;  %2075 = vmatprep.subr.bf16.mxu0 %v4294_v13  ;;  %v6590_v54 = vld [vmem:[#allocation43_spill] sm:$0xff]  ;;  %v6591_v13 = vld [vmem:[#allocation16_spill] sm:$0xff] }
 0x3b8   :  { %2035 = vmatpush1.bf16.msra.mxu1 %v6502_v43  ;;  %2076 = vmatpush1.bf16.msra.mxu0 %v4302_v22  ;;  %v6592_v43 = vld [vmem:[#allocation45_spill] sm:$0xff] }
 0x3b9   :  { %2036 = vmatprep.subr.bf16.mxu1 %v6583_v52  ;;  %2077 = vmatprep.subr.bf16.mxu0 %v6584_v61  ;;  %v6593_v22 = vld [vmem:[#allocation17_spill] sm:$0xff]  ;;  %v6594_v52 = vld [vmem:[#allocation47_spill] sm:$0xff]  ;;  %v6595_v61 = vld [vmem:[#allocation18_spill] sm:$0xff] }
 0x3bc   :  { %2037 = vmatpush1.bf16.msra.mxu1 %v6585_v53  ;;  %2078 = vmatpush1.bf16.msra.mxu0 %v6586_v45  ;;  %v6596_v53 = vld [vmem:[#allocation49_spill] sm:$0xff]  ;;  %v6597_v45 = vld [vmem:[#allocation19_spill] sm:$0xff] }
 0x3bd   :  { %2038 = vmatprep.subr.bf16.mxu1 %v6587_v50  ;;  %2079 = vmatprep.subr.bf16.mxu0 %v6588_v30  ;;  %v6598_v50 = vld [vmem:[#allocation51_spill] sm:$0xff]  ;;  %v6599_v30 = vld [vmem:[#allocation20_spill] sm:$0xff] }
 0x3c0   :  { %2039 = vmatpush1.bf16.msra.mxu1 %v6589_v9  ;;  %2080 = vmatpush1.bf16.msra.mxu0 %v6590_v54  ;;  %v6600_v9 = vld [vmem:[#allocation52_spill] sm:$0xff]  ;;  %v6601_v54 = vld [vmem:[#allocation21_spill] sm:$0xff] }
 0x3c1   :  { %2040 = vmatprep.subr.bf16.mxu1 %v6591_v13  ;;  %2081 = vmatprep.subr.bf16.mxu0 %v6592_v43  ;;  %v6602_v13 = vld [vmem:[#allocation54_spill] sm:$0xff] }
 0x3c2   :  { %v6603_v43 = vld [vmem:[#allocation22_spill] sm:$0xff] }
 0x3c4   :  { %2041 = vmatpush1.bf16.msra.mxu1 %v6593_v22  ;;  %2082 = vmatpush1.bf16.msra.mxu0 %v6594_v52  ;;  %v6604_v22 = vld [vmem:[#allocation56_spill] sm:$0xff]  ;;  %v6605_v52 = vld [vmem:[#allocation23_spill] sm:$0xff] }
 0x3c5   :  { %2042 = vmatprep.subr.bf16.mxu1 %v6595_v61  ;;  %2083 = vmatprep.subr.bf16.mxu0 %v6596_v53  ;;  %v6606_v61 = vld [vmem:[#allocation58_spill] sm:$0xff]  ;;  %v6607_v53 = vld [vmem:[#allocation24_spill] sm:$0xff] }
 0x3c8   :  { %2043 = vmatpush1.bf16.msra.mxu1 %v6597_v45  ;;  %2084 = vmatpush1.bf16.msra.mxu0 %v6598_v50  ;;  %v6608_v45 = vld [vmem:[#allocation60_spill] sm:$0xff]  ;;  %v6609_v50 = vld [vmem:[#allocation26_spill] sm:$0xff] }
 0x3c9   :  { %2044 = vmatprep.subr.bf16.mxu1 %v6599_v30  ;;  %2085 = vmatprep.subr.bf16.mxu0 %v6600_v9  ;;  %v6610_v30 = vld [vmem:[#allocation62_spill] sm:$0xff]  ;;  %v6611_v9 = vld [vmem:[#allocation27_spill] sm:$0xff] }
 0x3cc   :  { %2045 = vmatpush1.bf16.msra.mxu1 %v6601_v54  ;;  %2086 = vmatpush1.bf16.msra.mxu0 %v6602_v13  ;;  %v6612_v54 = vld [vmem:[#allocation64_spill] sm:$0xff] }
 0x3cd   :  { %2046 = vmatprep.subr.bf16.mxu1 %v6603_v43  ;;  %2087 = vmatprep.subr.bf16.mxu0 %v6604_v22  ;;  %v6613_v13 = vld [vmem:[#allocation28_spill] sm:$0xff]  ;;  %v6614_v43 = vld [vmem:[#allocation66_spill] sm:$0xff]  ;;  %v6615_v22 = vld [vmem:[#allocation29_spill] sm:$0xff] }
 0x3d0   :  { %2047 = vmatpush1.bf16.msra.mxu1 %v6605_v52  ;;  %2088 = vmatpush1.bf16.msra.mxu0 %v6606_v61  ;;  %v6616_v52 = vld [vmem:[#allocation68_spill] sm:$0xff]  ;;  %v6617_v61 = vld [vmem:[#allocation30_spill] sm:$0xff] }
 0x3d1   :  { %2048 = vmatprep.subr.bf16.mxu1 %v6607_v53  ;;  %2089 = vmatprep.subr.bf16.mxu0 %v6608_v45  ;;  %v6618_v53 = vld [vmem:[#allocation70_spill] sm:$0xff]  ;;  %v6619_v45 = vld [vmem:[#allocation32_spill] sm:$0xff] }
 0x3d4   :  { %2049 = vmatpush1.bf16.msra.mxu1 %v6609_v50  ;;  %2090 = vmatpush1.bf16.msra.mxu0 %v6610_v30  ;;  %v6620_v50 = vld [vmem:[#allocation72_spill] sm:$0xff]  ;;  %v6621_v30 = vld [vmem:[#allocation34_spill] sm:$0xff] }
 0x3d5   :  { %2050 = vmatprep.subr.bf16.mxu1 %v6611_v9  ;;  %2091 = vmatprep.subr.bf16.mxu0 %v6612_v54  ;;  %v6622_v9 = vld [vmem:[#allocation74_spill] sm:$0xff]  ;;  %v6623_v54 = vld [vmem:[#allocation36_spill] sm:$0xff] }
 0x3d8   :  { %2051 = vmatpush1.bf16.msra.mxu1 %v6613_v13  ;;  %2092 = vmatpush1.bf16.msra.mxu0 %v6614_v43  ;;  %v6624_v13 = vld [vmem:[#allocation76_spill] sm:$0xff]  ;;  %v6625_v43 = vld [vmem:[#allocation38_spill] sm:$0xff] }
 0x3d9   :  { %2052 = vmatprep.subr.bf16.mxu1 %v6615_v22  ;;  %2093 = vmatprep.subr.bf16.mxu0 %v6616_v52  ;;  %v6626_v22 = vld [vmem:[#allocation78_spill] sm:$0xff]  ;;  %v6627_v52 = vld [vmem:[#allocation40_spill] sm:$0xff] }
 0x3dc   :  { %2053 = vmatpush1.bf16.msra.mxu1 %v6617_v61  ;;  %2094 = vmatpush1.bf16.msra.mxu0 %v6618_v53  ;;  %v6628_v61 = vld [vmem:[#allocation80_spill] sm:$0xff]  ;;  %v6629_v53 = vld [vmem:[#allocation42_spill] sm:$0xff] }
 0x3dd   :  { %2054 = vmatprep.subr.bf16.mxu1 %v6619_v45  ;;  %2095 = vmatprep.subr.bf16.mxu0 %v6620_v50  ;;  %v6630_v45 = vld [vmem:[#allocation82_spill] sm:$0xff]  ;;  %v6631_v50 = vld [vmem:[#allocation44_spill] sm:$0xff] }
 0x3e0   :  { %2055 = vmatpush1.bf16.msra.mxu1 %v6621_v30  ;;  %2096 = vmatpush1.bf16.msra.mxu0 %v6622_v9  ;;  %v6632_v30 = vld [vmem:[#allocation84_spill] sm:$0xff]  ;;  %v6633_v9 = vld [vmem:[#allocation46_spill] sm:$0xff] }
 0x3e1   :  { %2056 = vmatprep.subr.bf16.mxu1 %v6623_v54  ;;  %2097 = vmatprep.subr.bf16.mxu0 %v6624_v13  ;;  %v6634_v54 = vld [vmem:[#allocation86_spill] sm:$0xff]  ;;  %v6635_v13 = vld [vmem:[#allocation48_spill] sm:$0xff] }
 0x3e4   :  { %2057 = vmatpush1.bf16.msra.mxu1 %v6625_v43  ;;  %2098 = vmatpush1.bf16.msra.mxu0 %v6626_v22  ;;  %v6636_v43 = vld [vmem:[#allocation87_spill] sm:$0xff]  ;;  %v6637_v22 = vld [vmem:[#allocation50_spill] sm:$0xff] }
 0x3e5   :  { %2058 = vmatprep.subr.bf16.mxu1 %v6627_v52  ;;  %2099 = vmatprep.subr.bf16.mxu0 %v6628_v61  ;;  %v6638_v52 = vld [vmem:[#allocation89_spill] sm:$0xff]  ;;  %v6639_v61 = vld [vmem:[#allocation130_spill] sm:$0xff] }
 0x3e8   :  { %2059 = vmatpush1.bf16.msra.mxu1 %v6629_v53  ;;  %2100 = vmatpush1.bf16.msra.mxu0 %v6630_v45  ;;  %v6640_v53 = vld [vmem:[#allocation53_spill] sm:$0xff]  ;;  %v6641_v45 = vld [vmem:[#allocation102_spill] sm:$0xff] }
 0x3e9   :  { %2060 = vmatprep.subr.bf16.mxu1 %v6631_v50  ;;  %2101 = vmatprep.subr.bf16.mxu0 %v6632_v30  ;;  %v6642_v50 = vld [vmem:[#allocation128_spill] sm:$0xff] }
 0x3ea   :  { %v434_v63 = vadd.f32 %v6642_v50, %v6641_v45 }
 0x3ec   :  { %2061 = vmatpush1.bf16.msra.mxu1 %v6633_v9  ;;  %2102 = vmatpush1.bf16.msra.mxu0 %v6634_v54  ;;  %v6643_v9 = vld [vmem:[#allocation106_spill] sm:$0xff]  ;;  %v6644_v54 = vld [vmem:[#allocation127_spill] sm:$0xff] }
 0x3ed   :  { %2062 = vmatprep.subr.bf16.mxu1 %v6635_v13  ;;  %2103 = vmatprep.subr.bf16.mxu0 %v6636_v43  ;;  %v6645_v43 = vld [vmem:[#allocation108_spill] sm:$0xff] }
 0x3f0   :  { %2063 = vmatpush1.bf16.msra.mxu1 %v6637_v22  ;;  %2104 = vmatpush1.bf16.msra.mxu0 %v6638_v52 }
 0x3f1   :  { %2114 = vmatprep.subr.bf16.mxu1 %v6639_v61  ;;  %2155 = vmatprep.subr.bf16.mxu0 %v6640_v53 }
 0x446   :  { %v1852_v30 = vpop.f32.mrb[52].mxu1  ;;  %v1893_v21 = vpop.f32.mrb[40].mxu0 }
 0x447   :  { %v1853_v47 = vadd.f32 %v1852_v30, %v6643_v9  ;;  %v1894_v17 = vadd.f32 %v1893_v21, %v6644_v54  ;;  %v1854_v13 = vpop.f32.mrb[53].mxu1  ;;  %v1895_v1 = vpop.f32.mrb[41].mxu0 }
 0x448   :  { %v1855_v20 = vadd.f32 %v1854_v13, %v6645_v43  ;;  %v1896_v22 = vadd.f32 %v1895_v1, %v434_v63  ;;  %v1856_v42 = vpop.f32.mrb[54].mxu1  ;;  %v1897_v52 = vpop.f32.mrb[42].mxu0  ;;  %v543_v13 = vadd.f32 %v6647_v12, %v6646_v28  ;;  %v6648_v1 = vld [vmem:[#allocation124_spill] sm:$0xff] }
 0x449   :  { %v1857_v59 = vpop.f32.mrb[55].mxu1  ;;  %v1898_v61 = vpop.f32.mrb[43].mxu0  ;;  %v3543_v6 = vmul.f32 -1.442695, %v1853_v47  ;;  %v6649_v42 = vld [vmem:[#allocation121_spill] sm:$0xff]  ;;  %v6651_v52 = vld [vmem:[#allocation150_spill] sm:$0xff] }
 0x44a   :  { %v3544_v53 = vmul.f32 -1.442695, %v1855_v20  ;;  %v3546_v26 = vmul.f32 -1.442695, %v1896_v22  ;;  %v545_v63 = vadd.f32 %v6649_v42, %v6648_v1  ;;  %v6650_v59 = vld [vmem:[#allocation104_spill] sm:$0xff] }
 0x44b   :  { %3760 = vpow2.f32 %v3543_v6  ;;  %v657_v47 = vadd.f32 %v6651_v52, %v6650_v59  ;;  %v3545_v52 = vmul.f32 -1.442695, %v1894_v17 }
 0x44c   :  { %3762 = vpow2.f32 %v3544_v53 }
 0x44d   :  { %3764 = vpow2.f32 %v3546_v26  ;;  %v6652_v26 = vld [vmem:[#allocation149_spill] sm:$0xff] }
 0x455   :  { %v3761_v50 = vpop.eup %3760 }
 0x456   :  { %v3763_v45 = vpop.eup %3762  ;;  %v2000_v30 = vadd.f32 1.0, %v3761_v50 }
 0x457   :  { %v3765_v9 = vpop.eup %3764  ;;  %v2001_v21 = vadd.f32 1.0, %v3763_v45 }
 0x458   :  { %v2003_v54 = vadd.f32 1.0, %v3765_v9  ;;  %3766 = vrcp.f32 %v2000_v30 }
 0x459   :  { %3768 = vrcp.f32 %v2001_v21 }
 0x45a   :  { %3770 = vrcp.f32 %v2003_v54 }
 0x462   :  { %v3767_v30 = vpop.eup %3766 }
 0x463   :  { %v3769_v59 = vpop.eup %3768 }
 0x464   :  { %v2020_v54 = vmul.f32 %v3769_v59, %v5005_v10 }
 0x486   :  { %v1934_v22 = vpop.f32.mrb[56].mxu1  ;;  %v1975_v6 = vpop.f32.mrb[44].mxu0 }
 0x487   :  { %v1935_v53 = vadd.f32 %v1934_v22, %v543_v13  ;;  %v1976_v20 = vadd.f32 %v1975_v6, %v6652_v26  ;;  %v1936_v61 = vpop.f32.mrb[57].mxu1  ;;  %v1977_v43 = vpop.f32.mrb[45].mxu0 }
 0x488   :  { %v1937_v45 = vadd.f32 %v1936_v61, %v545_v63  ;;  %v1978_v50 = vadd.f32 %v1977_v43, %v657_v47  ;;  %v1938_v9 = vpop.f32.mrb[58].mxu1  ;;  %v1979_v12 = vpop.f32.mrb[46].mxu0 }
 0x489   :  { %v3547_v28 = vmul.f32 -1.442695, %v1935_v53  ;;  %3772 = vtanh.f32 %v1976_v20  ;;  %v1939_v42 = vpop.f32.mrb[59].mxu1  ;;  %v1980_v1 = vpop.f32.mrb[47].mxu0 }
 0x48a   :  { %3774 = vtanh.f32 %v1978_v50  ;;  %v3548_v21 = vmul.f32 -1.442695, %v1937_v45  ;;  %v3771_v13 = vpop.eup %3770 }
 0x48b   :  { %3776 = vpow2.f32 %v3547_v28 }
 0x48c   :  { %3778 = vpow2.f32 %v3545_v52 }
 0x48d   :  { %3780 = vpow2.f32 %v3548_v21 }
 0x493   :  { %v3773_v22 = vpop.eup %3772 }
 0x494   :  { %v3775_v6 = vpop.eup %3774  ;;  %v2021_v63 = vmul.f32 %v3773_v22, %v3767_v30  ;;  %v6655_v22 = vld [vmem:[#allocation81_spill] sm:$0xff] }
 0x495   :  { %v3777_v47 = vpop.eup %3776  ;;  %v2026_v26 = vmul.f32 %v3775_v6, %v3771_v13  ;;  %v6654_v13 = vld [vmem:[#allocation75_spill] sm:$0xff] }
 0x496   :  { %v2004_v53 = vadd.f32 1.0, %v3777_v47  ;;  %v5158_v20 = vadd.f32 %v2021_v63, %v2020_v54  ;;  %v3779_v1 = vpop.eup %3778  ;;  %v6656_v6 = vld [vmem:[#allocation79_spill] sm:$0xff]  ;;  %v6658_v63 = vld [vmem:[#allocation85_spill] sm:$0xff] }
 0x497   :  { %v3781_v28 = vpop.eup %3780  ;;  %v2002_v61 = vadd.f32 1.0, %v3779_v1  ;;  %v6657_v54 = vld [vmem:[#allocation83_spill] sm:$0xff] }
 0x498   :  { %3782 = vrcp.f32 %v2004_v53  ;;  %v2005_v43 = vadd.f32 1.0, %v3781_v28  ;;  %v6659_v47 = vld [vmem:[#allocation167_spill] sm:$0xff]  ;;  %v6661_v53 = vld [vmem:[#allocation169_spill] sm:$0xff] }
 0x499   :  { %3784 = vtanh.f32 %v5158_v20  ;;  %v6662_v1 = vld [vmem:[#allocation175_spill] sm:$0xff] }
 0x49a   :  { %3786 = vrcp.f32 %v2002_v61  ;;  %v6663_v28 = vld [vmem:[#allocation95_spill] sm:$0xff]  ;;  %v6664_v61 = vld [vmem:[#allocation176_spill] sm:$0xff] }
 0x49b   :  { %3788 = vrcp.f32 %v2005_v43  ;;  %v6666_v43 = vld [vmem:[#allocation177_spill] sm:$0xff] }
 0x4a2   :  { %v3783_v17 = vpop.eup %3782 }
 0x4a3   :  { %v2025_v45 = vmul.f32 %v3783_v17, %v5008_v5  ;;  %v3785_v10 = vpop.eup %3784  ;;  %v6653_v5 = vld [vmem:[#allocation77_spill] sm:$0xff]  ;;  %v6665_v17 = vld [vmem:[#allocation96_spill] sm:$0xff] }
 0x4a4   :  { %v3787_v59 = vpop.eup %3786 }
 0x4a5   :  { %v5162_v50 = vadd.f32 %v2026_v26, %v2025_v45  ;;  %v3789_v9 = vpop.eup %3788  ;;  %v2024_v42 = vmul.f32 %v3787_v59, %v3785_v10  ;;  %v6660_v26 = vld [vmem:[#allocation88_spill] sm:$0xff]  ;;  %v6667_v45 = vld [vmem:[#allocation97_spill] sm:$0xff]  ;;  %v6668_v10 = vld [vmem:[#allocation178_spill] sm:$0xff] }
 0x4a6   :  { %v6669_v59 = vld [vmem:[#allocation98_spill] sm:$0xff] }
 0x4a7   :  { %3790 = vtanh.f32 %v5162_v50  ;;  %v5165_v21 = vpack.c.bf16 %v2024_v42, %v2024_v42  ;;  %v6672_v42 = vld [vmem:[#allocation180_spill] sm:$0xff] }
 0x4b1   :  { %v3791_v12 = vpop.eup %3790 }
 0x4b2   :  { %v2029_v30 = vmul.f32 %v3791_v12, %v3789_v9  ;;  %v6670_v9 = vld [vmem:[#allocation179_spill] sm:$0xff] }
 0x4b3   :  { %v6671_v12 = vld [vmem:[#allocation99_spill] sm:$0xff] }
 0x4b4   :  { %v2031_v52 = vpack.c.bf16 %v2029_v30, %v2029_v30  ;;  %v6673_v30 = vld [vmem:[#allocation100_spill] sm:$0xff] }
 0x4b6   :  { %2064 = vmatprep.mubr.bf16.mxu1 %v2031_v52  ;;  %2105 = vmatprep.mubr.bf16.mxu0 %v2031_v52 }
 0x4b7   :  { %2065 = vmatmul.mubr.bf16.vlgmr.msra.gmra.mrb[60].mxu1 %v5165_v21  ;;  %2106 = vmatmul.mubr.bf16.vlgmr.msra.gmra.mrb[48].mxu0 %v5165_v21 }
 0x4b8   :  { %2115 = vmatpush1.bf16.msra.mxu1 %v4729_v33  ;;  %2156 = vmatpush1.bf16.msra.mxu0 %v6455_v23 }
 0x4b9   :  { %2146 = vmatprep.mubr.bf16.mxu1 %v2031_v52  ;;  %2187 = vmatprep.mubr.bf16.mxu0 %v2031_v52  ;;  %v6674_v52 = vld [vmem:[#allocation181_spill] sm:$0xff] }
 0x4ba   :  { %2116 = vmatprep.subr.bf16.mxu1 %v4782_v38  ;;  %2157 = vmatprep.subr.bf16.mxu0 %v6456_v55 }
 0x4bc   :  { %2117 = vmatpush1.bf16.msra.mxu1 %v4788_v48  ;;  %2158 = vmatpush1.bf16.msra.mxu0 %v6457_v62 }
 0x4bd   :  { %2118 = vmatprep.subr.bf16.mxu1 %v4792_v39  ;;  %2159 = vmatprep.subr.bf16.mxu0 %v6459_v8 }
 0x4c0   :  { %2119 = vmatpush1.bf16.msra.mxu1 %v6553_v34  ;;  %2160 = vmatpush1.bf16.msra.mxu0 %v6554_v36 }
 0x4c1   :  { %2120 = vmatprep.subr.bf16.mxu1 %v6555_v31  ;;  %2161 = vmatprep.subr.bf16.mxu0 %v6556_v29 }
 0x4c4   :  { %2121 = vmatpush1.bf16.msra.mxu1 %v6557_v37  ;;  %2162 = vmatpush1.bf16.msra.mxu0 %v6558_v16 }
 0x4c5   :  { %2122 = vmatprep.subr.bf16.mxu1 %v6559_v19  ;;  %2163 = vmatprep.subr.bf16.mxu0 %v6560_v32 }
 0x4c8   :  { %2123 = vmatpush1.bf16.msra.mxu1 %v6561_v57  ;;  %2164 = vmatpush1.bf16.msra.mxu0 %v6562_v25 }
 0x4c9   :  { %2124 = vmatprep.subr.bf16.mxu1 %v6563_v7  ;;  %2165 = vmatprep.subr.bf16.mxu0 %v6564_v0 }
 0x4cc   :  { %2125 = vmatpush1.bf16.msra.mxu1 %v6565_v3  ;;  %2166 = vmatpush1.bf16.msra.mxu0 %v6473_v60 }
 0x4cd   :  { %2126 = vmatprep.subr.bf16.mxu1 %v6566_v56  ;;  %2167 = vmatprep.subr.bf16.mxu0 %v6653_v5 }
 0x4d0   :  { %2127 = vmatpush1.bf16.msra.mxu1 %v6654_v13  ;;  %2168 = vmatpush1.bf16.msra.mxu0 %v6477_v27 }
 0x4d1   :  { %2128 = vmatprep.subr.bf16.mxu1 %v6569_v2  ;;  %2169 = vmatprep.subr.bf16.mxu0 %v6655_v22 }
 0x4d4   :  { %2129 = vmatpush1.bf16.msra.mxu1 %v6656_v6  ;;  %2170 = vmatpush1.bf16.msra.mxu0 %v6657_v54 }
 0x4d5   :  { %2130 = vmatprep.subr.bf16.mxu1 %v6571_v18  ;;  %2171 = vmatprep.subr.bf16.mxu0 %v6658_v63 }
 0x4d8   :  { %2131 = vmatpush1.bf16.msra.mxu1 %v6659_v47  ;;  %2172 = vmatpush1.bf16.msra.mxu0 %v4482_v40 }
 0x4d9   :  { %2132 = vmatprep.subr.bf16.mxu1 %v6574_v44  ;;  %2173 = vmatprep.subr.bf16.mxu0 %v6660_v26 }
 0x4dc   :  { %2133 = vmatpush1.bf16.msra.mxu1 %v6661_v53  ;;  %2174 = vmatpush1.bf16.msra.mxu0 %v4494_v51 }
 0x4dd   :  { %2134 = vmatprep.subr.bf16.mxu1 %v6576_v24  ;;  %2175 = vmatprep.subr.bf16.mxu0 %v6577_v15  ;;  %v6748_v15 = vld [vmem:[#allocation122_spill] sm:$0xff] }
 0x4e0   :  { %2135 = vmatpush1.bf16.msra.mxu1 %v6578_v14  ;;  %2176 = vmatpush1.bf16.msra.mxu0 %v4502_v46  ;;  %v6747_v14 = vld [vmem:[#allocation103_spill] sm:$0xff] }
 0x4e1   :  { %2136 = vmatprep.subr.bf16.mxu1 %v6579_v11  ;;  %2177 = vmatprep.subr.bf16.mxu0 %v6580_v49 }
 0x4e4   :  { %2137 = vmatpush1.bf16.msra.mxu1 %v4870_v4  ;;  %2178 = vmatpush1.bf16.msra.mxu0 %v4510_v41 }
 0x4e5   :  { %2138 = vmatprep.subr.bf16.mxu1 %v6581_v58  ;;  %2179 = vmatprep.subr.bf16.mxu0 %v6582_v35 }
 0x4e8   :  { %2139 = vmatpush1.bf16.msra.mxu1 %v6662_v1  ;;  %2180 = vmatpush1.bf16.msra.mxu0 %v6663_v28 }
 0x4e9   :  { %2140 = vmatprep.subr.bf16.mxu1 %v6664_v61  ;;  %2181 = vmatprep.subr.bf16.mxu0 %v6665_v17  ;;  %v6675_v61 = vld [vmem:[#allocation101_spill] sm:$0xff]  ;;  %v6676_v17 = vld [vmem:[#allocation8_spill] sm:$0xff] }
 0x4ec   :  { %2141 = vmatpush1.bf16.msra.mxu1 %v6666_v43  ;;  %2182 = vmatpush1.bf16.msra.mxu0 %v6667_v45  ;;  %v6677_v43 = vld [vmem:[#allocation25_spill] sm:$0xff] }
 0x4ed   :  { %2142 = vmatprep.subr.bf16.mxu1 %v6668_v10  ;;  %2183 = vmatprep.subr.bf16.mxu0 %v6669_v59  ;;  %v6678_v59 = vld [vmem:[#allocation9_spill] sm:$0xff]  ;;  %v6687_v10 = vld [vmem:[#allocation39_spill] sm:$0xff] }
 0x4f0   :  { %2143 = vmatpush1.bf16.msra.mxu1 %v6670_v9  ;;  %2184 = vmatpush1.bf16.msra.mxu0 %v6671_v12  ;;  %v6679_v9 = vld [vmem:[#allocation31_spill] sm:$0xff]  ;;  %v6680_v12 = vld [vmem:[#allocation10_spill] sm:$0xff] }
 0x4f1   :  { %2144 = vmatprep.subr.bf16.mxu1 %v6672_v42  ;;  %2185 = vmatprep.subr.bf16.mxu0 %v6673_v30  ;;  %v6681_v42 = vld [vmem:[#allocation33_spill] sm:$0xff]  ;;  %v6682_v30 = vld [vmem:[#allocation11_spill] sm:$0xff] }
 0x4f4   :  { %2145 = vmatpush1.bf16.msra.mxu1 %v6674_v52  ;;  %2186 = vmatpush1.bf16.msra.mxu0 %v6675_v61  ;;  %v6683_v52 = vld [vmem:[#allocation35_spill] sm:$0xff]  ;;  %v6684_v61 = vld [vmem:[#allocation12_spill] sm:$0xff] }
 0x4f5   :  { %2246 = vmatprep.subr.bf16.mxu1 %v6676_v17  ;;  %2287 = vmatprep.subr.bf16.mxu0 %v6677_v43  ;;  %v6685_v17 = vld [vmem:[#allocation37_spill] sm:$0xff] }
 0x4f6   :  { %v6686_v43 = vld [vmem:[#allocation13_spill] sm:$0xff] }
 0x4f7   :  { %2147 = vmatmul.mubr.bf16.vlgmr.msra.gmra.mrb[64].mxu1 %v5165_v21  ;;  %2188 = vmatmul.mubr.bf16.vlgmr.msra.gmra.mrb[52].mxu0 %v5165_v21  ;;  %v6688_v21 = vld [vmem:[#allocation14_spill] sm:$0xff] }
 0x4f8   :  { %2247 = vmatpush1.bf16.msra.mxu1 %v6678_v59  ;;  %2288 = vmatpush1.bf16.msra.mxu0 %v6679_v9  ;;  %v6689_v59 = vld [vmem:[#allocation41_spill] sm:$0xff]  ;;  %v6690_v9 = vld [vmem:[#allocation15_spill] sm:$0xff] }
 0x4f9   :  { %2248 = vmatprep.subr.bf16.mxu1 %v6680_v12  ;;  %2289 = vmatprep.subr.bf16.mxu0 %v6681_v42  ;;  %v6691_v12 = vld [vmem:[#allocation43_spill] sm:$0xff]  ;;  %v6692_v42 = vld [vmem:[#allocation16_spill] sm:$0xff] }
 0x4fc   :  { %2249 = vmatpush1.bf16.msra.mxu1 %v6682_v30  ;;  %2290 = vmatpush1.bf16.msra.mxu0 %v6683_v52  ;;  %v6693_v30 = vld [vmem:[#allocation45_spill] sm:$0xff] }
 0x4fd   :  { %2250 = vmatprep.subr.bf16.mxu1 %v6684_v61  ;;  %2291 = vmatprep.subr.bf16.mxu0 %v6685_v17  ;;  %v6694_v52 = vld [vmem:[#allocation17_spill] sm:$0xff]  ;;  %v6695_v61 = vld [vmem:[#allocation47_spill] sm:$0xff]  ;;  %v6696_v17 = vld [vmem:[#allocation18_spill] sm:$0xff] }
 0x500   :  { %2251 = vmatpush1.bf16.msra.mxu1 %v6686_v43  ;;  %2292 = vmatpush1.bf16.msra.mxu0 %v6687_v10  ;;  %v6697_v43 = vld [vmem:[#allocation49_spill] sm:$0xff]  ;;  %v6698_v10 = vld [vmem:[#allocation19_spill] sm:$0xff] }
 0x501   :  { %2252 = vmatprep.subr.bf16.mxu1 %v6688_v21  ;;  %2293 = vmatprep.subr.bf16.mxu0 %v6689_v59  ;;  %v6699_v21 = vld [vmem:[#allocation51_spill] sm:$0xff]  ;;  %v6700_v59 = vld [vmem:[#allocation20_spill] sm:$0xff] }
 0x504   :  { %2253 = vmatpush1.bf16.msra.mxu1 %v6690_v9  ;;  %2294 = vmatpush1.bf16.msra.mxu0 %v6691_v12  ;;  %v6701_v9 = vld [vmem:[#allocation52_spill] sm:$0xff]  ;;  %v6702_v12 = vld [vmem:[#allocation21_spill] sm:$0xff] }
 0x505   :  { %2254 = vmatprep.subr.bf16.mxu1 %v6692_v42  ;;  %2295 = vmatprep.subr.bf16.mxu0 %v6693_v30  ;;  %v6703_v42 = vld [vmem:[#allocation54_spill] sm:$0xff] }
 0x506   :  { %v6704_v30 = vld [vmem:[#allocation22_spill] sm:$0xff] }
 0x508   :  { %2255 = vmatpush1.bf16.msra.mxu1 %v6694_v52  ;;  %2296 = vmatpush1.bf16.msra.mxu0 %v6695_v61  ;;  %v6705_v52 = vld [vmem:[#allocation56_spill] sm:$0xff]  ;;  %v6706_v61 = vld [vmem:[#allocation23_spill] sm:$0xff] }
 0x509   :  { %2256 = vmatprep.subr.bf16.mxu1 %v6696_v17  ;;  %2297 = vmatprep.subr.bf16.mxu0 %v6697_v43  ;;  %v6707_v17 = vld [vmem:[#allocation58_spill] sm:$0xff]  ;;  %v6708_v43 = vld [vmem:[#allocation24_spill] sm:$0xff] }
 0x50c   :  { %2257 = vmatpush1.bf16.msra.mxu1 %v6698_v10  ;;  %2298 = vmatpush1.bf16.msra.mxu0 %v6699_v21  ;;  %v6709_v10 = vld [vmem:[#allocation60_spill] sm:$0xff]  ;;  %v6710_v21 = vld [vmem:[#allocation26_spill] sm:$0xff] }
 0x50d   :  { %2258 = vmatprep.subr.bf16.mxu1 %v6700_v59  ;;  %2299 = vmatprep.subr.bf16.mxu0 %v6701_v9  ;;  %v6711_v59 = vld [vmem:[#allocation62_spill] sm:$0xff]  ;;  %v6712_v9 = vld [vmem:[#allocation27_spill] sm:$0xff] }
 0x510   :  { %2259 = vmatpush1.bf16.msra.mxu1 %v6702_v12  ;;  %2300 = vmatpush1.bf16.msra.mxu0 %v6703_v42  ;;  %v6713_v12 = vld [vmem:[#allocation64_spill] sm:$0xff] }
 0x511   :  { %2260 = vmatprep.subr.bf16.mxu1 %v6704_v30  ;;  %2301 = vmatprep.subr.bf16.mxu0 %v6705_v52  ;;  %v6714_v42 = vld [vmem:[#allocation28_spill] sm:$0xff]  ;;  %v6715_v30 = vld [vmem:[#allocation66_spill] sm:$0xff]  ;;  %v6716_v52 = vld [vmem:[#allocation29_spill] sm:$0xff] }
 0x514   :  { %2261 = vmatpush1.bf16.msra.mxu1 %v6706_v61  ;;  %2302 = vmatpush1.bf16.msra.mxu0 %v6707_v17  ;;  %v6717_v61 = vld [vmem:[#allocation68_spill] sm:$0xff]  ;;  %v6718_v17 = vld [vmem:[#allocation30_spill] sm:$0xff] }
 0x515   :  { %2262 = vmatprep.subr.bf16.mxu1 %v6708_v43  ;;  %2303 = vmatprep.subr.bf16.mxu0 %v6709_v10  ;;  %v6719_v43 = vld [vmem:[#allocation70_spill] sm:$0xff]  ;;  %v6720_v10 = vld [vmem:[#allocation32_spill] sm:$0xff] }
 0x518   :  { %2263 = vmatpush1.bf16.msra.mxu1 %v6710_v21  ;;  %2304 = vmatpush1.bf16.msra.mxu0 %v6711_v59  ;;  %v6721_v21 = vld [vmem:[#allocation72_spill] sm:$0xff]  ;;  %v6722_v59 = vld [vmem:[#allocation34_spill] sm:$0xff] }
 0x519   :  { %2264 = vmatprep.subr.bf16.mxu1 %v6712_v9  ;;  %2305 = vmatprep.subr.bf16.mxu0 %v6713_v12  ;;  %v6723_v9 = vld [vmem:[#allocation74_spill] sm:$0xff]  ;;  %v6724_v12 = vld [vmem:[#allocation36_spill] sm:$0xff] }
 0x51c   :  { %2265 = vmatpush1.bf16.msra.mxu1 %v6714_v42  ;;  %2306 = vmatpush1.bf16.msra.mxu0 %v6715_v30  ;;  %v6725_v42 = vld [vmem:[#allocation76_spill] sm:$0xff]  ;;  %v6726_v30 = vld [vmem:[#allocation38_spill] sm:$0xff] }
 0x51d   :  { %2266 = vmatprep.subr.bf16.mxu1 %v6716_v52  ;;  %2307 = vmatprep.subr.bf16.mxu0 %v6717_v61  ;;  %v6727_v52 = vld [vmem:[#allocation78_spill] sm:$0xff]  ;;  %v6728_v61 = vld [vmem:[#allocation40_spill] sm:$0xff] }
 0x520   :  { %2267 = vmatpush1.bf16.msra.mxu1 %v6718_v17  ;;  %2308 = vmatpush1.bf16.msra.mxu0 %v6719_v43  ;;  %v6729_v17 = vld [vmem:[#allocation80_spill] sm:$0xff]  ;;  %v6730_v43 = vld [vmem:[#allocation42_spill] sm:$0xff] }
 0x521   :  { %2268 = vmatprep.subr.bf16.mxu1 %v6720_v10  ;;  %2309 = vmatprep.subr.bf16.mxu0 %v6721_v21  ;;  %v6731_v10 = vld [vmem:[#allocation82_spill] sm:$0xff]  ;;  %v6732_v21 = vld [vmem:[#allocation44_spill] sm:$0xff] }
 0x524   :  { %2269 = vmatpush1.bf16.msra.mxu1 %v6722_v59  ;;  %2310 = vmatpush1.bf16.msra.mxu0 %v6723_v9  ;;  %v6733_v59 = vld [vmem:[#allocation84_spill] sm:$0xff]  ;;  %v6734_v9 = vld [vmem:[#allocation46_spill] sm:$0xff] }
 0x525   :  { %2270 = vmatprep.subr.bf16.mxu1 %v6724_v12  ;;  %2311 = vmatprep.subr.bf16.mxu0 %v6725_v42  ;;  %v6735_v12 = vld [vmem:[#allocation86_spill] sm:$0xff]  ;;  %v6736_v42 = vld [vmem:[#allocation48_spill] sm:$0xff] }
 0x528   :  { %2271 = vmatpush1.bf16.msra.mxu1 %v6726_v30  ;;  %2312 = vmatpush1.bf16.msra.mxu0 %v6727_v52  ;;  %v6737_v30 = vld [vmem:[#allocation87_spill] sm:$0xff]  ;;  %v6738_v52 = vld [vmem:[#allocation50_spill] sm:$0xff] }
 0x529   :  { %2272 = vmatprep.subr.bf16.mxu1 %v6728_v61  ;;  %2313 = vmatprep.subr.bf16.mxu0 %v6729_v17  ;;  %v6739_v61 = vld [vmem:[#allocation89_spill] sm:$0xff]  ;;  %v6740_v17 = vld [vmem:[#allocation130_spill] sm:$0xff] }
 0x52c   :  { %2273 = vmatpush1.bf16.msra.mxu1 %v6730_v43  ;;  %2314 = vmatpush1.bf16.msra.mxu0 %v6731_v10  ;;  %v6741_v43 = vld [vmem:[#allocation53_spill] sm:$0xff]  ;;  %v6742_v10 = vld [vmem:[#allocation102_spill] sm:$0xff] }
 0x52d   :  { %2274 = vmatprep.subr.bf16.mxu1 %v6732_v21  ;;  %2315 = vmatprep.subr.bf16.mxu0 %v6733_v59  ;;  %v6743_v21 = vld [vmem:[#allocation133_spill] sm:$0xff] }
 0x52e   :  { %v440_v45 = vadd.f32 %v6743_v21, %v6742_v10 }
 0x530   :  { %2275 = vmatpush1.bf16.msra.mxu1 %v6734_v9  ;;  %2316 = vmatpush1.bf16.msra.mxu0 %v6735_v12  ;;  %v6744_v9 = vld [vmem:[#allocation110_spill] sm:$0xff]  ;;  %v6745_v12 = vld [vmem:[#allocation132_spill] sm:$0xff] }
 0x531   :  { %2276 = vmatprep.subr.bf16.mxu1 %v6736_v42  ;;  %2317 = vmatprep.subr.bf16.mxu0 %v6737_v30  ;;  %v6746_v30 = vld [vmem:[#allocation112_spill] sm:$0xff] }
 0x534   :  { %2277 = vmatpush1.bf16.msra.mxu1 %v6738_v52  ;;  %2318 = vmatpush1.bf16.msra.mxu0 %v6739_v61 }
 0x535   :  { %2328 = vmatprep.subr.bf16.mxu1 %v6740_v17  ;;  %2369 = vmatprep.subr.bf16.mxu0 %v6741_v43 }
 0x58a   :  { %v2066_v59 = vpop.f32.mrb[60].mxu1  ;;  %v2107_v28 = vpop.f32.mrb[48].mxu0 }
 0x58b   :  { %v2067_v1 = vadd.f32 %v2066_v59, %v6744_v9  ;;  %v2108_v35 = vadd.f32 %v2107_v28, %v6745_v12  ;;  %v2068_v42 = vpop.f32.mrb[61].mxu1  ;;  %v2109_v58 = vpop.f32.mrb[49].mxu0 }
 0x58c   :  { %v2069_v41 = vadd.f32 %v2068_v42, %v6746_v30  ;;  %v2110_v52 = vadd.f32 %v2109_v58, %v440_v45  ;;  %v2070_v4 = vpop.f32.mrb[62].mxu1  ;;  %v2111_v61 = vpop.f32.mrb[50].mxu0  ;;  %v549_v42 = vadd.f32 %v6748_v15, %v6747_v14  ;;  %v6749_v58 = vld [vmem:[#allocation124_spill] sm:$0xff] }
 0x58d   :  { %v2071_v49 = vpop.f32.mrb[63].mxu1  ;;  %v2112_v17 = vpop.f32.mrb[51].mxu0  ;;  %v3549_v11 = vmul.f32 -1.442695, %v2067_v1  ;;  %v6750_v4 = vld [vmem:[#allocation125_spill] sm:$0xff] }
 0x58e   :  { %v3550_v43 = vmul.f32 -1.442695, %v2069_v41  ;;  %v3552_v46 = vmul.f32 -1.442695, %v2110_v52  ;;  %v551_v61 = vadd.f32 %v6750_v4, %v6749_v58  ;;  %v6751_v49 = vld [vmem:[#allocation104_spill] sm:$0xff] }
 0x58f   :  { %3792 = vpow2.f32 %v3549_v11  ;;  %v6752_v17 = vld [vmem:[#allocation152_spill] sm:$0xff] }
 0x590   :  { %3794 = vpow2.f32 %v3550_v43  ;;  %v663_v1 = vadd.f32 %v6752_v17, %v6751_v49  ;;  %v6753_v43 = vld [vmem:[#allocation151_spill] sm:$0xff]  ;;  %v3551_v17 = vmul.f32 -1.442695, %v2108_v35 }
 0x591   :  { %3796 = vpow2.f32 %v3552_v46 }
 0x599   :  { %v3793_v21 = vpop.eup %3792 }
 0x59a   :  { %v3795_v10 = vpop.eup %3794  ;;  %v2214_v9 = vadd.f32 1.0, %v3793_v21 }
 0x59b   :  { %v3797_v59 = vpop.eup %3796  ;;  %v2215_v28 = vadd.f32 1.0, %v3795_v10 }
 0x59c   :  { %v2217_v12 = vadd.f32 1.0, %v3797_v59  ;;  %3798 = vrcp.f32 %v2214_v9 }
 0x59d   :  { %3800 = vrcp.f32 %v2215_v28 }
 0x59e   :  { %3802 = vrcp.f32 %v2217_v12 }
 0x5a6   :  { %v3799_v9 = vpop.eup %3798 }
 0x5a7   :  { %v3801_v49 = vpop.eup %3800 }
 0x5a8   :  { %v2234_v12 = vmul.f32 %v3801_v49, %v5158_v20 }
 0x5ca   :  { %v2148_v41 = vpop.f32.mrb[64].mxu1  ;;  %v2189_v11 = vpop.f32.mrb[52].mxu0 }
 0x5cb   :  { %v2149_v46 = vadd.f32 %v2148_v41, %v549_v42  ;;  %v2190_v45 = vadd.f32 %v2189_v11, %v6753_v43  ;;  %v2150_v30 = vpop.f32.mrb[65].mxu1  ;;  %v2191_v52 = vpop.f32.mrb[53].mxu0 }
 0x5cc   :  { %v2151_v10 = vadd.f32 %v2150_v30, %v551_v61  ;;  %v2192_v21 = vadd.f32 %v2191_v52, %v663_v1  ;;  %v2152_v59 = vpop.f32.mrb[66].mxu1  ;;  %v2193_v15 = vpop.f32.mrb[54].mxu0 }
 0x5cd   :  { %v3553_v14 = vmul.f32 -1.442695, %v2149_v46  ;;  %3804 = vtanh.f32 %v2190_v45  ;;  %v2153_v4 = vpop.f32.mrb[67].mxu1  ;;  %v2194_v58 = vpop.f32.mrb[55].mxu0 }
 0x5ce   :  { %3806 = vtanh.f32 %v2192_v21  ;;  %v3554_v28 = vmul.f32 -1.442695, %v2151_v10  ;;  %v3803_v42 = vpop.eup %3802 }
 0x5cf   :  { %3808 = vpow2.f32 %v3553_v14 }
 0x5d0   :  { %3810 = vpow2.f32 %v3551_v17 }
 0x5d1   :  { %3812 = vpow2.f32 %v3554_v28 }
 0x5d7   :  { %v3805_v41 = vpop.eup %3804 }
 0x5d8   :  { %v3807_v11 = vpop.eup %3806  ;;  %v2235_v61 = vmul.f32 %v3805_v41, %v3799_v9  ;;  %v6756_v41 = vld [vmem:[#allocation91_spill] sm:$0xff] }
 0x5d9   :  { %v3809_v1 = vpop.eup %3808  ;;  %v2240_v43 = vmul.f32 %v3807_v11, %v3803_v42  ;;  %v6755_v42 = vld [vmem:[#allocation171_spill] sm:$0xff]  ;;  %v6757_v11 = vld [vmem:[#allocation172_spill] sm:$0xff] }
 0x5da   :  { %v2218_v46 = vadd.f32 1.0, %v3809_v1  ;;  %v5312_v45 = vadd.f32 %v2235_v61, %v2234_v12  ;;  %v3811_v58 = vpop.eup %3810  ;;  %v6758_v12 = vld [vmem:[#allocation92_spill] sm:$0xff]  ;;  %v6759_v61 = vld [vmem:[#allocation173_spill] sm:$0xff] }
 0x5db   :  { %v3813_v14 = vpop.eup %3812  ;;  %v2216_v30 = vadd.f32 1.0, %v3811_v58  ;;  %v6760_v1 = vld [vmem:[#allocation93_spill] sm:$0xff]  ;;  %v6763_v58 = vld [vmem:[#allocation175_spill] sm:$0xff] }
 0x5dc   :  { %3814 = vrcp.f32 %v2218_v46  ;;  %v2219_v52 = vadd.f32 1.0, %v3813_v14  ;;  %v6762_v46 = vld [vmem:[#allocation94_spill] sm:$0xff]  ;;  %v6764_v14 = vld [vmem:[#allocation95_spill] sm:$0xff] }
 0x5dd   :  { %3816 = vtanh.f32 %v5312_v45 }
 0x5de   :  { %3818 = vrcp.f32 %v2216_v30  ;;  %v6765_v30 = vld [vmem:[#allocation176_spill] sm:$0xff] }
 0x5df   :  { %3820 = vrcp.f32 %v2219_v52  ;;  %v6767_v52 = vld [vmem:[#allocation177_spill] sm:$0xff] }
 0x5e6   :  { %v3815_v35 = vpop.eup %3814 }
 0x5e7   :  { %v2239_v10 = vmul.f32 %v3815_v35, %v5162_v50  ;;  %v3817_v20 = vpop.eup %3816  ;;  %v6754_v50 = vld [vmem:[#allocation90_spill] sm:$0xff]  ;;  %v6766_v35 = vld [vmem:[#allocation96_spill] sm:$0xff] }
 0x5e8   :  { %v3819_v49 = vpop.eup %3818 }
 0x5e9   :  { %v5316_v21 = vadd.f32 %v2240_v43, %v2239_v10  ;;  %v3821_v59 = vpop.eup %3820  ;;  %v2238_v4 = vmul.f32 %v3819_v49, %v3817_v20  ;;  %v6761_v43 = vld [vmem:[#allocation174_spill] sm:$0xff]  ;;  %v6768_v10 = vld [vmem:[#allocation97_spill] sm:$0xff] }
 0x5ea   :  { %v6769_v20 = vld [vmem:[#allocation178_spill] sm:$0xff] }
 0x5eb   :  { %3822 = vtanh.f32 %v5316_v21  ;;  %v5319_v28 = vpack.c.bf16 %v2238_v4, %v2238_v4  ;;  %v6770_v49 = vld [vmem:[#allocation98_spill] sm:$0xff]  ;;  %v6773_v4 = vld [vmem:[#allocation180_spill] sm:$0xff] }
 0x5f5   :  { %v3823_v15 = vpop.eup %3822 }
 0x5f6   :  { %v2243_v9 = vmul.f32 %v3823_v15, %v3821_v59  ;;  %v6771_v59 = vld [vmem:[#allocation179_spill] sm:$0xff] }
 0x5f7   :  { %v6772_v15 = vld [vmem:[#allocation99_spill] sm:$0xff] }
 0x5f8   :  { %v2245_v17 = vpack.c.bf16 %v2243_v9, %v2243_v9  ;;  %v6774_v9 = vld [vmem:[#allocation100_spill] sm:$0xff] }
 0x5fa   :  { %2278 = vmatprep.mubr.bf16.mxu1 %v2245_v17  ;;  %2319 = vmatprep.mubr.bf16.mxu0 %v2245_v17 }
 0x5fb   :  { %2279 = vmatmul.mubr.bf16.vlgmr.msra.gmra.mrb[68].mxu1 %v5319_v28  ;;  %2320 = vmatmul.mubr.bf16.vlgmr.msra.gmra.mrb[56].mxu0 %v5319_v28 }
 0x5fc   :  { %2329 = vmatpush1.bf16.msra.mxu1 %v4729_v33  ;;  %2370 = vmatpush1.bf16.msra.mxu0 %v6455_v23 }
 0x5fd   :  { %2360 = vmatprep.mubr.bf16.mxu1 %v2245_v17  ;;  %2401 = vmatprep.mubr.bf16.mxu0 %v2245_v17  ;;  %v6775_v17 = vld [vmem:[#allocation181_spill] sm:$0xff] }
 0x5fe   :  { %2330 = vmatprep.subr.bf16.mxu1 %v4782_v38  ;;  %2371 = vmatprep.subr.bf16.mxu0 %v6456_v55 }
 0x600   :  { %2331 = vmatpush1.bf16.msra.mxu1 %v4788_v48  ;;  %2372 = vmatpush1.bf16.msra.mxu0 %v6457_v62 }
 0x601   :  { %2332 = vmatprep.subr.bf16.mxu1 %v4792_v39  ;;  %2373 = vmatprep.subr.bf16.mxu0 %v6459_v8 }
 0x604   :  { %2333 = vmatpush1.bf16.msra.mxu1 %v6553_v34  ;;  %2374 = vmatpush1.bf16.msra.mxu0 %v6554_v36 }
 0x605   :  { %2334 = vmatprep.subr.bf16.mxu1 %v6555_v31  ;;  %2375 = vmatprep.subr.bf16.mxu0 %v6556_v29 }
 0x608   :  { %2335 = vmatpush1.bf16.msra.mxu1 %v6557_v37  ;;  %2376 = vmatpush1.bf16.msra.mxu0 %v6558_v16 }
 0x609   :  { %2336 = vmatprep.subr.bf16.mxu1 %v6559_v19  ;;  %2377 = vmatprep.subr.bf16.mxu0 %v6560_v32 }
 0x60c   :  { %2337 = vmatpush1.bf16.msra.mxu1 %v6561_v57  ;;  %2378 = vmatpush1.bf16.msra.mxu0 %v6562_v25 }
 0x60d   :  { %2338 = vmatprep.subr.bf16.mxu1 %v6563_v7  ;;  %2379 = vmatprep.subr.bf16.mxu0 %v6564_v0 }
 0x610   :  { %2339 = vmatpush1.bf16.msra.mxu1 %v6565_v3  ;;  %2380 = vmatpush1.bf16.msra.mxu0 %v6473_v60 }
 0x611   :  { %2340 = vmatprep.subr.bf16.mxu1 %v6566_v56  ;;  %2381 = vmatprep.subr.bf16.mxu0 %v6653_v5 }
 0x614   :  { %2341 = vmatpush1.bf16.msra.mxu1 %v6654_v13  ;;  %2382 = vmatpush1.bf16.msra.mxu0 %v6477_v27 }
 0x615   :  { %2342 = vmatprep.subr.bf16.mxu1 %v6569_v2  ;;  %2383 = vmatprep.subr.bf16.mxu0 %v6655_v22 }
 0x618   :  { %2343 = vmatpush1.bf16.msra.mxu1 %v6656_v6  ;;  %2384 = vmatpush1.bf16.msra.mxu0 %v6657_v54 }
 0x619   :  { %2344 = vmatprep.subr.bf16.mxu1 %v6571_v18  ;;  %2385 = vmatprep.subr.bf16.mxu0 %v6658_v63 }
 0x61c   :  { %2345 = vmatpush1.bf16.msra.mxu1 %v6659_v47  ;;  %2386 = vmatpush1.bf16.msra.mxu0 %v4482_v40 }
 0x61d   :  { %2346 = vmatprep.subr.bf16.mxu1 %v6574_v44  ;;  %2387 = vmatprep.subr.bf16.mxu0 %v6660_v26 }
 0x620   :  { %2347 = vmatpush1.bf16.msra.mxu1 %v6661_v53  ;;  %2388 = vmatpush1.bf16.msra.mxu0 %v4494_v51 }
 0x621   :  { %2348 = vmatprep.subr.bf16.mxu1 %v6576_v24  ;;  %2389 = vmatprep.subr.bf16.mxu0 %v6754_v50  ;;  %v6849_v50 = vld [vmem:[#allocation126_spill] sm:$0xff] }
 0x624   :  { %2349 = vmatpush1.bf16.msra.mxu1 %v6755_v42  ;;  %2390 = vmatpush1.bf16.msra.mxu0 %v6756_v41  ;;  %v6848_v42 = vld [vmem:[#allocation103_spill] sm:$0xff] }
 0x625   :  { %2350 = vmatprep.subr.bf16.mxu1 %v6757_v11  ;;  %2391 = vmatprep.subr.bf16.mxu0 %v6758_v12 }
 0x628   :  { %2351 = vmatpush1.bf16.msra.mxu1 %v6759_v61  ;;  %2392 = vmatpush1.bf16.msra.mxu0 %v6760_v1 }
 0x629   :  { %2352 = vmatprep.subr.bf16.mxu1 %v6761_v43  ;;  %2393 = vmatprep.subr.bf16.mxu0 %v6762_v46 }
 0x62c   :  { %2353 = vmatpush1.bf16.msra.mxu1 %v6763_v58  ;;  %2394 = vmatpush1.bf16.msra.mxu0 %v6764_v14 }
 0x62d   :  { %2354 = vmatprep.subr.bf16.mxu1 %v6765_v30  ;;  %2395 = vmatprep.subr.bf16.mxu0 %v6766_v35  ;;  %v6776_v30 = vld [vmem:[#allocation101_spill] sm:$0xff]  ;;  %v6777_v35 = vld [vmem:[#allocation8_spill] sm:$0xff] }
 0x630   :  { %2355 = vmatpush1.bf16.msra.mxu1 %v6767_v52  ;;  %2396 = vmatpush1.bf16.msra.mxu0 %v6768_v10  ;;  %v6778_v52 = vld [vmem:[#allocation25_spill] sm:$0xff] }
 0x631   :  { %2356 = vmatprep.subr.bf16.mxu1 %v6769_v20  ;;  %2397 = vmatprep.subr.bf16.mxu0 %v6770_v49  ;;  %v6779_v49 = vld [vmem:[#allocation9_spill] sm:$0xff]  ;;  %v6788_v20 = vld [vmem:[#allocation39_spill] sm:$0xff] }
 0x634   :  { %2357 = vmatpush1.bf16.msra.mxu1 %v6771_v59  ;;  %2398 = vmatpush1.bf16.msra.mxu0 %v6772_v15  ;;  %v6780_v59 = vld [vmem:[#allocation31_spill] sm:$0xff]  ;;  %v6781_v15 = vld [vmem:[#allocation10_spill] sm:$0xff] }
 0x635   :  { %2358 = vmatprep.subr.bf16.mxu1 %v6773_v4  ;;  %2399 = vmatprep.subr.bf16.mxu0 %v6774_v9  ;;  %v6782_v4 = vld [vmem:[#allocation33_spill] sm:$0xff]  ;;  %v6783_v9 = vld [vmem:[#allocation11_spill] sm:$0xff] }
 0x638   :  { %2359 = vmatpush1.bf16.msra.mxu1 %v6775_v17  ;;  %2400 = vmatpush1.bf16.msra.mxu0 %v6776_v30  ;;  %v6784_v17 = vld [vmem:[#allocation35_spill] sm:$0xff]  ;;  %v6785_v30 = vld [vmem:[#allocation12_spill] sm:$0xff] }
 0x639   :  { %2460 = vmatprep.subr.bf16.mxu1 %v6777_v35  ;;  %2501 = vmatprep.subr.bf16.mxu0 %v6778_v52  ;;  %v6786_v35 = vld [vmem:[#allocation37_spill] sm:$0xff] }
 0x63a   :  { %v6787_v52 = vld [vmem:[#allocation13_spill] sm:$0xff] }
 0x63b   :  { %2361 = vmatmul.mubr.bf16.vlgmr.msra.gmra.mrb[72].mxu1 %v5319_v28  ;;  %2402 = vmatmul.mubr.bf16.vlgmr.msra.gmra.mrb[60].mxu0 %v5319_v28  ;;  %v6789_v28 = vld [vmem:[#allocation14_spill] sm:$0xff] }
 0x63c   :  { %2461 = vmatpush1.bf16.msra.mxu1 %v6779_v49  ;;  %2502 = vmatpush1.bf16.msra.mxu0 %v6780_v59  ;;  %v6790_v49 = vld [vmem:[#allocation41_spill] sm:$0xff]  ;;  %v6791_v59 = vld [vmem:[#allocation15_spill] sm:$0xff] }
 0x63d   :  { %2462 = vmatprep.subr.bf16.mxu1 %v6781_v15  ;;  %2503 = vmatprep.subr.bf16.mxu0 %v6782_v4  ;;  %v6792_v15 = vld [vmem:[#allocation43_spill] sm:$0xff]  ;;  %v6793_v4 = vld [vmem:[#allocation16_spill] sm:$0xff] }
 0x640   :  { %2463 = vmatpush1.bf16.msra.mxu1 %v6783_v9  ;;  %2504 = vmatpush1.bf16.msra.mxu0 %v6784_v17  ;;  %v6794_v9 = vld [vmem:[#allocation45_spill] sm:$0xff] }
 0x641   :  { %2464 = vmatprep.subr.bf16.mxu1 %v6785_v30  ;;  %2505 = vmatprep.subr.bf16.mxu0 %v6786_v35  ;;  %v6795_v17 = vld [vmem:[#allocation17_spill] sm:$0xff]  ;;  %v6796_v30 = vld [vmem:[#allocation47_spill] sm:$0xff]  ;;  %v6797_v35 = vld [vmem:[#allocation18_spill] sm:$0xff] }
 0x644   :  { %2465 = vmatpush1.bf16.msra.mxu1 %v6787_v52  ;;  %2506 = vmatpush1.bf16.msra.mxu0 %v6788_v20  ;;  %v6798_v52 = vld [vmem:[#allocation49_spill] sm:$0xff]  ;;  %v6799_v20 = vld [vmem:[#allocation19_spill] sm:$0xff] }
 0x645   :  { %2466 = vmatprep.subr.bf16.mxu1 %v6789_v28  ;;  %2507 = vmatprep.subr.bf16.mxu0 %v6790_v49  ;;  %v6800_v28 = vld [vmem:[#allocation51_spill] sm:$0xff]  ;;  %v6801_v49 = vld [vmem:[#allocation20_spill] sm:$0xff] }
 0x648   :  { %2467 = vmatpush1.bf16.msra.mxu1 %v6791_v59  ;;  %2508 = vmatpush1.bf16.msra.mxu0 %v6792_v15  ;;  %v6802_v59 = vld [vmem:[#allocation52_spill] sm:$0xff]  ;;  %v6803_v15 = vld [vmem:[#allocation21_spill] sm:$0xff] }
 0x649   :  { %2468 = vmatprep.subr.bf16.mxu1 %v6793_v4  ;;  %2509 = vmatprep.subr.bf16.mxu0 %v6794_v9  ;;  %v6804_v4 = vld [vmem:[#allocation54_spill] sm:$0xff] }
 0x64a   :  { %v6805_v9 = vld [vmem:[#allocation22_spill] sm:$0xff] }
 0x64c   :  { %2469 = vmatpush1.bf16.msra.mxu1 %v6795_v17  ;;  %2510 = vmatpush1.bf16.msra.mxu0 %v6796_v30  ;;  %v6806_v17 = vld [vmem:[#allocation56_spill] sm:$0xff]  ;;  %v6807_v30 = vld [vmem:[#allocation23_spill] sm:$0xff] }
 0x64d   :  { %2470 = vmatprep.subr.bf16.mxu1 %v6797_v35  ;;  %2511 = vmatprep.subr.bf16.mxu0 %v6798_v52  ;;  %v6808_v35 = vld [vmem:[#allocation58_spill] sm:$0xff]  ;;  %v6809_v52 = vld [vmem:[#allocation24_spill] sm:$0xff] }
 0x650   :  { %2471 = vmatpush1.bf16.msra.mxu1 %v6799_v20  ;;  %2512 = vmatpush1.bf16.msra.mxu0 %v6800_v28  ;;  %v6810_v20 = vld [vmem:[#allocation60_spill] sm:$0xff]  ;;  %v6811_v28 = vld [vmem:[#allocation26_spill] sm:$0xff] }
 0x651   :  { %2472 = vmatprep.subr.bf16.mxu1 %v6801_v49  ;;  %2513 = vmatprep.subr.bf16.mxu0 %v6802_v59  ;;  %v6812_v49 = vld [vmem:[#allocation62_spill] sm:$0xff]  ;;  %v6813_v59 = vld [vmem:[#allocation27_spill] sm:$0xff] }
 0x654   :  { %2473 = vmatpush1.bf16.msra.mxu1 %v6803_v15  ;;  %2514 = vmatpush1.bf16.msra.mxu0 %v6804_v4  ;;  %v6814_v15 = vld [vmem:[#allocation64_spill] sm:$0xff] }
 0x655   :  { %2474 = vmatprep.subr.bf16.mxu1 %v6805_v9  ;;  %2515 = vmatprep.subr.bf16.mxu0 %v6806_v17  ;;  %v6815_v4 = vld [vmem:[#allocation28_spill] sm:$0xff]  ;;  %v6816_v9 = vld [vmem:[#allocation66_spill] sm:$0xff]  ;;  %v6817_v17 = vld [vmem:[#allocation29_spill] sm:$0xff] }
 0x658   :  { %2475 = vmatpush1.bf16.msra.mxu1 %v6807_v30  ;;  %2516 = vmatpush1.bf16.msra.mxu0 %v6808_v35  ;;  %v6818_v30 = vld [vmem:[#allocation68_spill] sm:$0xff]  ;;  %v6819_v35 = vld [vmem:[#allocation30_spill] sm:$0xff] }
 0x659   :  { %2476 = vmatprep.subr.bf16.mxu1 %v6809_v52  ;;  %2517 = vmatprep.subr.bf16.mxu0 %v6810_v20  ;;  %v6820_v52 = vld [vmem:[#allocation70_spill] sm:$0xff]  ;;  %v6821_v20 = vld [vmem:[#allocation32_spill] sm:$0xff] }
 0x65c   :  { %2477 = vmatpush1.bf16.msra.mxu1 %v6811_v28  ;;  %2518 = vmatpush1.bf16.msra.mxu0 %v6812_v49  ;;  %v6822_v28 = vld [vmem:[#allocation72_spill] sm:$0xff]  ;;  %v6823_v49 = vld [vmem:[#allocation34_spill] sm:$0xff] }
 0x65d   :  { %2478 = vmatprep.subr.bf16.mxu1 %v6813_v59  ;;  %2519 = vmatprep.subr.bf16.mxu0 %v6814_v15  ;;  %v6824_v59 = vld [vmem:[#allocation74_spill] sm:$0xff]  ;;  %v6825_v15 = vld [vmem:[#allocation36_spill] sm:$0xff] }
 0x660   :  { %2479 = vmatpush1.bf16.msra.mxu1 %v6815_v4  ;;  %2520 = vmatpush1.bf16.msra.mxu0 %v6816_v9  ;;  %v6826_v4 = vld [vmem:[#allocation76_spill] sm:$0xff]  ;;  %v6827_v9 = vld [vmem:[#allocation38_spill] sm:$0xff] }
 0x661   :  { %2480 = vmatprep.subr.bf16.mxu1 %v6817_v17  ;;  %2521 = vmatprep.subr.bf16.mxu0 %v6818_v30  ;;  %v6828_v17 = vld [vmem:[#allocation78_spill] sm:$0xff]  ;;  %v6829_v30 = vld [vmem:[#allocation40_spill] sm:$0xff] }
 0x664   :  { %2481 = vmatpush1.bf16.msra.mxu1 %v6819_v35  ;;  %2522 = vmatpush1.bf16.msra.mxu0 %v6820_v52  ;;  %v6830_v35 = vld [vmem:[#allocation80_spill] sm:$0xff]  ;;  %v6831_v52 = vld [vmem:[#allocation42_spill] sm:$0xff] }
 0x665   :  { %2482 = vmatprep.subr.bf16.mxu1 %v6821_v20  ;;  %2523 = vmatprep.subr.bf16.mxu0 %v6822_v28  ;;  %v6832_v20 = vld [vmem:[#allocation82_spill] sm:$0xff]  ;;  %v6833_v28 = vld [vmem:[#allocation44_spill] sm:$0xff] }
 0x668   :  { %2483 = vmatpush1.bf16.msra.mxu1 %v6823_v49  ;;  %2524 = vmatpush1.bf16.msra.mxu0 %v6824_v59  ;;  %v6834_v49 = vld [vmem:[#allocation84_spill] sm:$0xff]  ;;  %v6835_v59 = vld [vmem:[#allocation46_spill] sm:$0xff] }
 0x669   :  { %2484 = vmatprep.subr.bf16.mxu1 %v6825_v15  ;;  %2525 = vmatprep.subr.bf16.mxu0 %v6826_v4  ;;  %v6836_v15 = vld [vmem:[#allocation86_spill] sm:$0xff]  ;;  %v6837_v4 = vld [vmem:[#allocation48_spill] sm:$0xff] }
 0x66c   :  { %2485 = vmatpush1.bf16.msra.mxu1 %v6827_v9  ;;  %2526 = vmatpush1.bf16.msra.mxu0 %v6828_v17  ;;  %v6838_v9 = vld [vmem:[#allocation87_spill] sm:$0xff]  ;;  %v6839_v17 = vld [vmem:[#allocation50_spill] sm:$0xff] }
 0x66d   :  { %2486 = vmatprep.subr.bf16.mxu1 %v6829_v30  ;;  %2527 = vmatprep.subr.bf16.mxu0 %v6830_v35  ;;  %v6840_v30 = vld [vmem:[#allocation89_spill] sm:$0xff]  ;;  %v6841_v35 = vld [vmem:[#allocation130_spill] sm:$0xff] }
 0x670   :  { %2487 = vmatpush1.bf16.msra.mxu1 %v6831_v52  ;;  %2528 = vmatpush1.bf16.msra.mxu0 %v6832_v20  ;;  %v6842_v52 = vld [vmem:[#allocation53_spill] sm:$0xff]  ;;  %v6843_v20 = vld [vmem:[#allocation102_spill] sm:$0xff] }
 0x671   :  { %2488 = vmatprep.subr.bf16.mxu1 %v6833_v28  ;;  %2529 = vmatprep.subr.bf16.mxu0 %v6834_v49  ;;  %v6844_v28 = vld [vmem:[#allocation137_spill] sm:$0xff] }
 0x672   :  { %v446_v10 = vadd.f32 %v6844_v28, %v6843_v20 }
 0x674   :  { %2489 = vmatpush1.bf16.msra.mxu1 %v6835_v59  ;;  %2530 = vmatpush1.bf16.msra.mxu0 %v6836_v15  ;;  %v6845_v59 = vld [vmem:[#allocation107_spill] sm:$0xff]  ;;  %v6846_v15 = vld [vmem:[#allocation136_spill] sm:$0xff] }
 0x675   :  { %2490 = vmatprep.subr.bf16.mxu1 %v6837_v4  ;;  %2531 = vmatprep.subr.bf16.mxu0 %v6838_v9  ;;  %v6847_v9 = vld [vmem:[#allocation109_spill] sm:$0xff] }
 0x678   :  { %2491 = vmatpush1.bf16.msra.mxu1 %v6839_v17  ;;  %2532 = vmatpush1.bf16.msra.mxu0 %v6840_v30 }
 0x679   :  { %2542 = vmatprep.subr.bf16.mxu1 %v6841_v35  ;;  %2583 = vmatprep.subr.bf16.mxu0 %v6842_v52 }
 0x6ce   :  { %v2280_v49 = vpop.f32.mrb[68].mxu1  ;;  %v2321_v14 = vpop.f32.mrb[56].mxu0 }
 0x6cf   :  { %v2281_v58 = vadd.f32 %v2280_v49, %v6845_v59  ;;  %v2322_v46 = vadd.f32 %v2321_v14, %v6846_v15  ;;  %v2282_v4 = vpop.f32.mrb[69].mxu1  ;;  %v2323_v43 = vpop.f32.mrb[57].mxu0 }
 0x6d0   :  { %v2283_v1 = vadd.f32 %v2282_v4, %v6847_v9  ;;  %v2324_v17 = vadd.f32 %v2323_v43, %v446_v10  ;;  %v2284_v61 = vpop.f32.mrb[70].mxu1  ;;  %v2325_v30 = vpop.f32.mrb[58].mxu0  ;;  %v555_v4 = vadd.f32 %v6849_v50, %v6848_v42  ;;  %v6850_v43 = vld [vmem:[#allocation124_spill] sm:$0xff] }
 0x6d1   :  { %v2285_v12 = vpop.f32.mrb[71].mxu1  ;;  %v2326_v35 = vpop.f32.mrb[59].mxu0  ;;  %v3555_v11 = vmul.f32 -1.442695, %v2281_v58  ;;  %v6851_v61 = vld [vmem:[#allocation129_spill] sm:$0xff] }
 0x6d2   :  { %v3556_v52 = vmul.f32 -1.442695, %v2283_v1  ;;  %v3558_v41 = vmul.f32 -1.442695, %v2324_v17  ;;  %v557_v30 = vadd.f32 %v6851_v61, %v6850_v43  ;;  %v6852_v12 = vld [vmem:[#allocation104_spill] sm:$0xff]  ;;  %v6853_v35 = vld [vmem:[#allocation154_spill] sm:$0xff] }
 0x6d3   :  { %3824 = vpow2.f32 %v3555_v11  ;;  %v669_v58 = vadd.f32 %v6853_v35, %v6852_v12  ;;  %v3557_v35 = vmul.f32 -1.442695, %v2322_v46 }
 0x6d4   :  { %3826 = vpow2.f32 %v3556_v52  ;;  %v6854_v52 = vld [vmem:[#allocation153_spill] sm:$0xff] }
 0x6d5   :  { %3828 = vpow2.f32 %v3558_v41 }
 0x6dd   :  { %v3825_v28 = vpop.eup %3824 }
 0x6de   :  { %v3827_v20 = vpop.eup %3826  ;;  %v2428_v59 = vadd.f32 1.0, %v3825_v28 }
 0x6df   :  { %v3829_v49 = vpop.eup %3828  ;;  %v2429_v14 = vadd.f32 1.0, %v3827_v20 }
 0x6e0   :  { %v2431_v15 = vadd.f32 1.0, %v3829_v49  ;;  %3830 = vrcp.f32 %v2428_v59 }
 0x6e1   :  { %3832 = vrcp.f32 %v2429_v14 }
 0x6e2   :  { %3834 = vrcp.f32 %v2431_v15 }
 0x6ea   :  { %v3831_v59 = vpop.eup %3830 }
 0x6eb   :  { %v3833_v12 = vpop.eup %3832 }
 0x6ec   :  { %v2448_v15 = vmul.f32 %v3833_v12, %v5312_v45 }
 0x70e   :  { %v2362_v1 = vpop.f32.mrb[72].mxu1  ;;  %v2403_v11 = vpop.f32.mrb[60].mxu0 }
 0x70f   :  { %v2363_v41 = vadd.f32 %v2362_v1, %v555_v4  ;;  %v2404_v10 = vadd.f32 %v2403_v11, %v6854_v52  ;;  %v2364_v9 = vpop.f32.mrb[73].mxu1  ;;  %v2405_v17 = vpop.f32.mrb[61].mxu0 }
 0x710   :  { %v2365_v20 = vadd.f32 %v2364_v9, %v557_v30  ;;  %v2406_v28 = vadd.f32 %v2405_v17, %v669_v58  ;;  %v2366_v49 = vpop.f32.mrb[74].mxu1  ;;  %v2407_v50 = vpop.f32.mrb[62].mxu0 }
 0x711   :  { %v3559_v42 = vmul.f32 -1.442695, %v2363_v41  ;;  %3836 = vtanh.f32 %v2404_v10  ;;  %v2367_v61 = vpop.f32.mrb[75].mxu1  ;;  %v2408_v43 = vpop.f32.mrb[63].mxu0 }
 0x712   :  { %3838 = vtanh.f32 %v2406_v28  ;;  %v3560_v14 = vmul.f32 -1.442695, %v2365_v20  ;;  %v3835_v4 = vpop.eup %3834 }
 0x713   :  { %3840 = vpow2.f32 %v3559_v42 }
 0x714   :  { %3842 = vpow2.f32 %v3557_v35 }
 0x715   :  { %3844 = vpow2.f32 %v3560_v14 }
 0x71b   :  { %v3837_v1 = vpop.eup %3836 }
 0x71c   :  { %v3839_v11 = vpop.eup %3838  ;;  %v2449_v30 = vmul.f32 %v3837_v1, %v3831_v59  ;;  %v6857_v1 = vld [vmem:[#allocation91_spill] sm:$0xff] }
 0x71d   :  { %v3841_v58 = vpop.eup %3840  ;;  %v2454_v52 = vmul.f32 %v3839_v11, %v3835_v4  ;;  %v6856_v4 = vld [vmem:[#allocation171_spill] sm:$0xff]  ;;  %v6858_v11 = vld [vmem:[#allocation172_spill] sm:$0xff] }
 0x71e   :  { %v2432_v41 = vadd.f32 1.0, %v3841_v58  ;;  %v5466_v10 = vadd.f32 %v2449_v30, %v2448_v15  ;;  %v3843_v43 = vpop.eup %3842  ;;  %v6859_v15 = vld [vmem:[#allocation92_spill] sm:$0xff]  ;;  %v6860_v30 = vld [vmem:[#allocation173_spill] sm:$0xff] }
 0x71f   :  { %v3845_v42 = vpop.eup %3844  ;;  %v2430_v9 = vadd.f32 1.0, %v3843_v43  ;;  %v6861_v58 = vld [vmem:[#allocation93_spill] sm:$0xff]  ;;  %v6864_v43 = vld [vmem:[#allocation175_spill] sm:$0xff] }
 0x720   :  { %3846 = vrcp.f32 %v2432_v41  ;;  %v2433_v17 = vadd.f32 1.0, %v3845_v42  ;;  %v6863_v41 = vld [vmem:[#allocation94_spill] sm:$0xff]  ;;  %v6865_v42 = vld [vmem:[#allocation95_spill] sm:$0xff] }
 0x721   :  { %3848 = vtanh.f32 %v5466_v10 }
 0x722   :  { %3850 = vrcp.f32 %v2430_v9  ;;  %v6866_v9 = vld [vmem:[#allocation176_spill] sm:$0xff] }
 0x723   :  { %3852 = vrcp.f32 %v2433_v17  ;;  %v6868_v17 = vld [vmem:[#allocation177_spill] sm:$0xff] }
 0x72a   :  { %v3847_v46 = vpop.eup %3846 }
 0x72b   :  { %v2453_v20 = vmul.f32 %v3847_v46, %v5316_v21  ;;  %v3849_v45 = vpop.eup %3848  ;;  %v6855_v21 = vld [vmem:[#allocation90_spill] sm:$0xff]  ;;  %v6867_v46 = vld [vmem:[#allocation96_spill] sm:$0xff] }
 0x72c   :  { %v3851_v12 = vpop.eup %3850 }
 0x72d   :  { %v5470_v28 = vadd.f32 %v2454_v52, %v2453_v20  ;;  %v3853_v49 = vpop.eup %3852  ;;  %v2452_v61 = vmul.f32 %v3851_v12, %v3849_v45  ;;  %v6862_v52 = vld [vmem:[#allocation174_spill] sm:$0xff]  ;;  %v6869_v20 = vld [vmem:[#allocation97_spill] sm:$0xff] }
 0x72e   :  { %v6870_v45 = vld [vmem:[#allocation178_spill] sm:$0xff] }
 0x72f   :  { %3854 = vtanh.f32 %v5470_v28  ;;  %v5473_v14 = vpack.c.bf16 %v2452_v61, %v2452_v61  ;;  %v6871_v12 = vld [vmem:[#allocation98_spill] sm:$0xff]  ;;  %v6874_v61 = vld [vmem:[#allocation180_spill] sm:$0xff] }
 0x739   :  { %v3855_v50 = vpop.eup %3854 }
 0x73a   :  { %v2457_v59 = vmul.f32 %v3855_v50, %v3853_v49  ;;  %v6872_v49 = vld [vmem:[#allocation179_spill] sm:$0xff] }
 0x73b   :  { %v6873_v50 = vld [vmem:[#allocation99_spill] sm:$0xff] }
 0x73c   :  { %v2459_v35 = vpack.c.bf16 %v2457_v59, %v2457_v59  ;;  %v6875_v59 = vld [vmem:[#allocation100_spill] sm:$0xff] }
 0x73e   :  { %2492 = vmatprep.mubr.bf16.mxu1 %v2459_v35  ;;  %2533 = vmatprep.mubr.bf16.mxu0 %v2459_v35 }
 0x73f   :  { %2493 = vmatmul.mubr.bf16.vlgmr.msra.gmra.mrb[76].mxu1 %v5473_v14  ;;  %2534 = vmatmul.mubr.bf16.vlgmr.msra.gmra.mrb[64].mxu0 %v5473_v14 }
 0x740   :  { %2543 = vmatpush1.bf16.msra.mxu1 %v4729_v33  ;;  %2584 = vmatpush1.bf16.msra.mxu0 %v6455_v23 }
 0x741   :  { %2574 = vmatprep.mubr.bf16.mxu1 %v2459_v35  ;;  %2615 = vmatprep.mubr.bf16.mxu0 %v2459_v35  ;;  %v6876_v35 = vld [vmem:[#allocation181_spill] sm:$0xff] }
 0x742   :  { %2544 = vmatprep.subr.bf16.mxu1 %v4782_v38  ;;  %2585 = vmatprep.subr.bf16.mxu0 %v6456_v55 }
 0x744   :  { %2545 = vmatpush1.bf16.msra.mxu1 %v4788_v48  ;;  %2586 = vmatpush1.bf16.msra.mxu0 %v6457_v62 }
 0x745   :  { %2546 = vmatprep.subr.bf16.mxu1 %v4792_v39  ;;  %2587 = vmatprep.subr.bf16.mxu0 %v6459_v8 }
 0x748   :  { %2547 = vmatpush1.bf16.msra.mxu1 %v6553_v34  ;;  %2588 = vmatpush1.bf16.msra.mxu0 %v6554_v36 }
 0x749   :  { %2548 = vmatprep.subr.bf16.mxu1 %v6555_v31  ;;  %2589 = vmatprep.subr.bf16.mxu0 %v6556_v29 }
 0x74c   :  { %2549 = vmatpush1.bf16.msra.mxu1 %v6557_v37  ;;  %2590 = vmatpush1.bf16.msra.mxu0 %v6558_v16 }
 0x74d   :  { %2550 = vmatprep.subr.bf16.mxu1 %v6559_v19  ;;  %2591 = vmatprep.subr.bf16.mxu0 %v6560_v32 }
 0x750   :  { %2551 = vmatpush1.bf16.msra.mxu1 %v6561_v57  ;;  %2592 = vmatpush1.bf16.msra.mxu0 %v6562_v25 }
 0x751   :  { %2552 = vmatprep.subr.bf16.mxu1 %v6563_v7  ;;  %2593 = vmatprep.subr.bf16.mxu0 %v6564_v0 }
 0x754   :  { %2553 = vmatpush1.bf16.msra.mxu1 %v6565_v3  ;;  %2594 = vmatpush1.bf16.msra.mxu0 %v6473_v60 }
 0x755   :  { %2554 = vmatprep.subr.bf16.mxu1 %v6566_v56  ;;  %2595 = vmatprep.subr.bf16.mxu0 %v6653_v5 }
 0x758   :  { %2555 = vmatpush1.bf16.msra.mxu1 %v6654_v13  ;;  %2596 = vmatpush1.bf16.msra.mxu0 %v6477_v27 }
 0x759   :  { %2556 = vmatprep.subr.bf16.mxu1 %v6569_v2  ;;  %2597 = vmatprep.subr.bf16.mxu0 %v6655_v22 }
 0x75c   :  { %2557 = vmatpush1.bf16.msra.mxu1 %v6656_v6  ;;  %2598 = vmatpush1.bf16.msra.mxu0 %v6657_v54 }
 0x75d   :  { %2558 = vmatprep.subr.bf16.mxu1 %v6571_v18  ;;  %2599 = vmatprep.subr.bf16.mxu0 %v6658_v63 }
 0x760   :  { %2559 = vmatpush1.bf16.msra.mxu1 %v6659_v47  ;;  %2600 = vmatpush1.bf16.msra.mxu0 %v4482_v40 }
 0x761   :  { %2560 = vmatprep.subr.bf16.mxu1 %v6574_v44  ;;  %2601 = vmatprep.subr.bf16.mxu0 %v6660_v26 }
 0x764   :  { %2561 = vmatpush1.bf16.msra.mxu1 %v6661_v53  ;;  %2602 = vmatpush1.bf16.msra.mxu0 %v4494_v51 }
 0x765   :  { %2562 = vmatprep.subr.bf16.mxu1 %v6576_v24  ;;  %2603 = vmatprep.subr.bf16.mxu0 %v6855_v21  ;;  %v6950_v21 = vld [vmem:[#allocation131_spill] sm:$0xff] }
 0x768   :  { %2563 = vmatpush1.bf16.msra.mxu1 %v6856_v4  ;;  %2604 = vmatpush1.bf16.msra.mxu0 %v6857_v1  ;;  %v6949_v4 = vld [vmem:[#allocation103_spill] sm:$0xff] }
 0x769   :  { %2564 = vmatprep.subr.bf16.mxu1 %v6858_v11  ;;  %2605 = vmatprep.subr.bf16.mxu0 %v6859_v15 }
 0x76c   :  { %2565 = vmatpush1.bf16.msra.mxu1 %v6860_v30  ;;  %2606 = vmatpush1.bf16.msra.mxu0 %v6861_v58 }
 0x76d   :  { %2566 = vmatprep.subr.bf16.mxu1 %v6862_v52  ;;  %2607 = vmatprep.subr.bf16.mxu0 %v6863_v41 }
 0x770   :  { %2567 = vmatpush1.bf16.msra.mxu1 %v6864_v43  ;;  %2608 = vmatpush1.bf16.msra.mxu0 %v6865_v42 }
 0x771   :  { %2568 = vmatprep.subr.bf16.mxu1 %v6866_v9  ;;  %2609 = vmatprep.subr.bf16.mxu0 %v6867_v46  ;;  %v6877_v9 = vld [vmem:[#allocation101_spill] sm:$0xff]  ;;  %v6878_v46 = vld [vmem:[#allocation8_spill] sm:$0xff] }
 0x774   :  { %2569 = vmatpush1.bf16.msra.mxu1 %v6868_v17  ;;  %2610 = vmatpush1.bf16.msra.mxu0 %v6869_v20  ;;  %v6879_v17 = vld [vmem:[#allocation25_spill] sm:$0xff] }
 0x775   :  { %2570 = vmatprep.subr.bf16.mxu1 %v6870_v45  ;;  %2611 = vmatprep.subr.bf16.mxu0 %v6871_v12  ;;  %v6880_v12 = vld [vmem:[#allocation9_spill] sm:$0xff]  ;;  %v6889_v45 = vld [vmem:[#allocation39_spill] sm:$0xff] }
 0x778   :  { %2571 = vmatpush1.bf16.msra.mxu1 %v6872_v49  ;;  %2612 = vmatpush1.bf16.msra.mxu0 %v6873_v50  ;;  %v6881_v49 = vld [vmem:[#allocation31_spill] sm:$0xff]  ;;  %v6882_v50 = vld [vmem:[#allocation10_spill] sm:$0xff] }
 0x779   :  { %2572 = vmatprep.subr.bf16.mxu1 %v6874_v61  ;;  %2613 = vmatprep.subr.bf16.mxu0 %v6875_v59  ;;  %v6883_v61 = vld [vmem:[#allocation33_spill] sm:$0xff]  ;;  %v6884_v59 = vld [vmem:[#allocation11_spill] sm:$0xff] }
 0x77c   :  { %2573 = vmatpush1.bf16.msra.mxu1 %v6876_v35  ;;  %2614 = vmatpush1.bf16.msra.mxu0 %v6877_v9  ;;  %v6885_v35 = vld [vmem:[#allocation35_spill] sm:$0xff]  ;;  %v6886_v9 = vld [vmem:[#allocation12_spill] sm:$0xff] }
 0x77d   :  { %2674 = vmatprep.subr.bf16.mxu1 %v6878_v46  ;;  %2715 = vmatprep.subr.bf16.mxu0 %v6879_v17  ;;  %v6887_v46 = vld [vmem:[#allocation37_spill] sm:$0xff] }
 0x77e   :  { %v6888_v17 = vld [vmem:[#allocation13_spill] sm:$0xff] }
 0x77f   :  { %2575 = vmatmul.mubr.bf16.vlgmr.msra.gmra.mrb[80].mxu1 %v5473_v14  ;;  %2616 = vmatmul.mubr.bf16.vlgmr.msra.gmra.mrb[68].mxu0 %v5473_v14  ;;  %v6890_v14 = vld [vmem:[#allocation14_spill] sm:$0xff] }
 0x780   :  { %2675 = vmatpush1.bf16.msra.mxu1 %v6880_v12  ;;  %2716 = vmatpush1.bf16.msra.mxu0 %v6881_v49  ;;  %v6891_v12 = vld [vmem:[#allocation41_spill] sm:$0xff]  ;;  %v6892_v49 = vld [vmem:[#allocation15_spill] sm:$0xff] }
 0x781   :  { %2676 = vmatprep.subr.bf16.mxu1 %v6882_v50  ;;  %2717 = vmatprep.subr.bf16.mxu0 %v6883_v61  ;;  %v6893_v50 = vld [vmem:[#allocation43_spill] sm:$0xff]  ;;  %v6894_v61 = vld [vmem:[#allocation16_spill] sm:$0xff] }
 0x784   :  { %2677 = vmatpush1.bf16.msra.mxu1 %v6884_v59  ;;  %2718 = vmatpush1.bf16.msra.mxu0 %v6885_v35  ;;  %v6895_v59 = vld [vmem:[#allocation45_spill] sm:$0xff] }
 0x785   :  { %2678 = vmatprep.subr.bf16.mxu1 %v6886_v9  ;;  %2719 = vmatprep.subr.bf16.mxu0 %v6887_v46  ;;  %v6896_v35 = vld [vmem:[#allocation17_spill] sm:$0xff]  ;;  %v6897_v9 = vld [vmem:[#allocation47_spill] sm:$0xff]  ;;  %v6898_v46 = vld [vmem:[#allocation18_spill] sm:$0xff] }
 0x788   :  { %2679 = vmatpush1.bf16.msra.mxu1 %v6888_v17  ;;  %2720 = vmatpush1.bf16.msra.mxu0 %v6889_v45  ;;  %v6899_v17 = vld [vmem:[#allocation49_spill] sm:$0xff]  ;;  %v6900_v45 = vld [vmem:[#allocation19_spill] sm:$0xff] }
 0x789   :  { %2680 = vmatprep.subr.bf16.mxu1 %v6890_v14  ;;  %2721 = vmatprep.subr.bf16.mxu0 %v6891_v12  ;;  %v6901_v14 = vld [vmem:[#allocation51_spill] sm:$0xff]  ;;  %v6902_v12 = vld [vmem:[#allocation20_spill] sm:$0xff] }
 0x78c   :  { %2681 = vmatpush1.bf16.msra.mxu1 %v6892_v49  ;;  %2722 = vmatpush1.bf16.msra.mxu0 %v6893_v50  ;;  %v6903_v49 = vld [vmem:[#allocation52_spill] sm:$0xff]  ;;  %v6904_v50 = vld [vmem:[#allocation21_spill] sm:$0xff] }
 0x78d   :  { %2682 = vmatprep.subr.bf16.mxu1 %v6894_v61  ;;  %2723 = vmatprep.subr.bf16.mxu0 %v6895_v59  ;;  %v6905_v61 = vld [vmem:[#allocation54_spill] sm:$0xff] }
 0x78e   :  { %v6906_v59 = vld [vmem:[#allocation22_spill] sm:$0xff] }
 0x790   :  { %2683 = vmatpush1.bf16.msra.mxu1 %v6896_v35  ;;  %2724 = vmatpush1.bf16.msra.mxu0 %v6897_v9  ;;  %v6907_v35 = vld [vmem:[#allocation56_spill] sm:$0xff]  ;;  %v6908_v9 = vld [vmem:[#allocation23_spill] sm:$0xff] }
 0x791   :  { %2684 = vmatprep.subr.bf16.mxu1 %v6898_v46  ;;  %2725 = vmatprep.subr.bf16.mxu0 %v6899_v17  ;;  %v6909_v46 = vld [vmem:[#allocation58_spill] sm:$0xff]  ;;  %v6910_v17 = vld [vmem:[#allocation24_spill] sm:$0xff] }
 0x794   :  { %2685 = vmatpush1.bf16.msra.mxu1 %v6900_v45  ;;  %2726 = vmatpush1.bf16.msra.mxu0 %v6901_v14  ;;  %v6911_v45 = vld [vmem:[#allocation60_spill] sm:$0xff]  ;;  %v6912_v14 = vld [vmem:[#allocation26_spill] sm:$0xff] }
 0x795   :  { %2686 = vmatprep.subr.bf16.mxu1 %v6902_v12  ;;  %2727 = vmatprep.subr.bf16.mxu0 %v6903_v49  ;;  %v6913_v12 = vld [vmem:[#allocation62_spill] sm:$0xff]  ;;  %v6914_v49 = vld [vmem:[#allocation27_spill] sm:$0xff] }
 0x798   :  { %2687 = vmatpush1.bf16.msra.mxu1 %v6904_v50  ;;  %2728 = vmatpush1.bf16.msra.mxu0 %v6905_v61  ;;  %v6915_v50 = vld [vmem:[#allocation64_spill] sm:$0xff] }
 0x799   :  { %2688 = vmatprep.subr.bf16.mxu1 %v6906_v59  ;;  %2729 = vmatprep.subr.bf16.mxu0 %v6907_v35  ;;  %v6916_v61 = vld [vmem:[#allocation28_spill] sm:$0xff]  ;;  %v6917_v59 = vld [vmem:[#allocation66_spill] sm:$0xff]  ;;  %v6918_v35 = vld [vmem:[#allocation29_spill] sm:$0xff] }
 0x79c   :  { %2689 = vmatpush1.bf16.msra.mxu1 %v6908_v9  ;;  %2730 = vmatpush1.bf16.msra.mxu0 %v6909_v46  ;;  %v6919_v9 = vld [vmem:[#allocation68_spill] sm:$0xff]  ;;  %v6920_v46 = vld [vmem:[#allocation30_spill] sm:$0xff] }
 0x79d   :  { %2690 = vmatprep.subr.bf16.mxu1 %v6910_v17  ;;  %2731 = vmatprep.subr.bf16.mxu0 %v6911_v45  ;;  %v6921_v17 = vld [vmem:[#allocation70_spill] sm:$0xff]  ;;  %v6922_v45 = vld [vmem:[#allocation32_spill] sm:$0xff] }
 0x7a0   :  { %2691 = vmatpush1.bf16.msra.mxu1 %v6912_v14  ;;  %2732 = vmatpush1.bf16.msra.mxu0 %v6913_v12  ;;  %v6923_v14 = vld [vmem:[#allocation72_spill] sm:$0xff]  ;;  %v6924_v12 = vld [vmem:[#allocation34_spill] sm:$0xff] }
 0x7a1   :  { %2692 = vmatprep.subr.bf16.mxu1 %v6914_v49  ;;  %2733 = vmatprep.subr.bf16.mxu0 %v6915_v50  ;;  %v6925_v49 = vld [vmem:[#allocation74_spill] sm:$0xff]  ;;  %v6926_v50 = vld [vmem:[#allocation36_spill] sm:$0xff] }
 0x7a4   :  { %2693 = vmatpush1.bf16.msra.mxu1 %v6916_v61  ;;  %2734 = vmatpush1.bf16.msra.mxu0 %v6917_v59  ;;  %v6927_v61 = vld [vmem:[#allocation76_spill] sm:$0xff]  ;;  %v6928_v59 = vld [vmem:[#allocation38_spill] sm:$0xff] }
 0x7a5   :  { %2694 = vmatprep.subr.bf16.mxu1 %v6918_v35  ;;  %2735 = vmatprep.subr.bf16.mxu0 %v6919_v9  ;;  %v6929_v35 = vld [vmem:[#allocation78_spill] sm:$0xff]  ;;  %v6930_v9 = vld [vmem:[#allocation40_spill] sm:$0xff] }
 0x7a8   :  { %2695 = vmatpush1.bf16.msra.mxu1 %v6920_v46  ;;  %2736 = vmatpush1.bf16.msra.mxu0 %v6921_v17  ;;  %v6931_v46 = vld [vmem:[#allocation80_spill] sm:$0xff]  ;;  %v6932_v17 = vld [vmem:[#allocation42_spill] sm:$0xff] }
 0x7a9   :  { %2696 = vmatprep.subr.bf16.mxu1 %v6922_v45  ;;  %2737 = vmatprep.subr.bf16.mxu0 %v6923_v14  ;;  %v6933_v45 = vld [vmem:[#allocation82_spill] sm:$0xff]  ;;  %v6934_v14 = vld [vmem:[#allocation44_spill] sm:$0xff] }
 0x7ac   :  { %2697 = vmatpush1.bf16.msra.mxu1 %v6924_v12  ;;  %2738 = vmatpush1.bf16.msra.mxu0 %v6925_v49  ;;  %v6935_v12 = vld [vmem:[#allocation84_spill] sm:$0xff]  ;;  %v6936_v49 = vld [vmem:[#allocation46_spill] sm:$0xff] }
 0x7ad   :  { %2698 = vmatprep.subr.bf16.mxu1 %v6926_v50  ;;  %2739 = vmatprep.subr.bf16.mxu0 %v6927_v61  ;;  %v6937_v50 = vld [vmem:[#allocation86_spill] sm:$0xff]  ;;  %v6938_v61 = vld [vmem:[#allocation48_spill] sm:$0xff] }
 0x7b0   :  { %2699 = vmatpush1.bf16.msra.mxu1 %v6928_v59  ;;  %2740 = vmatpush1.bf16.msra.mxu0 %v6929_v35  ;;  %v6939_v59 = vld [vmem:[#allocation87_spill] sm:$0xff]  ;;  %v6940_v35 = vld [vmem:[#allocation50_spill] sm:$0xff] }
 0x7b1   :  { %2700 = vmatprep.subr.bf16.mxu1 %v6930_v9  ;;  %2741 = vmatprep.subr.bf16.mxu0 %v6931_v46  ;;  %v6941_v9 = vld [vmem:[#allocation89_spill] sm:$0xff]  ;;  %v6942_v46 = vld [vmem:[#allocation130_spill] sm:$0xff] }
 0x7b4   :  { %2701 = vmatpush1.bf16.msra.mxu1 %v6932_v17  ;;  %2742 = vmatpush1.bf16.msra.mxu0 %v6933_v45  ;;  %v6943_v17 = vld [vmem:[#allocation53_spill] sm:$0xff]  ;;  %v6944_v45 = vld [vmem:[#allocation102_spill] sm:$0xff] }
 0x7b5   :  { %2702 = vmatprep.subr.bf16.mxu1 %v6934_v14  ;;  %2743 = vmatprep.subr.bf16.mxu0 %v6935_v12  ;;  %v6945_v14 = vld [vmem:[#allocation141_spill] sm:$0xff] }
 0x7b6   :  { %v452_v20 = vadd.f32 %v6945_v14, %v6944_v45 }
 0x7b8   :  { %2703 = vmatpush1.bf16.msra.mxu1 %v6936_v49  ;;  %2744 = vmatpush1.bf16.msra.mxu0 %v6937_v50  ;;  %v6946_v49 = vld [vmem:[#allocation111_spill] sm:$0xff]  ;;  %v6947_v50 = vld [vmem:[#allocation140_spill] sm:$0xff] }
 0x7b9   :  { %2704 = vmatprep.subr.bf16.mxu1 %v6938_v61  ;;  %2745 = vmatprep.subr.bf16.mxu0 %v6939_v59  ;;  %v6948_v59 = vld [vmem:[#allocation113_spill] sm:$0xff] }
 0x7bc   :  { %2705 = vmatpush1.bf16.msra.mxu1 %v6940_v35  ;;  %2746 = vmatpush1.bf16.msra.mxu0 %v6941_v9 }
 0x7bd   :  { %2756 = vmatprep.subr.bf16.mxu1 %v6942_v46  ;;  %2797 = vmatprep.subr.bf16.mxu0 %v6943_v17 }
 0x812   :  { %v2494_v12 = vpop.f32.mrb[76].mxu1  ;;  %v2535_v42 = vpop.f32.mrb[64].mxu0 }
 0x813   :  { %v2495_v43 = vadd.f32 %v2494_v12, %v6946_v49  ;;  %v2536_v41 = vadd.f32 %v2535_v42, %v6947_v50  ;;  %v2496_v61 = vpop.f32.mrb[77].mxu1  ;;  %v2537_v52 = vpop.f32.mrb[65].mxu0 }
 0x814   :  { %v2497_v58 = vadd.f32 %v2496_v61, %v6948_v59  ;;  %v2538_v35 = vadd.f32 %v2537_v52, %v452_v20  ;;  %v2498_v30 = vpop.f32.mrb[78].mxu1  ;;  %v2539_v9 = vpop.f32.mrb[66].mxu0  ;;  %v561_v61 = vadd.f32 %v6950_v21, %v6949_v4  ;;  %v6951_v52 = vld [vmem:[#allocation124_spill] sm:$0xff] }
 0x815   :  { %v2499_v15 = vpop.f32.mrb[79].mxu1  ;;  %v2540_v46 = vpop.f32.mrb[67].mxu0  ;;  %v3561_v11 = vmul.f32 -1.442695, %v2495_v43  ;;  %v6952_v30 = vld [vmem:[#allocation134_spill] sm:$0xff] }
 0x816   :  { %v3562_v17 = vmul.f32 -1.442695, %v2497_v58  ;;  %v3564_v1 = vmul.f32 -1.442695, %v2538_v35  ;;  %v563_v9 = vadd.f32 %v6952_v30, %v6951_v52  ;;  %v6953_v15 = vld [vmem:[#allocation104_spill] sm:$0xff] }
 0x817   :  { %3856 = vpow2.f32 %v3561_v11  ;;  %v6954_v46 = vld [vmem:[#allocation156_spill] sm:$0xff] }
 0x818   :  { %3858 = vpow2.f32 %v3562_v17  ;;  %v675_v43 = vadd.f32 %v6954_v46, %v6953_v15  ;;  %v6955_v17 = vld [vmem:[#allocation155_spill] sm:$0xff]  ;;  %v3563_v46 = vmul.f32 -1.442695, %v2536_v41 }
 0x819   :  { %3860 = vpow2.f32 %v3564_v1 }
 0x821   :  { %v3857_v14 = vpop.eup %3856 }
 0x822   :  { %v3859_v45 = vpop.eup %3858  ;;  %v2642_v49 = vadd.f32 1.0, %v3857_v14 }
 0x823   :  { %v3861_v12 = vpop.eup %3860  ;;  %v2643_v42 = vadd.f32 1.0, %v3859_v45 }
 0x824   :  { %v2645_v50 = vadd.f32 1.0, %v3861_v12  ;;  %3862 = vrcp.f32 %v2642_v49 }
 0x825   :  { %3864 = vrcp.f32 %v2643_v42 }
 0x826   :  { %3866 = vrcp.f32 %v2645_v50 }
 0x82e   :  { %v3863_v49 = vpop.eup %3862 }
 0x82f   :  { %v3865_v15 = vpop.eup %3864 }
 0x830   :  { %v2662_v50 = vmul.f32 %v3865_v15, %v5466_v10 }
 0x852   :  { %v2576_v58 = vpop.f32.mrb[80].mxu1  ;;  %v2617_v11 = vpop.f32.mrb[68].mxu0 }
 0x853   :  { %v2577_v1 = vadd.f32 %v2576_v58, %v561_v61  ;;  %v2618_v20 = vadd.f32 %v2617_v11, %v6955_v17  ;;  %v2578_v59 = vpop.f32.mrb[81].mxu1  ;;  %v2619_v35 = vpop.f32.mrb[69].mxu0 }
 0x854   :  { %v2579_v45 = vadd.f32 %v2578_v59, %v563_v9  ;;  %v2620_v14 = vadd.f32 %v2619_v35, %v675_v43  ;;  %v2580_v12 = vpop.f32.mrb[82].mxu1  ;;  %v2621_v21 = vpop.f32.mrb[70].mxu0 }
 0x855   :  { %v3565_v4 = vmul.f32 -1.442695, %v2577_v1  ;;  %3868 = vtanh.f32 %v2618_v20  ;;  %v2581_v30 = vpop.f32.mrb[83].mxu1  ;;  %v2622_v52 = vpop.f32.mrb[71].mxu0 }
 0x856   :  { %3870 = vtanh.f32 %v2620_v14  ;;  %v3566_v42 = vmul.f32 -1.442695, %v2579_v45  ;;  %v3867_v61 = vpop.eup %3866 }
 0x857   :  { %3872 = vpow2.f32 %v3565_v4 }
 0x858   :  { %3874 = vpow2.f32 %v3563_v46 }
 0x859   :  { %3876 = vpow2.f32 %v3566_v42 }
 0x85f   :  { %v3869_v58 = vpop.eup %3868 }
 0x860   :  { %v3871_v11 = vpop.eup %3870  ;;  %v2663_v9 = vmul.f32 %v3869_v58, %v3863_v49  ;;  %v6958_v58 = vld [vmem:[#allocation91_spill] sm:$0xff] }
 0x861   :  { %v3873_v43 = vpop.eup %3872  ;;  %v2668_v17 = vmul.f32 %v3871_v11, %v3867_v61  ;;  %v6957_v61 = vld [vmem:[#allocation171_spill] sm:$0xff]  ;;  %v6959_v11 = vld [vmem:[#allocation172_spill] sm:$0xff] }
 0x862   :  { %v2646_v1 = vadd.f32 1.0, %v3873_v43  ;;  %v5620_v20 = vadd.f32 %v2663_v9, %v2662_v50  ;;  %v3875_v52 = vpop.eup %3874  ;;  %v6960_v50 = vld [vmem:[#allocation92_spill] sm:$0xff]  ;;  %v6961_v9 = vld [vmem:[#allocation173_spill] sm:$0xff] }
 0x863   :  { %v3877_v4 = vpop.eup %3876  ;;  %v2644_v59 = vadd.f32 1.0, %v3875_v52  ;;  %v6962_v43 = vld [vmem:[#allocation93_spill] sm:$0xff]  ;;  %v6965_v52 = vld [vmem:[#allocation175_spill] sm:$0xff] }
 0x864   :  { %3878 = vrcp.f32 %v2646_v1  ;;  %v2647_v35 = vadd.f32 1.0, %v3877_v4  ;;  %v6964_v1 = vld [vmem:[#allocation94_spill] sm:$0xff]  ;;  %v6966_v4 = vld [vmem:[#allocation95_spill] sm:$0xff] }
 0x865   :  { %3880 = vtanh.f32 %v5620_v20 }
 0x866   :  { %3882 = vrcp.f32 %v2644_v59  ;;  %v6967_v59 = vld [vmem:[#allocation176_spill] sm:$0xff] }
 0x867   :  { %3884 = vrcp.f32 %v2647_v35  ;;  %v6969_v35 = vld [vmem:[#allocation177_spill] sm:$0xff] }
 0x86e   :  { %v3879_v41 = vpop.eup %3878 }
 0x86f   :  { %v2667_v45 = vmul.f32 %v3879_v41, %v5470_v28  ;;  %v3881_v10 = vpop.eup %3880  ;;  %v6956_v28 = vld [vmem:[#allocation90_spill] sm:$0xff]  ;;  %v6968_v41 = vld [vmem:[#allocation96_spill] sm:$0xff] }
 0x870   :  { %v3883_v15 = vpop.eup %3882 }
 0x871   :  { %v5624_v14 = vadd.f32 %v2668_v17, %v2667_v45  ;;  %v3885_v12 = vpop.eup %3884  ;;  %v2666_v30 = vmul.f32 %v3883_v15, %v3881_v10  ;;  %v6963_v17 = vld [vmem:[#allocation174_spill] sm:$0xff]  ;;  %v6970_v45 = vld [vmem:[#allocation97_spill] sm:$0xff] }
 0x872   :  { %v6971_v10 = vld [vmem:[#allocation178_spill] sm:$0xff] }
 0x873   :  { %3886 = vtanh.f32 %v5624_v14  ;;  %v5627_v42 = vpack.c.bf16 %v2666_v30, %v2666_v30  ;;  %v6972_v15 = vld [vmem:[#allocation98_spill] sm:$0xff]  ;;  %v6975_v30 = vld [vmem:[#allocation180_spill] sm:$0xff] }
 0x87d   :  { %v3887_v21 = vpop.eup %3886 }
 0x87e   :  { %v2671_v49 = vmul.f32 %v3887_v21, %v3885_v12  ;;  %v6973_v12 = vld [vmem:[#allocation179_spill] sm:$0xff] }
 0x87f   :  { %v6974_v21 = vld [vmem:[#allocation99_spill] sm:$0xff] }
 0x880   :  { %v2673_v46 = vpack.c.bf16 %v2671_v49, %v2671_v49  ;;  %v6976_v49 = vld [vmem:[#allocation100_spill] sm:$0xff] }
 0x882   :  { %2706 = vmatprep.mubr.bf16.mxu1 %v2673_v46  ;;  %2747 = vmatprep.mubr.bf16.mxu0 %v2673_v46 }
 0x883   :  { %2707 = vmatmul.mubr.bf16.vlgmr.msra.gmra.mrb[84].mxu1 %v5627_v42  ;;  %2748 = vmatmul.mubr.bf16.vlgmr.msra.gmra.mrb[72].mxu0 %v5627_v42 }
 0x884   :  { %2757 = vmatpush1.bf16.msra.mxu1 %v4729_v33  ;;  %2798 = vmatpush1.bf16.msra.mxu0 %v6455_v23 }
 0x885   :  { %2788 = vmatprep.mubr.bf16.mxu1 %v2673_v46  ;;  %2829 = vmatprep.mubr.bf16.mxu0 %v2673_v46  ;;  %v6977_v46 = vld [vmem:[#allocation181_spill] sm:$0xff] }
 0x886   :  { %2758 = vmatprep.subr.bf16.mxu1 %v4782_v38  ;;  %2799 = vmatprep.subr.bf16.mxu0 %v6456_v55 }
 0x888   :  { %2759 = vmatpush1.bf16.msra.mxu1 %v4788_v48  ;;  %2800 = vmatpush1.bf16.msra.mxu0 %v6457_v62 }
 0x889   :  { %2760 = vmatprep.subr.bf16.mxu1 %v4792_v39  ;;  %2801 = vmatprep.subr.bf16.mxu0 %v6459_v8 }
 0x88c   :  { %2761 = vmatpush1.bf16.msra.mxu1 %v6553_v34  ;;  %2802 = vmatpush1.bf16.msra.mxu0 %v6554_v36 }
 0x88d   :  { %2762 = vmatprep.subr.bf16.mxu1 %v6555_v31  ;;  %2803 = vmatprep.subr.bf16.mxu0 %v6556_v29 }
 0x890   :  { %2763 = vmatpush1.bf16.msra.mxu1 %v6557_v37  ;;  %2804 = vmatpush1.bf16.msra.mxu0 %v6558_v16 }
 0x891   :  { %2764 = vmatprep.subr.bf16.mxu1 %v6559_v19  ;;  %2805 = vmatprep.subr.bf16.mxu0 %v6560_v32 }
 0x894   :  { %2765 = vmatpush1.bf16.msra.mxu1 %v6561_v57  ;;  %2806 = vmatpush1.bf16.msra.mxu0 %v6562_v25 }
 0x895   :  { %2766 = vmatprep.subr.bf16.mxu1 %v6563_v7  ;;  %2807 = vmatprep.subr.bf16.mxu0 %v6564_v0 }
 0x898   :  { %2767 = vmatpush1.bf16.msra.mxu1 %v6565_v3  ;;  %2808 = vmatpush1.bf16.msra.mxu0 %v6473_v60 }
 0x899   :  { %2768 = vmatprep.subr.bf16.mxu1 %v6566_v56  ;;  %2809 = vmatprep.subr.bf16.mxu0 %v6653_v5 }
 0x89c   :  { %2769 = vmatpush1.bf16.msra.mxu1 %v6654_v13  ;;  %2810 = vmatpush1.bf16.msra.mxu0 %v6477_v27 }
 0x89d   :  { %2770 = vmatprep.subr.bf16.mxu1 %v6569_v2  ;;  %2811 = vmatprep.subr.bf16.mxu0 %v6655_v22 }
 0x8a0   :  { %2771 = vmatpush1.bf16.msra.mxu1 %v6656_v6  ;;  %2812 = vmatpush1.bf16.msra.mxu0 %v6657_v54 }
 0x8a1   :  { %2772 = vmatprep.subr.bf16.mxu1 %v6571_v18  ;;  %2813 = vmatprep.subr.bf16.mxu0 %v6658_v63 }
 0x8a4   :  { %2773 = vmatpush1.bf16.msra.mxu1 %v6659_v47  ;;  %2814 = vmatpush1.bf16.msra.mxu0 %v4482_v40 }
 0x8a5   :  { %2774 = vmatprep.subr.bf16.mxu1 %v6574_v44  ;;  %2815 = vmatprep.subr.bf16.mxu0 %v6660_v26 }
 0x8a8   :  { %2775 = vmatpush1.bf16.msra.mxu1 %v6661_v53  ;;  %2816 = vmatpush1.bf16.msra.mxu0 %v4494_v51 }
 0x8a9   :  { %2776 = vmatprep.subr.bf16.mxu1 %v6576_v24  ;;  %2817 = vmatprep.subr.bf16.mxu0 %v6956_v28  ;;  %v7051_v28 = vld [vmem:[#allocation135_spill] sm:$0xff] }
 0x8ac   :  { %2777 = vmatpush1.bf16.msra.mxu1 %v6957_v61  ;;  %2818 = vmatpush1.bf16.msra.mxu0 %v6958_v58  ;;  %v7050_v61 = vld [vmem:[#allocation103_spill] sm:$0xff] }
 0x8ad   :  { %2778 = vmatprep.subr.bf16.mxu1 %v6959_v11  ;;  %2819 = vmatprep.subr.bf16.mxu0 %v6960_v50 }
 0x8b0   :  { %2779 = vmatpush1.bf16.msra.mxu1 %v6961_v9  ;;  %2820 = vmatpush1.bf16.msra.mxu0 %v6962_v43 }
 0x8b1   :  { %2780 = vmatprep.subr.bf16.mxu1 %v6963_v17  ;;  %2821 = vmatprep.subr.bf16.mxu0 %v6964_v1 }
 0x8b4   :  { %2781 = vmatpush1.bf16.msra.mxu1 %v6965_v52  ;;  %2822 = vmatpush1.bf16.msra.mxu0 %v6966_v4 }
 0x8b5   :  { %2782 = vmatprep.subr.bf16.mxu1 %v6967_v59  ;;  %2823 = vmatprep.subr.bf16.mxu0 %v6968_v41  ;;  %v6978_v59 = vld [vmem:[#allocation101_spill] sm:$0xff]  ;;  %v6979_v41 = vld [vmem:[#allocation8_spill] sm:$0xff] }
 0x8b8   :  { %2783 = vmatpush1.bf16.msra.mxu1 %v6969_v35  ;;  %2824 = vmatpush1.bf16.msra.mxu0 %v6970_v45  ;;  %v6980_v35 = vld [vmem:[#allocation25_spill] sm:$0xff] }
 0x8b9   :  { %2784 = vmatprep.subr.bf16.mxu1 %v6971_v10  ;;  %2825 = vmatprep.subr.bf16.mxu0 %v6972_v15  ;;  %v6981_v15 = vld [vmem:[#allocation9_spill] sm:$0xff]  ;;  %v6990_v10 = vld [vmem:[#allocation39_spill] sm:$0xff] }
 0x8bc   :  { %2785 = vmatpush1.bf16.msra.mxu1 %v6973_v12  ;;  %2826 = vmatpush1.bf16.msra.mxu0 %v6974_v21  ;;  %v6982_v12 = vld [vmem:[#allocation31_spill] sm:$0xff]  ;;  %v6983_v21 = vld [vmem:[#allocation10_spill] sm:$0xff] }
 0x8bd   :  { %2786 = vmatprep.subr.bf16.mxu1 %v6975_v30  ;;  %2827 = vmatprep.subr.bf16.mxu0 %v6976_v49  ;;  %v6984_v30 = vld [vmem:[#allocation33_spill] sm:$0xff]  ;;  %v6985_v49 = vld [vmem:[#allocation11_spill] sm:$0xff] }
 0x8c0   :  { %2787 = vmatpush1.bf16.msra.mxu1 %v6977_v46  ;;  %2828 = vmatpush1.bf16.msra.mxu0 %v6978_v59  ;;  %v6986_v46 = vld [vmem:[#allocation35_spill] sm:$0xff]  ;;  %v6987_v59 = vld [vmem:[#allocation12_spill] sm:$0xff] }
 0x8c1   :  { %2888 = vmatprep.subr.bf16.mxu1 %v6979_v41  ;;  %2929 = vmatprep.subr.bf16.mxu0 %v6980_v35  ;;  %v6988_v41 = vld [vmem:[#allocation37_spill] sm:$0xff] }
 0x8c2   :  { %v6989_v35 = vld [vmem:[#allocation13_spill] sm:$0xff] }
 0x8c3   :  { %2789 = vmatmul.mubr.bf16.vlgmr.msra.gmra.mrb[88].mxu1 %v5627_v42  ;;  %2830 = vmatmul.mubr.bf16.vlgmr.msra.gmra.mrb[76].mxu0 %v5627_v42  ;;  %v6991_v42 = vld [vmem:[#allocation14_spill] sm:$0xff] }
 0x8c4   :  { %2889 = vmatpush1.bf16.msra.mxu1 %v6981_v15  ;;  %2930 = vmatpush1.bf16.msra.mxu0 %v6982_v12  ;;  %v6992_v15 = vld [vmem:[#allocation41_spill] sm:$0xff]  ;;  %v6993_v12 = vld [vmem:[#allocation15_spill] sm:$0xff] }
 0x8c5   :  { %2890 = vmatprep.subr.bf16.mxu1 %v6983_v21  ;;  %2931 = vmatprep.subr.bf16.mxu0 %v6984_v30  ;;  %v6994_v21 = vld [vmem:[#allocation43_spill] sm:$0xff]  ;;  %v6995_v30 = vld [vmem:[#allocation16_spill] sm:$0xff] }
 0x8c8   :  { %2891 = vmatpush1.bf16.msra.mxu1 %v6985_v49  ;;  %2932 = vmatpush1.bf16.msra.mxu0 %v6986_v46  ;;  %v6996_v49 = vld [vmem:[#allocation45_spill] sm:$0xff] }
 0x8c9   :  { %2892 = vmatprep.subr.bf16.mxu1 %v6987_v59  ;;  %2933 = vmatprep.subr.bf16.mxu0 %v6988_v41  ;;  %v6997_v46 = vld [vmem:[#allocation17_spill] sm:$0xff]  ;;  %v6998_v59 = vld [vmem:[#allocation47_spill] sm:$0xff]  ;;  %v6999_v41 = vld [vmem:[#allocation18_spill] sm:$0xff] }
 0x8cc   :  { %2893 = vmatpush1.bf16.msra.mxu1 %v6989_v35  ;;  %2934 = vmatpush1.bf16.msra.mxu0 %v6990_v10  ;;  %v7000_v35 = vld [vmem:[#allocation49_spill] sm:$0xff]  ;;  %v7001_v10 = vld [vmem:[#allocation19_spill] sm:$0xff] }
 0x8cd   :  { %2894 = vmatprep.subr.bf16.mxu1 %v6991_v42  ;;  %2935 = vmatprep.subr.bf16.mxu0 %v6992_v15  ;;  %v7002_v42 = vld [vmem:[#allocation51_spill] sm:$0xff]  ;;  %v7003_v15 = vld [vmem:[#allocation20_spill] sm:$0xff] }
 0x8d0   :  { %2895 = vmatpush1.bf16.msra.mxu1 %v6993_v12  ;;  %2936 = vmatpush1.bf16.msra.mxu0 %v6994_v21  ;;  %v7004_v12 = vld [vmem:[#allocation52_spill] sm:$0xff]  ;;  %v7005_v21 = vld [vmem:[#allocation21_spill] sm:$0xff] }
 0x8d1   :  { %2896 = vmatprep.subr.bf16.mxu1 %v6995_v30  ;;  %2937 = vmatprep.subr.bf16.mxu0 %v6996_v49  ;;  %v7006_v30 = vld [vmem:[#allocation54_spill] sm:$0xff] }
 0x8d2   :  { %v7007_v49 = vld [vmem:[#allocation22_spill] sm:$0xff] }
 0x8d4   :  { %2897 = vmatpush1.bf16.msra.mxu1 %v6997_v46  ;;  %2938 = vmatpush1.bf16.msra.mxu0 %v6998_v59  ;;  %v7008_v46 = vld [vmem:[#allocation56_spill] sm:$0xff]  ;;  %v7009_v59 = vld [vmem:[#allocation23_spill] sm:$0xff] }
 0x8d5   :  { %2898 = vmatprep.subr.bf16.mxu1 %v6999_v41  ;;  %2939 = vmatprep.subr.bf16.mxu0 %v7000_v35  ;;  %v7010_v41 = vld [vmem:[#allocation58_spill] sm:$0xff]  ;;  %v7011_v35 = vld [vmem:[#allocation24_spill] sm:$0xff] }
 0x8d8   :  { %2899 = vmatpush1.bf16.msra.mxu1 %v7001_v10  ;;  %2940 = vmatpush1.bf16.msra.mxu0 %v7002_v42  ;;  %v7012_v10 = vld [vmem:[#allocation60_spill] sm:$0xff]  ;;  %v7013_v42 = vld [vmem:[#allocation26_spill] sm:$0xff] }
 0x8d9   :  { %2900 = vmatprep.subr.bf16.mxu1 %v7003_v15  ;;  %2941 = vmatprep.subr.bf16.mxu0 %v7004_v12  ;;  %v7014_v15 = vld [vmem:[#allocation62_spill] sm:$0xff]  ;;  %v7015_v12 = vld [vmem:[#allocation27_spill] sm:$0xff] }
 0x8dc   :  { %2901 = vmatpush1.bf16.msra.mxu1 %v7005_v21  ;;  %2942 = vmatpush1.bf16.msra.mxu0 %v7006_v30  ;;  %v7016_v21 = vld [vmem:[#allocation64_spill] sm:$0xff] }
 0x8dd   :  { %2902 = vmatprep.subr.bf16.mxu1 %v7007_v49  ;;  %2943 = vmatprep.subr.bf16.mxu0 %v7008_v46  ;;  %v7017_v30 = vld [vmem:[#allocation28_spill] sm:$0xff]  ;;  %v7018_v49 = vld [vmem:[#allocation66_spill] sm:$0xff]  ;;  %v7019_v46 = vld [vmem:[#allocation29_spill] sm:$0xff] }
 0x8e0   :  { %2903 = vmatpush1.bf16.msra.mxu1 %v7009_v59  ;;  %2944 = vmatpush1.bf16.msra.mxu0 %v7010_v41  ;;  %v7020_v59 = vld [vmem:[#allocation68_spill] sm:$0xff]  ;;  %v7021_v41 = vld [vmem:[#allocation30_spill] sm:$0xff] }
 0x8e1   :  { %2904 = vmatprep.subr.bf16.mxu1 %v7011_v35  ;;  %2945 = vmatprep.subr.bf16.mxu0 %v7012_v10  ;;  %v7022_v35 = vld [vmem:[#allocation70_spill] sm:$0xff]  ;;  %v7023_v10 = vld [vmem:[#allocation32_spill] sm:$0xff] }
 0x8e4   :  { %2905 = vmatpush1.bf16.msra.mxu1 %v7013_v42  ;;  %2946 = vmatpush1.bf16.msra.mxu0 %v7014_v15  ;;  %v7024_v42 = vld [vmem:[#allocation72_spill] sm:$0xff]  ;;  %v7025_v15 = vld [vmem:[#allocation34_spill] sm:$0xff] }
 0x8e5   :  { %2906 = vmatprep.subr.bf16.mxu1 %v7015_v12  ;;  %2947 = vmatprep.subr.bf16.mxu0 %v7016_v21  ;;  %v7026_v12 = vld [vmem:[#allocation74_spill] sm:$0xff]  ;;  %v7027_v21 = vld [vmem:[#allocation36_spill] sm:$0xff] }
 0x8e8   :  { %2907 = vmatpush1.bf16.msra.mxu1 %v7017_v30  ;;  %2948 = vmatpush1.bf16.msra.mxu0 %v7018_v49  ;;  %v7028_v30 = vld [vmem:[#allocation76_spill] sm:$0xff]  ;;  %v7029_v49 = vld [vmem:[#allocation38_spill] sm:$0xff] }
 0x8e9   :  { %2908 = vmatprep.subr.bf16.mxu1 %v7019_v46  ;;  %2949 = vmatprep.subr.bf16.mxu0 %v7020_v59  ;;  %v7030_v46 = vld [vmem:[#allocation78_spill] sm:$0xff]  ;;  %v7031_v59 = vld [vmem:[#allocation40_spill] sm:$0xff] }
 0x8ec   :  { %2909 = vmatpush1.bf16.msra.mxu1 %v7021_v41  ;;  %2950 = vmatpush1.bf16.msra.mxu0 %v7022_v35  ;;  %v7032_v41 = vld [vmem:[#allocation80_spill] sm:$0xff]  ;;  %v7033_v35 = vld [vmem:[#allocation42_spill] sm:$0xff] }
 0x8ed   :  { %2910 = vmatprep.subr.bf16.mxu1 %v7023_v10  ;;  %2951 = vmatprep.subr.bf16.mxu0 %v7024_v42  ;;  %v7034_v10 = vld [vmem:[#allocation82_spill] sm:$0xff]  ;;  %v7035_v42 = vld [vmem:[#allocation44_spill] sm:$0xff] }
 0x8f0   :  { %2911 = vmatpush1.bf16.msra.mxu1 %v7025_v15  ;;  %2952 = vmatpush1.bf16.msra.mxu0 %v7026_v12  ;;  %v7036_v15 = vld [vmem:[#allocation84_spill] sm:$0xff]  ;;  %v7037_v12 = vld [vmem:[#allocation46_spill] sm:$0xff] }
 0x8f1   :  { %2912 = vmatprep.subr.bf16.mxu1 %v7027_v21  ;;  %2953 = vmatprep.subr.bf16.mxu0 %v7028_v30  ;;  %v7038_v21 = vld [vmem:[#allocation86_spill] sm:$0xff]  ;;  %v7039_v30 = vld [vmem:[#allocation48_spill] sm:$0xff] }
 0x8f4   :  { %2913 = vmatpush1.bf16.msra.mxu1 %v7029_v49  ;;  %2954 = vmatpush1.bf16.msra.mxu0 %v7030_v46  ;;  %v7040_v49 = vld [vmem:[#allocation87_spill] sm:$0xff]  ;;  %v7041_v46 = vld [vmem:[#allocation50_spill] sm:$0xff] }
 0x8f5   :  { %2914 = vmatprep.subr.bf16.mxu1 %v7031_v59  ;;  %2955 = vmatprep.subr.bf16.mxu0 %v7032_v41  ;;  %v7042_v59 = vld [vmem:[#allocation89_spill] sm:$0xff]  ;;  %v7043_v41 = vld [vmem:[#allocation130_spill] sm:$0xff] }
 0x8f8   :  { %2915 = vmatpush1.bf16.msra.mxu1 %v7033_v35  ;;  %2956 = vmatpush1.bf16.msra.mxu0 %v7034_v10  ;;  %v7044_v35 = vld [vmem:[#allocation53_spill] sm:$0xff]  ;;  %v7045_v10 = vld [vmem:[#allocation102_spill] sm:$0xff] }
 0x8f9   :  { %2916 = vmatprep.subr.bf16.mxu1 %v7035_v42  ;;  %2957 = vmatprep.subr.bf16.mxu0 %v7036_v15  ;;  %v7046_v42 = vld [vmem:[#allocation144_spill] sm:$0xff] }
 0x8fa   :  { %v458_v45 = vadd.f32 %v7046_v42, %v7045_v10 }
 0x8fc   :  { %2917 = vmatpush1.bf16.msra.mxu1 %v7037_v12  ;;  %2958 = vmatpush1.bf16.msra.mxu0 %v7038_v21  ;;  %v7047_v12 = vld [vmem:[#allocation114_spill] sm:$0xff]  ;;  %v7048_v21 = vld [vmem:[#allocation143_spill] sm:$0xff] }
 0x8fd   :  { %2918 = vmatprep.subr.bf16.mxu1 %v7039_v30  ;;  %2959 = vmatprep.subr.bf16.mxu0 %v7040_v49  ;;  %v7049_v49 = vld [vmem:[#allocation115_spill] sm:$0xff] }
 0x900   :  { %2919 = vmatpush1.bf16.msra.mxu1 %v7041_v46  ;;  %2960 = vmatpush1.bf16.msra.mxu0 %v7042_v59 }
 0x901   :  { %2970 = vmatprep.subr.bf16.mxu1 %v7043_v41  ;;  %3011 = vmatprep.subr.bf16.mxu0 %v7044_v35 }
 0x956   :  { %v2708_v15 = vpop.f32.mrb[84].mxu1  ;;  %v2749_v4 = vpop.f32.mrb[72].mxu0 }
 0x957   :  { %v2709_v52 = vadd.f32 %v2708_v15, %v7047_v12  ;;  %v2750_v1 = vadd.f32 %v2749_v4, %v7048_v21  ;;  %v2710_v30 = vpop.f32.mrb[85].mxu1  ;;  %v2751_v17 = vpop.f32.mrb[73].mxu0 }
 0x958   :  { %v2711_v43 = vadd.f32 %v2710_v30, %v7049_v49  ;;  %v2752_v46 = vadd.f32 %v2751_v17, %v458_v45  ;;  %v2712_v9 = vpop.f32.mrb[86].mxu1  ;;  %v2753_v59 = vpop.f32.mrb[74].mxu0  ;;  %v567_v49 = vadd.f32 %v7051_v28, %v7050_v61  ;;  %v7052_v17 = vld [vmem:[#allocation124_spill] sm:$0xff] }
 0x959   :  { %v2713_v50 = vpop.f32.mrb[87].mxu1  ;;  %v2754_v41 = vpop.f32.mrb[75].mxu0  ;;  %v3567_v11 = vmul.f32 -1.442695, %v2709_v52  ;;  %v7053_v9 = vld [vmem:[#allocation138_spill] sm:$0xff]  ;;  %v7056_v59 = vld [vmem:[#allocation157_spill] sm:$0xff] }
 0x95a   :  { %v3568_v35 = vmul.f32 -1.442695, %v2711_v43  ;;  %v3570_v58 = vmul.f32 -1.442695, %v2752_v46  ;;  %v569_v45 = vadd.f32 %v7053_v9, %v7052_v17  ;;  %v7054_v50 = vld [vmem:[#allocation104_spill] sm:$0xff]  ;;  %v7055_v41 = vld [vmem:[#allocation158_spill] sm:$0xff] }
 0x95b   :  { %3888 = vpow2.f32 %v3567_v11  ;;  %v681_v52 = vadd.f32 %v7055_v41, %v7054_v50  ;;  %v3569_v41 = vmul.f32 -1.442695, %v2750_v1 }
 0x95c   :  { %3890 = vpow2.f32 %v3568_v35 }
 0x95d   :  { %3892 = vpow2.f32 %v3570_v58 }
 0x965   :  { %v3889_v42 = vpop.eup %3888 }
 0x966   :  { %v3891_v10 = vpop.eup %3890  ;;  %v2856_v12 = vadd.f32 1.0, %v3889_v42 }
 0x967   :  { %v3893_v15 = vpop.eup %3892  ;;  %v2857_v4 = vadd.f32 1.0, %v3891_v10 }
 0x968   :  { %v2859_v21 = vadd.f32 1.0, %v3893_v15  ;;  %3894 = vrcp.f32 %v2856_v12 }
 0x969   :  { %3896 = vrcp.f32 %v2857_v4 }
 0x96a   :  { %3898 = vrcp.f32 %v2859_v21 }
 0x972   :  { %v3895_v12 = vpop.eup %3894 }
 0x973   :  { %v3897_v50 = vpop.eup %3896 }
 0x974   :  { %v2876_v21 = vmul.f32 %v3897_v50, %v5620_v20 }
 0x996   :  { %v2790_v43 = vpop.f32.mrb[88].mxu1  ;;  %v2831_v11 = vpop.f32.mrb[76].mxu0 }
 0x997   :  { %v2791_v58 = vadd.f32 %v2790_v43, %v567_v49  ;;  %v2832_v35 = vadd.f32 %v2831_v11, %v7056_v59  ;;  %v2792_v30 = vpop.f32.mrb[89].mxu1  ;;  %v2833_v46 = vpop.f32.mrb[77].mxu0 }
 0x998   :  { %v2793_v10 = vadd.f32 %v2792_v30, %v569_v45  ;;  %v2834_v42 = vadd.f32 %v2833_v46, %v681_v52  ;;  %v2794_v15 = vpop.f32.mrb[90].mxu1  ;;  %v2835_v28 = vpop.f32.mrb[78].mxu0 }
 0x999   :  { %v3571_v61 = vmul.f32 -1.442695, %v2791_v58  ;;  %3900 = vtanh.f32 %v2832_v35  ;;  %v2795_v9 = vpop.f32.mrb[91].mxu1  ;;  %v2836_v17 = vpop.f32.mrb[79].mxu0 }
 0x99a   :  { %3902 = vtanh.f32 %v2834_v42  ;;  %v3572_v4 = vmul.f32 -1.442695, %v2793_v10  ;;  %v3899_v49 = vpop.eup %3898 }
 0x99b   :  { %3904 = vpow2.f32 %v3571_v61 }
 0x99c   :  { %3906 = vpow2.f32 %v3569_v41 }
 0x99d   :  { %3908 = vpow2.f32 %v3572_v4 }
 0x9a3   :  { %v3901_v43 = vpop.eup %3900 }
 0x9a4   :  { %v3903_v11 = vpop.eup %3902  ;;  %v2877_v45 = vmul.f32 %v3901_v43, %v3895_v12  ;;  %v7059_v43 = vld [vmem:[#allocation91_spill] sm:$0xff] }
 0x9a5   :  { %v3905_v52 = vpop.eup %3904  ;;  %v2882_v59 = vmul.f32 %v3903_v11, %v3899_v49  ;;  %v7058_v49 = vld [vmem:[#allocation171_spill] sm:$0xff]  ;;  %v7060_v11 = vld [vmem:[#allocation172_spill] sm:$0xff] }
 0x9a6   :  { %v2860_v58 = vadd.f32 1.0, %v3905_v52  ;;  %v5774_v35 = vadd.f32 %v2877_v45, %v2876_v21  ;;  %v3907_v17 = vpop.eup %3906  ;;  %v7061_v21 = vld [vmem:[#allocation92_spill] sm:$0xff]  ;;  %v7062_v45 = vld [vmem:[#allocation173_spill] sm:$0xff] }
 0x9a7   :  { %v3909_v61 = vpop.eup %3908  ;;  %v2858_v30 = vadd.f32 1.0, %v3907_v17  ;;  %v7063_v52 = vld [vmem:[#allocation93_spill] sm:$0xff]  ;;  %v7066_v17 = vld [vmem:[#allocation175_spill] sm:$0xff] }
 0x9a8   :  { %3910 = vrcp.f32 %v2860_v58  ;;  %v2861_v46 = vadd.f32 1.0, %v3909_v61  ;;  %v7065_v58 = vld [vmem:[#allocation94_spill] sm:$0xff]  ;;  %v7067_v61 = vld [vmem:[#allocation95_spill] sm:$0xff] }
 0x9a9   :  { %3912 = vtanh.f32 %v5774_v35 }
 0x9aa   :  { %3914 = vrcp.f32 %v2858_v30  ;;  %v7068_v30 = vld [vmem:[#allocation176_spill] sm:$0xff] }
 0x9ab   :  { %3916 = vrcp.f32 %v2861_v46  ;;  %v7070_v46 = vld [vmem:[#allocation177_spill] sm:$0xff] }
 0x9b2   :  { %v3911_v1 = vpop.eup %3910 }
 0x9b3   :  { %v2881_v10 = vmul.f32 %v3911_v1, %v5624_v14  ;;  %v3913_v20 = vpop.eup %3912  ;;  %v7057_v14 = vld [vmem:[#allocation90_spill] sm:$0xff]  ;;  %v7069_v1 = vld [vmem:[#allocation96_spill] sm:$0xff] }
 0x9b4   :  { %v3915_v50 = vpop.eup %3914 }
 0x9b5   :  { %v5778_v42 = vadd.f32 %v2882_v59, %v2881_v10  ;;  %v3917_v15 = vpop.eup %3916  ;;  %v2880_v9 = vmul.f32 %v3915_v50, %v3913_v20  ;;  %v7064_v59 = vld [vmem:[#allocation174_spill] sm:$0xff]  ;;  %v7071_v10 = vld [vmem:[#allocation97_spill] sm:$0xff] }
 0x9b6   :  { %v7072_v20 = vld [vmem:[#allocation178_spill] sm:$0xff] }
 0x9b7   :  { %3918 = vtanh.f32 %v5778_v42  ;;  %v5781_v4 = vpack.c.bf16 %v2880_v9, %v2880_v9  ;;  %v7073_v50 = vld [vmem:[#allocation98_spill] sm:$0xff]  ;;  %v7076_v9 = vld [vmem:[#allocation180_spill] sm:$0xff] }
 0x9c1   :  { %v3919_v28 = vpop.eup %3918 }
 0x9c2   :  { %v2885_v12 = vmul.f32 %v3919_v28, %v3917_v15  ;;  %v7074_v15 = vld [vmem:[#allocation179_spill] sm:$0xff] }
 0x9c3   :  { %v7075_v28 = vld [vmem:[#allocation99_spill] sm:$0xff] }
 0x9c4   :  { %v2887_v41 = vpack.c.bf16 %v2885_v12, %v2885_v12  ;;  %v7077_v12 = vld [vmem:[#allocation100_spill] sm:$0xff] }
 0x9c6   :  { %2920 = vmatprep.mubr.bf16.mxu1 %v2887_v41  ;;  %2961 = vmatprep.mubr.bf16.mxu0 %v2887_v41 }
 0x9c7   :  { %2921 = vmatmul.mubr.bf16.vlgmr.msra.gmra.mrb[92].mxu1 %v5781_v4  ;;  %2962 = vmatmul.mubr.bf16.vlgmr.msra.gmra.mrb[80].mxu0 %v5781_v4 }
 0x9c8   :  { %2971 = vmatpush1.bf16.msra.mxu1 %v4729_v33  ;;  %3012 = vmatpush1.bf16.msra.mxu0 %v6455_v23 }
 0x9c9   :  { %3002 = vmatprep.mubr.bf16.mxu1 %v2887_v41  ;;  %3043 = vmatprep.mubr.bf16.mxu0 %v2887_v41  ;;  %v7078_v41 = vld [vmem:[#allocation181_spill] sm:$0xff] }
 0x9ca   :  { %2972 = vmatprep.subr.bf16.mxu1 %v4782_v38  ;;  %3013 = vmatprep.subr.bf16.mxu0 %v6456_v55 }
 0x9cc   :  { %2973 = vmatpush1.bf16.msra.mxu1 %v4788_v48  ;;  %3014 = vmatpush1.bf16.msra.mxu0 %v6457_v62 }
 0x9cd   :  { %2974 = vmatprep.subr.bf16.mxu1 %v4792_v39  ;;  %3015 = vmatprep.subr.bf16.mxu0 %v6459_v8 }
 0x9d0   :  { %2975 = vmatpush1.bf16.msra.mxu1 %v6553_v34  ;;  %3016 = vmatpush1.bf16.msra.mxu0 %v6554_v36 }
 0x9d1   :  { %2976 = vmatprep.subr.bf16.mxu1 %v6555_v31  ;;  %3017 = vmatprep.subr.bf16.mxu0 %v6556_v29 }
 0x9d4   :  { %2977 = vmatpush1.bf16.msra.mxu1 %v6557_v37  ;;  %3018 = vmatpush1.bf16.msra.mxu0 %v6558_v16 }
 0x9d5   :  { %2978 = vmatprep.subr.bf16.mxu1 %v6559_v19  ;;  %3019 = vmatprep.subr.bf16.mxu0 %v6560_v32 }
 0x9d8   :  { %2979 = vmatpush1.bf16.msra.mxu1 %v6561_v57  ;;  %3020 = vmatpush1.bf16.msra.mxu0 %v6562_v25 }
 0x9d9   :  { %2980 = vmatprep.subr.bf16.mxu1 %v6563_v7  ;;  %3021 = vmatprep.subr.bf16.mxu0 %v6564_v0 }
 0x9dc   :  { %2981 = vmatpush1.bf16.msra.mxu1 %v6565_v3  ;;  %3022 = vmatpush1.bf16.msra.mxu0 %v6473_v60 }
 0x9dd   :  { %2982 = vmatprep.subr.bf16.mxu1 %v6566_v56  ;;  %3023 = vmatprep.subr.bf16.mxu0 %v6653_v5 }
 0x9e0   :  { %2983 = vmatpush1.bf16.msra.mxu1 %v6654_v13  ;;  %3024 = vmatpush1.bf16.msra.mxu0 %v6477_v27 }
 0x9e1   :  { %2984 = vmatprep.subr.bf16.mxu1 %v6569_v2  ;;  %3025 = vmatprep.subr.bf16.mxu0 %v6655_v22 }
 0x9e4   :  { %2985 = vmatpush1.bf16.msra.mxu1 %v6656_v6  ;;  %3026 = vmatpush1.bf16.msra.mxu0 %v6657_v54 }
 0x9e5   :  { %2986 = vmatprep.subr.bf16.mxu1 %v6571_v18  ;;  %3027 = vmatprep.subr.bf16.mxu0 %v6658_v63 }
 0x9e8   :  { %2987 = vmatpush1.bf16.msra.mxu1 %v6659_v47  ;;  %3028 = vmatpush1.bf16.msra.mxu0 %v4482_v40 }
 0x9e9   :  { %2988 = vmatprep.subr.bf16.mxu1 %v6574_v44  ;;  %3029 = vmatprep.subr.bf16.mxu0 %v6660_v26 }
 0x9ec   :  { %2989 = vmatpush1.bf16.msra.mxu1 %v6661_v53  ;;  %3030 = vmatpush1.bf16.msra.mxu0 %v4494_v51 }
 0x9ed   :  { %2990 = vmatprep.subr.bf16.mxu1 %v6576_v24  ;;  %3031 = vmatprep.subr.bf16.mxu0 %v7057_v14 }
 0x9f0   :  { %2991 = vmatpush1.bf16.msra.mxu1 %v7058_v49  ;;  %3032 = vmatpush1.bf16.msra.mxu0 %v7059_v43 }
 0x9f1   :  { %2992 = vmatprep.subr.bf16.mxu1 %v7060_v11  ;;  %3033 = vmatprep.subr.bf16.mxu0 %v7061_v21 }
 0x9f4   :  { %2993 = vmatpush1.bf16.msra.mxu1 %v7062_v45  ;;  %3034 = vmatpush1.bf16.msra.mxu0 %v7063_v52 }
 0x9f5   :  { %2994 = vmatprep.subr.bf16.mxu1 %v7064_v59  ;;  %3035 = vmatprep.subr.bf16.mxu0 %v7065_v58  ;;  %v7081_v58 = vld [vmem:[#allocation130_spill] sm:$0xff] }
 0x9f8   :  { %2995 = vmatpush1.bf16.msra.mxu1 %v7066_v17  ;;  %3036 = vmatpush1.bf16.msra.mxu0 %v7067_v61  ;;  %v7079_v61 = vld [vmem:[#allocation101_spill] sm:$0xff] }
 0x9f9   :  { %2996 = vmatprep.subr.bf16.mxu1 %v7068_v30  ;;  %3037 = vmatprep.subr.bf16.mxu0 %v7069_v1  ;;  %v7080_v1 = vld [vmem:[#allocation25_spill] sm:$0xff] }
 0x9fc   :  { %2997 = vmatpush1.bf16.msra.mxu1 %v7070_v46  ;;  %3038 = vmatpush1.bf16.msra.mxu0 %v7071_v10 }
 0x9fd   :  { %2998 = vmatprep.subr.bf16.mxu1 %v7072_v20  ;;  %3039 = vmatprep.subr.bf16.mxu0 %v7073_v50  ;;  %v7082_v50 = vld [vmem:[#allocation31_spill] sm:$0xff] }
 0xa00   :  { %2999 = vmatpush1.bf16.msra.mxu1 %v7074_v15  ;;  %3040 = vmatpush1.bf16.msra.mxu0 %v7075_v28  ;;  %v7083_v28 = vld [vmem:[#allocation33_spill] sm:$0xff] }
 0xa01   :  { %3000 = vmatprep.subr.bf16.mxu1 %v7076_v9  ;;  %3041 = vmatprep.subr.bf16.mxu0 %v7077_v12  ;;  %v7084_v12 = vld [vmem:[#allocation35_spill] sm:$0xff] }
 0xa04   :  { %3001 = vmatpush1.bf16.msra.mxu1 %v7078_v41  ;;  %3042 = vmatpush1.bf16.msra.mxu0 %v7079_v61  ;;  %v7085_v61 = vld [vmem:[#allocation37_spill] sm:$0xff] }
 0xa05   :  { %3102 = vmatprep.subr.bf16.mxu1 %v7080_v1  ;;  %3142 = vmatprep.subr.bf16.mxu0 %v7081_v58  ;;  %v7086_v58 = vld [vmem:[#allocation39_spill] sm:$0xff]  ;;  %v7115_v1 = vld [vmem:[#allocation102_spill] sm:$0xff] }
 0xa07   :  { %3003 = vmatmul.mubr.bf16.vlgmr.msra.gmra.mrb[96].mxu1 %v5781_v4  ;;  %3044 = vmatmul.mubr.bf16.vlgmr.msra.gmra.mrb[84].mxu0 %v5781_v4  ;;  %v7087_v4 = vld [vmem:[#allocation41_spill] sm:$0xff] }
 0xa08   :  { %3103 = vmatpush1.bf16.msra.mxu1 %v7082_v50  ;;  %3143 = vmatpush1.bf16.msra.mxu0 %v4729_v33  ;;  %v7088_v33 = vld [vmem:[#allocation43_spill] sm:$0xff] }
 0xa09   :  { %3104 = vmatprep.subr.bf16.mxu1 %v7083_v28  ;;  %3144 = vmatprep.subr.bf16.mxu0 %v4782_v38  ;;  %v7089_v38 = vld [vmem:[#allocation45_spill] sm:$0xff] }
 0xa0c   :  { %3105 = vmatpush1.bf16.msra.mxu1 %v7084_v12  ;;  %3145 = vmatpush1.bf16.msra.mxu0 %v4788_v48  ;;  %v7090_v48 = vld [vmem:[#allocation47_spill] sm:$0xff]  ;;  %v7117_v12 = vld [vmem:[#allocation117_spill] sm:$0xff] }
 0xa0d   :  { %3106 = vmatprep.subr.bf16.mxu1 %v7085_v61  ;;  %3146 = vmatprep.subr.bf16.mxu0 %v4792_v39  ;;  %v7091_v39 = vld [vmem:[#allocation49_spill] sm:$0xff] }
 0xa0e   :  { %v7113_v61 = vld [vmem:[#allocation53_spill] sm:$0xff] }
 0xa10   :  { %3107 = vmatpush1.bf16.msra.mxu1 %v7086_v58  ;;  %3147 = vmatpush1.bf16.msra.mxu0 %v6553_v34  ;;  %v7092_v34 = vld [vmem:[#allocation51_spill] sm:$0xff] }
 0xa11   :  { %3108 = vmatprep.subr.bf16.mxu1 %v7087_v4  ;;  %3148 = vmatprep.subr.bf16.mxu0 %v6555_v31  ;;  %v7093_v31 = vld [vmem:[#allocation52_spill] sm:$0xff] }
 0xa14   :  { %3109 = vmatpush1.bf16.msra.mxu1 %v7088_v33  ;;  %3149 = vmatpush1.bf16.msra.mxu0 %v6557_v37  ;;  %v7094_v37 = vld [vmem:[#allocation54_spill] sm:$0xff] }
 0xa15   :  { %3110 = vmatprep.subr.bf16.mxu1 %v7089_v38  ;;  %3150 = vmatprep.subr.bf16.mxu0 %v6559_v19  ;;  %v7095_v19 = vld [vmem:[#allocation56_spill] sm:$0xff] }
 0xa18   :  { %3111 = vmatpush1.bf16.msra.mxu1 %v7090_v48  ;;  %3151 = vmatpush1.bf16.msra.mxu0 %v6561_v57  ;;  %v7096_v57 = vld [vmem:[#allocation58_spill] sm:$0xff] }
 0xa19   :  { %3112 = vmatprep.subr.bf16.mxu1 %v7091_v39  ;;  %3152 = vmatprep.subr.bf16.mxu0 %v6563_v7  ;;  %v7097_v7 = vld [vmem:[#allocation60_spill] sm:$0xff] }
 0xa1c   :  { %3113 = vmatpush1.bf16.msra.mxu1 %v7092_v34  ;;  %3153 = vmatpush1.bf16.msra.mxu0 %v6565_v3  ;;  %v7098_v3 = vld [vmem:[#allocation62_spill] sm:$0xff] }
 0xa1d   :  { %3114 = vmatprep.subr.bf16.mxu1 %v7093_v31  ;;  %3154 = vmatprep.subr.bf16.mxu0 %v6566_v56  ;;  %v7099_v56 = vld [vmem:[#allocation64_spill] sm:$0xff] }
 0xa20   :  { %3115 = vmatpush1.bf16.msra.mxu1 %v7094_v37  ;;  %3155 = vmatpush1.bf16.msra.mxu0 %v6654_v13  ;;  %v7100_v13 = vld [vmem:[#allocation66_spill] sm:$0xff] }
 0xa21   :  { %3116 = vmatprep.subr.bf16.mxu1 %v7095_v19  ;;  %3156 = vmatprep.subr.bf16.mxu0 %v6569_v2  ;;  %v7101_v2 = vld [vmem:[#allocation68_spill] sm:$0xff] }
 0xa24   :  { %3117 = vmatpush1.bf16.msra.mxu1 %v7096_v57  ;;  %3157 = vmatpush1.bf16.msra.mxu0 %v6656_v6  ;;  %v7102_v6 = vld [vmem:[#allocation70_spill] sm:$0xff] }
 0xa25   :  { %3118 = vmatprep.subr.bf16.mxu1 %v7097_v7  ;;  %3158 = vmatprep.subr.bf16.mxu0 %v6571_v18  ;;  %v7103_v18 = vld [vmem:[#allocation72_spill] sm:$0xff] }
 0xa28   :  { %3119 = vmatpush1.bf16.msra.mxu1 %v7098_v3  ;;  %3159 = vmatpush1.bf16.msra.mxu0 %v6659_v47  ;;  %v7104_v47 = vld [vmem:[#allocation74_spill] sm:$0xff] }
 0xa29   :  { %3120 = vmatprep.subr.bf16.mxu1 %v7099_v56  ;;  %3160 = vmatprep.subr.bf16.mxu0 %v6574_v44  ;;  %v7105_v44 = vld [vmem:[#allocation76_spill] sm:$0xff] }
 0xa2c   :  { %3121 = vmatpush1.bf16.msra.mxu1 %v7100_v13  ;;  %3161 = vmatpush1.bf16.msra.mxu0 %v6661_v53  ;;  %v7106_v53 = vld [vmem:[#allocation78_spill] sm:$0xff] }
 0xa2d   :  { %3122 = vmatprep.subr.bf16.mxu1 %v7101_v2  ;;  %3162 = vmatprep.subr.bf16.mxu0 %v6576_v24  ;;  %v7107_v24 = vld [vmem:[#allocation80_spill] sm:$0xff] }
 0xa30   :  { %3123 = vmatpush1.bf16.msra.mxu1 %v7102_v6  ;;  %3163 = vmatpush1.bf16.msra.mxu0 %v7058_v49  ;;  %v7108_v49 = vld [vmem:[#allocation82_spill] sm:$0xff] }
 0xa31   :  { %3124 = vmatprep.subr.bf16.mxu1 %v7103_v18  ;;  %3164 = vmatprep.subr.bf16.mxu0 %v7060_v11  ;;  %v7109_v11 = vld [vmem:[#allocation84_spill] sm:$0xff] }
 0xa34   :  { %3125 = vmatpush1.bf16.msra.mxu1 %v7104_v47  ;;  %3165 = vmatpush1.bf16.msra.mxu0 %v7062_v45  ;;  %v7110_v45 = vld [vmem:[#allocation86_spill] sm:$0xff] }
 0xa35   :  { %3126 = vmatprep.subr.bf16.mxu1 %v7105_v44  ;;  %3166 = vmatprep.subr.bf16.mxu0 %v7064_v59  ;;  %v7111_v59 = vld [vmem:[#allocation87_spill] sm:$0xff] }
 0xa36   :  { %v7120_v44 = vld [vmem:[#allocation103_spill] sm:$0xff] }
 0xa38   :  { %3127 = vmatpush1.bf16.msra.mxu1 %v7106_v53  ;;  %3167 = vmatpush1.bf16.msra.mxu0 %v7066_v17  ;;  %v7112_v17 = vld [vmem:[#allocation89_spill] sm:$0xff]  ;;  %v7121_v53 = vld [vmem:[#allocation139_spill] sm:$0xff] }
 0xa39   :  { %3128 = vmatprep.subr.bf16.mxu1 %v7107_v24  ;;  %3168 = vmatprep.subr.bf16.mxu0 %v7068_v30  ;;  %v7114_v30 = vmov 0.0   ;;  %v573_v24 = vadd.f32 %v7121_v53, %v7120_v44 }
 0xa3c   :  { %3129 = vmatpush1.bf16.msra.mxu1 %v7108_v49  ;;  %3169 = vmatpush1.bf16.msra.mxu0 %v7070_v46  ;;  %v7116_v46 = vld [vmem:[#allocation146_spill] sm:$0xff]  ;;  %v7122_v49 = vld [vmem:[#allocation124_spill] sm:$0xff] }
 0xa3d   :  { %3130 = vmatprep.subr.bf16.mxu1 %v7109_v11  ;;  %3170 = vmatprep.subr.bf16.mxu0 %v7072_v20  ;;  %v464_v50 = vadd.f32 %v7116_v46, %v7115_v1  ;;  %v7123_v11 = vld [vmem:[#allocation142_spill] sm:$0xff] }
 0xa40   :  { %3131 = vmatpush1.bf16.msra.mxu1 %v7110_v45  ;;  %3171 = vmatpush1.bf16.msra.mxu0 %v7074_v15  ;;  %v7118_v15 = vld [vmem:[#allocation145_spill] sm:$0xff]  ;;  %v575_v45 = vadd.f32 %v7123_v11, %v7122_v49 }
 0xa41   :  { %3132 = vmatprep.subr.bf16.mxu1 %v7111_v59  ;;  %3172 = vmatprep.subr.bf16.mxu0 %v7076_v9  ;;  %v7119_v9 = vld [vmem:[#allocation119_spill] sm:$0xff]  ;;  %v7124_v59 = vld [vmem:[#allocation104_spill] sm:$0xff] }
 0xa44   :  { %3133 = vmatpush1.bf16.msra.mxu1 %v7112_v17  ;;  %3173 = vmatpush1.bf16.msra.mxu0 %v7078_v41  ;;  %v7125_v17 = vld [vmem:[#allocation160_spill] sm:$0xff] }
 0xa45   :  { %3183 = vmatprep.subr.bf16.mxu1 %v7113_v61  ;;  %3600 = vmatprep.subr.bf16.mxu0 %v7114_v30  ;;  %v687_v61 = vadd.f32 %v7125_v17, %v7124_v59 }
 0xa9a   :  { %v2922_v20 = vpop.f32.mrb[92].mxu1  ;;  %v2963_v28 = vpop.f32.mrb[80].mxu0 }
 0xa9b   :  { %v2923_v58 = vadd.f32 %v2922_v20, %v7117_v12  ;;  %v2964_v4 = vadd.f32 %v2963_v28, %v7118_v15  ;;  %v2924_v33 = vpop.f32.mrb[93].mxu1  ;;  %v2965_v38 = vpop.f32.mrb[81].mxu0  ;;  %v7126_v28 = vld [vmem:[#allocation159_spill] sm:$0xff] }
 0xa9c   :  { %v2925_v48 = vadd.f32 %v2924_v33, %v7119_v9  ;;  %v2966_v39 = vadd.f32 %v2965_v38, %v464_v50  ;;  %v2926_v34 = vpop.f32.mrb[94].mxu1  ;;  %v2967_v41 = vpop.f32.mrb[82].mxu0 }
 0xa9d   :  { %v2927_v31 = vpop.f32.mrb[95].mxu1  ;;  %v2968_v37 = vpop.f32.mrb[83].mxu0  ;;  %v3573_v19 = vmul.f32 -1.442695, %v2923_v58  ;;  %v3575_v2 = vmul.f32 -1.442695, %v2964_v4 }
 0xa9e   :  { %v3574_v57 = vmul.f32 -1.442695, %v2925_v48  ;;  %v3576_v7 = vmul.f32 -1.442695, %v2966_v39 }
 0xa9f   :  { %3920 = vpow2.f32 %v3573_v19 }
 0xaa0   :  { %3922 = vpow2.f32 %v3574_v57 }
 0xaa1   :  { %3924 = vpow2.f32 %v3576_v7 }
 0xaa2   :  { %3926 = vpow2.f32 %v3575_v2 }
 0xaa9   :  { %v3921_v3 = vpop.eup %3920 }
 0xaaa   :  { %v3923_v56 = vpop.eup %3922  ;;  %v3070_v6 = vadd.f32 1.0, %v3921_v3 }
 0xaab   :  { %v3925_v13 = vpop.eup %3924  ;;  %v3071_v18 = vadd.f32 1.0, %v3923_v56 }
 0xaac   :  { %v3073_v47 = vadd.f32 1.0, %v3925_v13  ;;  %3928 = vrcp.f32 %v3070_v6  ;;  %v3927_v41 = vpop.eup %3926 }
 0xaad   :  { %3930 = vrcp.f32 %v3071_v18  ;;  %v3072_v3 = vadd.f32 1.0, %v3927_v41 }
 0xaae   :  { %3932 = vrcp.f32 %v3073_v47 }
 0xab6   :  { %v3929_v31 = vpop.eup %3928 }
 0xab7   :  { %v3931_v37 = vpop.eup %3930 }
 0xab8   :  { %v3933_v57 = vpop.eup %3932  ;;  %v3090_v13 = vmul.f32 %v3931_v37, %v5774_v35 }
 0xada   :  { %v3004_v46 = vpop.f32.mrb[96].mxu1  ;;  %v3045_v50 = vpop.f32.mrb[84].mxu0 }
 0xadb   :  { %v3005_v20 = vadd.f32 %v3004_v46, %v573_v24  ;;  %v3046_v12 = vadd.f32 %v3045_v50, %v7126_v28  ;;  %v3006_v58 = vpop.f32.mrb[97].mxu1  ;;  %v3047_v15 = vpop.f32.mrb[85].mxu0 }
 0xadc   :  { %v3007_v4 = vadd.f32 %v3006_v58, %v575_v45  ;;  %v3048_v33 = vadd.f32 %v3047_v15, %v687_v61  ;;  %v3008_v38 = vpop.f32.mrb[98].mxu1  ;;  %v3049_v9 = vpop.f32.mrb[86].mxu0 }
 0xadd   :  { %v3577_v48 = vmul.f32 -1.442695, %v3005_v20  ;;  %3934 = vtanh.f32 %v3046_v12  ;;  %v3009_v39 = vpop.f32.mrb[99].mxu1  ;;  %v3050_v34 = vpop.f32.mrb[87].mxu0 }
 0xade   :  { %3936 = vtanh.f32 %v3048_v33  ;;  %v3578_v19 = vmul.f32 -1.442695, %v3007_v4 }
 0xadf   :  { %3938 = vpow2.f32 %v3577_v48 }
 0xae0   :  { %3940 = vpow2.f32 %v3578_v19 }
 0xae1   :  { %3942 = vrcp.f32 %v3072_v3 }
 0xae7   :  { %v3935_v7 = vpop.eup %3934 }
 0xae8   :  { %v3937_v56 = vpop.eup %3936  ;;  %v3091_v2 = vmul.f32 %v3935_v7, %v3929_v31 }
 0xae9   :  { %v3939_v6 = vpop.eup %3938  ;;  %v3096_v18 = vmul.f32 %v3937_v56, %v3933_v57 }
 0xaea   :  { %v3074_v47 = vadd.f32 1.0, %v3939_v6  ;;  %v3092_v53 = vadd.f32 %v3091_v2, %v3090_v13  ;;  %v3941_v24 = vpop.eup %3940 }
 0xaeb   :  { %v3943_v11 = vpop.eup %3942  ;;  %v3075_v17 = vadd.f32 1.0, %v3941_v24 }
 0xaec   :  { %3944 = vrcp.f32 %v3074_v47 }
 0xaed   :  { %3946 = vtanh.f32 %v3092_v53 }
 0xaee   :  { %3948 = vrcp.f32 %v3075_v17 }
 0xaf6   :  { %v3945_v45 = vpop.eup %3944 }
 0xaf7   :  { %v3947_v61 = vpop.eup %3946  ;;  %v3095_v46 = vmul.f32 %v3945_v45, %v5778_v42 }
 0xaf8   :  { %v3094_v50 = vmul.f32 %v3947_v61, %v3943_v11  ;;  %v3949_v35 = vpop.eup %3948 }
 0xaf9   :  { %v5929_v20 = vadd.f32 %v3096_v18, %v3095_v46 }
 0xafa   :  { %v3100_v15 = vpack.c.bf16 %v3094_v50, %v3094_v50 }
 0xafb   :  { %3950 = vtanh.f32 %v5929_v20 }
 0xb05   :  { %v3951_v28 = vpop.eup %3950 }
 0xb06   :  { %v3099_v12 = vmul.f32 %v3951_v28, %v3949_v35 }
 0xb08   :  { %v3101_v58 = vpack.c.bf16 %v3099_v12, %v3099_v12 }
 0xb0a   :  { %3134 = vmatprep.mubr.bf16.mxu1 %v3101_v58  ;;  %3174 = vmatprep.mubr.bf16.mxu0 %v3101_v58 }
 0xb0b   :  { %3135 = vmatmul.mubr.bf16.vlgmr.msra.gmra.mrb[100].mxu1 %v3100_v15  ;;  %3175 = vmatmul.mubr.bf16.vlgmr.msra.gmra.mrb[88].mxu0 %v3100_v15 }
 0xb0c   :  { %3184 = vmatpush1.bf16.msra.mxu1 %v6455_v23  ;;  %3215 = vmatprep.mubr.bf16.mxu1 %v3101_v58  ;;  %v7127_v23 = vld [vmem:[#allocation94_spill] sm:$0xff] }
 0xb0d   :  { %3185 = vmatprep.subr.bf16.mxu1 %v6456_v55  ;;  %v7128_v55 = vld [vmem:[#allocation95_spill] sm:$0xff]  ;;  %3616 = vmatprep.mubr.msk.bf16.mxu0 %vm4025_vm9, %v7114_v30 }
 0xb10   :  { %3186 = vmatpush1.bf16.msra.mxu1 %v6457_v62  ;;  %v7129_v62 = vld [vmem:[#allocation96_spill] sm:$0xff] }
 0xb11   :  { %3187 = vmatprep.subr.bf16.mxu1 %v6459_v8  ;;  %v7133_v8 = vld [vmem:[#allocation101_spill] sm:$0xff] }
 0xb14   :  { %3188 = vmatpush1.bf16.msra.mxu1 %v6554_v36  ;;  %v3705_v36 = vld [vmem:[%s6010_s4 + $0x8] sm:$0xff]  }
 0xb15   :  { %3189 = vmatprep.subr.bf16.mxu1 %v6556_v29  ;;  %v3706_v29 = vld [vmem:[%s6010_s4 + $0x10] sm:$0xff]  }
 0xb18   :  { %3190 = vmatpush1.bf16.msra.mxu1 %v6558_v16  ;;  %v3707_v16 = vld [vmem:[%s6010_s4 + $0x18] sm:$0xff]  }
 0xb19   :  { %3191 = vmatprep.subr.bf16.mxu1 %v6560_v32  ;;  %v3708_v32 = vld [vmem:[%s6010_s4 + $0x20] sm:$0xff]  }
 0xb1c   :  { %3192 = vmatpush1.bf16.msra.mxu1 %v6562_v25  ;;  %v3709_v25 = vld [vmem:[%s6010_s4 + $0x28] sm:$0xff]  }
 0xb1d   :  { %3193 = vmatprep.subr.bf16.mxu1 %v6564_v0  ;;  %v3710_v0 = vld [vmem:[%s6010_s4 + $0x30] sm:$0xff]  }
 0xb20   :  { %3194 = vmatpush1.bf16.msra.mxu1 %v6473_v60  ;;  %v7131_v60 = vld [vmem:[#allocation99_spill] sm:$0xff] }
 0xb21   :  { %3195 = vmatprep.subr.bf16.mxu1 %v6653_v5  ;;  %v3711_v5 = vld [vmem:[%s6010_s4 + $0x38] sm:$0xff]  }
 0xb24   :  { %3196 = vmatpush1.bf16.msra.mxu1 %v6477_v27  ;;  %v3704_v27 = vld [vmem:[%s6010_s4] sm:$0xff]  }
 0xb25   :  { %3197 = vmatprep.subr.bf16.mxu1 %v6655_v22  ;;  %3601 = vmatpush3.bf16.msra.mxu0 %v3704_v27 }
 0xb26   :  { %3602 = vmatprep.subr.bf16.mxu0 %v7114_v30 }
 0xb28   :  { %3198 = vmatpush1.bf16.msra.mxu1 %v6657_v54 }
 0xb29   :  { %3199 = vmatprep.subr.bf16.mxu1 %v6658_v63  ;;  %3603 = vmatpush3.bf16.msra.mxu0 %v3705_v36 }
 0xb2a   :  { %3604 = vmatprep.subr.bf16.mxu0 %v7114_v30 }
 0xb2c   :  { %3200 = vmatpush1.bf16.msra.mxu1 %v4482_v40  ;;  %v7130_v40 = vld [vmem:[#allocation98_spill] sm:$0xff] }
 0xb2d   :  { %3201 = vmatprep.subr.bf16.mxu1 %v6660_v26  ;;  %3605 = vmatpush3.bf16.msra.mxu0 %v3706_v29 }
 0xb2e   :  { %3606 = vmatprep.subr.bf16.mxu0 %v7114_v30 }
 0xb30   :  { %3202 = vmatpush1.bf16.msra.mxu1 %v4494_v51  ;;  %v7132_v51 = vld [vmem:[#allocation100_spill] sm:$0xff] }
 0xb31   :  { %3203 = vmatprep.subr.bf16.mxu1 %v7057_v14  ;;  %3607 = vmatpush3.bf16.msra.mxu0 %v3707_v16 }
 0xb32   :  { %3608 = vmatprep.subr.bf16.mxu0 %v7114_v30 }
 0xb34   :  { %3204 = vmatpush1.bf16.msra.mxu1 %v7059_v43 }
 0xb35   :  { %3205 = vmatprep.subr.bf16.mxu1 %v7061_v21  ;;  %3609 = vmatpush3.bf16.msra.mxu0 %v3708_v32 }
 0xb36   :  { %3610 = vmatprep.subr.bf16.mxu0 %v7114_v30 }
 0xb38   :  { %3206 = vmatpush1.bf16.msra.mxu1 %v7063_v52 }
 0xb39   :  { %3207 = vmatprep.subr.bf16.mxu1 %v7127_v23  ;;  %3611 = vmatpush3.bf16.msra.mxu0 %v3709_v25 }
 0xb3a   :  { %3612 = vmatprep.subr.bf16.mxu0 %v7114_v30 }
 0xb3c   :  { %3208 = vmatpush1.bf16.msra.mxu1 %v7128_v55 }
 0xb3d   :  { %3209 = vmatprep.subr.bf16.mxu1 %v7129_v62  ;;  %3613 = vmatpush3.bf16.msra.mxu0 %v3710_v0 }
 0xb3e   :  { %3614 = vmatprep.subr.bf16.mxu0 %v7114_v30 }
 0xb40   :  { %3210 = vmatpush1.bf16.msra.mxu1 %v7071_v10 }
 0xb41   :  { %3211 = vmatprep.subr.bf16.mxu1 %v7130_v40  ;;  %3615 = vmatpush3.bf16.msra.mxu0 %v3711_v5 }
 0xb44   :  { %3212 = vmatpush1.bf16.msra.mxu1 %v7131_v60 }
 0xb45   :  { %3213 = vmatprep.subr.bf16.mxu1 %v7132_v51 }
 0xb48   :  { %3214 = vmatpush1.bf16.msra.mxu1 %v7133_v8 }
 0xb4b   :  { %3216 = vmatmul.mubr.bf16.vlgmr.msra.gmra.mrb[104].mxu1 %v3100_v15 }
 0xbde   :  { %v3136_v22 = vpop.f32.mrb[100].mxu1  ;;  %v3176_v54 = vpop.f32.mrb[88].mxu0 }
 0xbdf   :  { %v3137_v63 = vpop.f32.mrb[101].mxu1  ;;  %v3178_v26 = vpop.f32.mrb[89].mxu0  ;;  %v3177_v52 = vadd.f32 %v3176_v54, %v7120_v44 }
 0xbe0   :  { %v3139_v42 = vpop.f32.mrb[102].mxu1  ;;  %v3180_v14 = vpop.f32.mrb[90].mxu0  ;;  %v3138_v10 = vadd.f32 %v3137_v63, %v7115_v1  ;;  %v3179_v38 = vadd.f32 %v3178_v26, %v7122_v49 }
 0xbe1   :  { %v3140_v43 = vpop.f32.mrb[103].mxu1  ;;  %v3181_v21 = vpop.f32.mrb[91].mxu0  ;;  %v3580_v4 = vmul.f32 -1.442695, %v3177_v52 }
 0xbe2   :  { %v3579_v33 = vmul.f32 -1.442695, %v3138_v10  ;;  %v3581_v48 = vmul.f32 -1.442695, %v3179_v38 }
 0xbe3   :  { %3952 = vpow2.f32 %v3580_v4 }
 0xbe4   :  { %3954 = vpow2.f32 %v3579_v33 }
 0xbe5   :  { %3956 = vpow2.f32 %v3581_v48 }
 0xbed   :  { %v3953_v30 = vpop.eup %3952 }
 0xbee   :  { %v3955_v9 = vpop.eup %3954  ;;  %v3233_v39 = vadd.f32 1.0, %v3953_v30 }
 0xbef   :  { %v3232_v34 = vadd.f32 1.0, %v3955_v9  ;;  %v3957_v19 = vpop.eup %3956 }
 0xbf0   :  { %3958 = vrcp.f32 %v3233_v39  ;;  %v3234_v49 = vadd.f32 1.0, %v3957_v19 }
 0xbf1   :  { %3960 = vrcp.f32 %v3232_v34 }
 0xbfa   :  { %v3959_v57 = vpop.eup %3958 }
 0xbfb   :  { %v3961_v7 = vpop.eup %3960  ;;  %v3242_v56 = vmul.f32 %v3959_v57, %v5929_v20 }
 0xc1e   :  { %v3217_v41 = vpop.f32.mrb[104].mxu1 }
 0xc1f   :  { %v3218_v31 = vpop.f32.mrb[105].mxu1 }
 0xc20   :  { %v3219_v37 = vadd.f32 %v3218_v31, %v7124_v59  ;;  %v3220_v44 = vpop.f32.mrb[106].mxu1  ;;  %v3582_v59 = vld [vmem:[%s6011_s5] ss:$0 sm:$0xff] }
 0xc21   :  { %v3221_v1 = vpop.f32.mrb[107].mxu1 }
 0xc22   :  { %3962 = vtanh.f32 %v3219_v37 }
 0xc23   :  { %3964 = vrcp.f32 %v3234_v49 }
 0xc2c   :  { %v3963_v3 = vpop.eup %3962 }
 0xc2d   :  { %v3243_v13 = vmul.f32 %v3963_v3, %v3961_v7  ;;  %v3965_v6 = vpop.eup %3964 }
 0xc2f   :  { %v3244_v2 = vadd.f32 %v3243_v13, %v3242_v56 }
 0xc31   :  { %3966 = vtanh.f32 %v3244_v2 }
 0xc3b   :  { %v3967_v18 = vpop.eup %3966 }
 0xc3c   :  { %v3246_v47 = vmul.f32 %v3967_v18, %v3965_v6 }
 0xc3e   :  { %v3247_v53 = vpack.c.bf16 %v3246_v47, %v3246_v47 }
 0xc40   :  { %3617 = vmatmul.mubr.bf16.vlgmr.msra.gmra.mrb[92].mxu0 %v3247_v53 }
 0xd13   :  { %v3353_v24 = vpop.f32.mrb[92].mxu0 }
 0xd14   :  { %v3354_v11 = vadd.f32 %v3582_v59, %v3353_v24  ;;  %v3618_v45 = vpop.f32.mrb[93].mxu0 }
 0xd15   :  { %v3356_v17 = vpop.f32.mrb[94].mxu0 }
 0xd16   :  { %3359 = vst [vmem:[%s6012_s6] sm:$0xff] %v3354_v11  ;;  %v3619_v61 = vpop.f32.mrb[95].mxu0 }
 0xd17   :  { %3364 = vsyncpa [#allocation3], 1 }
 0xd18   :  { %3365 = vsyncpa [#allocation5], 1 }

</bundles_post_ra>
